<compile_context>
chip_gen: v7x
topology: tpu7x:2x2x1
jax: 0.10.0
libtpu: 0.0.40
codegen_flags: <defaults>
</compile_context>

<pallas_src>
import jax
import jax.numpy as jnp
from jax.experimental import pallas as pl
from jax.experimental.pallas import tpu as pltpu

VMEM_SPEC = pl.BlockSpec(memory_space=pltpu.MemorySpace.VMEM)


# ---------------------------------------------------------------------------
# Fused kernel: action/speed MLPs + 2-layer LSTM (PyTorch gate order i,f,g,o,
# zero init state, dropout=0) + output_fc.
# ---------------------------------------------------------------------------
def _encoder_kernel(
    vis_ref,                                  # (T*B, V)  f32, time-major rows
    action_ref, speed_ref,                    # (B, 3)    f32
    aw1_ref, ab1_ref, aw2_ref, ab2_ref,       # action MLP params, f32
    sw1_ref, sb1_ref, sw2_ref, sb2_ref,       # speed  MLP params, f32
    wih0v_ref,                                # (V,   4H) bf16  vis cols of W_ih_l0^T
    wih0as_ref,                               # (A+S, 4H) bf16  act|spd cols of W_ih_l0^T
    whh0_ref,                                 # (H,   4H) bf16  W_hh_l0^T
    b0_ref,                                   # (1,   4H) f32   b_ih_l0 + b_hh_l0
    w1cat_ref,                                # (2H,  4H) bf16  [W_ih_l1^T ; W_hh_l1^T]
    b1_ref,                                   # (1,   4H) f32   b_ih_l1 + b_hh_l1
    fcw_ref, fcb_ref,                         # (4H, out) bf16 / (1, out) f32
    out_ref,                                  # (B, out)  f32
    hn_ref, cn_ref,                           # (2, B, H) f32
    y_scr,                                    # VMEM scratch (B, 4H) f32
):
    TB, V = vis_ref.shape
    H = whh0_ref.shape[0]
    B = action_ref.shape[0]
    T = TB // B
    f32 = jnp.float32
    bf16 = jnp.bfloat16

    # ---- tiny 2-layer MLPs (contraction dims 3 and 16 -> VPU broadcast MACs) ----
    def mlp(x, w1, b1, w2, b2):
        h = jnp.broadcast_to(b1, (x.shape[0], w1.shape[1]))
        for k in range(w1.shape[0]):
            h = h + x[:, k:k + 1] * w1[k:k + 1, :]
        h = jnp.maximum(h, 0.0)                          # ReLU
        o = jnp.broadcast_to(b2, (x.shape[0], w2.shape[1]))
        for k in range(w2.shape[0]):
            o = o + h[:, k:k + 1] * w2[k:k + 1, :]
        return o

    a = mlp(action_ref[...], aw1_ref[...], ab1_ref[...], aw2_ref[...], ab2_ref[...])
    s = mlp(speed_ref[...], sw1_ref[...], sb1_ref[...], sw2_ref[...], sb2_ref[...])
    as_cat = jnp.concatenate([a, s], axis=1)             # (B, A+S) 128-lane slab

    # ---- hoisted, non-recurrent gate projections (one MXU op each) ----
    # vis contribution for all timesteps at once: (T*B, V) @ (V, 4H)
    gx = jnp.dot(vis_ref[...].astype(bf16), wih0v_ref[...],
                 preferred_element_type=f32)             # (T*B, 4H)
    # action/speed contribution is identical for every timestep: compute once.
    base0 = (jnp.dot(as_cat.astype(bf16), wih0as_ref[...],
                     preferred_element_type=f32) + b0_ref[...])   # (B, 4H)
    b1v = b1_ref[...]
    whh0 = whh0_ref[...]
    w1cat = w1cat_ref[...]

    def gate_math(gates, c):
        # PyTorch gate order: i, f, g, o  (all math in f32; v5e has no bf16 VPU/EUP)
        i = jax.nn.sigmoid(gates[:, 0:H])
        f = jax.nn.sigmoid(gates[:, H:2 * H])
        g = jnp.tanh(gates[:, 2 * H:3 * H])
        o = jax.nn.sigmoid(gates[:, 3 * H:4 * H])
        c_new = f * c + i * g
        h_new = o * jnp.tanh(c_new)
        return h_new, c_new

    z = jnp.zeros((B, H), f32)
    h0, c0, h1, c1 = z, z, z, z

    # T=4: fully unrolled; layer 0 and layer 1 interleaved per step so only one
    # layer-0 output is live and layer-1's matmul overlaps layer-0's gate math.
    for t in range(T):
        g0 = (gx[t * B:(t + 1) * B, :] + base0
              + jnp.dot(h0.astype(bf16), whh0, preferred_element_type=f32))
        h0, c0 = gate_math(g0, c0)

        xh = jnp.concatenate([h0, h1], axis=1).astype(bf16)       # (B, 2H)
        g1 = jnp.dot(xh, w1cat, preferred_element_type=f32) + b1v
        h1, c1 = gate_math(g1, c1)

        # lane-dense accumulation of y.reshape(B, -1): row b = [h1_t0 | h1_t1 | ...]
        y_scr[:, t * H:(t + 1) * H] = h1

    # ---- output_fc fused: (B, 4H) @ (4H, out) ----
    out_ref[...] = (jnp.dot(y_scr[...].astype(bf16), fcw_ref[...],
                            preferred_element_type=f32) + fcb_ref[...])

    hn_ref[0] = h0
    hn_ref[1] = h1
    cn_ref[0] = c0
    cn_ref[1] = c1


# ---------------------------------------------------------------------------
# Wrapper: single pallas_call; only glue is a zero/near-zero-cost reshape +
# tiny transpose to present vis in time-major row order.
# ---------------------------------------------------------------------------
def vanilla_rnn_encoder_forward(embedding, action, speed, p):
    B, T = embedding.shape[0], embedding.shape[1]
    C, Hs, Ws = embedding.shape[-3], embedding.shape[-2], embedding.shape[-1]
    assert T == 4, "forward hard-codes 4 timesteps (cat of 4 copies)"
    V = C * Hs * Ws
    H = p["whh0"].shape[0]
    out_dim = p["fc_w"].shape[1]

    # time-major flattened vis: rows for step t are contiguous (t*B : (t+1)*B)
    vis_tm = jnp.transpose(embedding.reshape(B, T, V), (1, 0, 2)).reshape(T * B, V)

    out, hn, cn = pl.pallas_call(
        _encoder_kernel,
        out_shape=(
            jax.ShapeDtypeStruct((B, out_dim), jnp.float32),   # output_fc(y)
            jax.ShapeDtypeStruct((2, B, H), jnp.float32),      # h_n
            jax.ShapeDtypeStruct((2, B, H), jnp.float32),      # c_n
        ),
        in_specs=[VMEM_SPEC] * 19,
        out_specs=(VMEM_SPEC, VMEM_SPEC, VMEM_SPEC),
        scratch_shapes=[pltpu.VMEM((B, 4 * H), jnp.float32)],
    )(vis_tm, action, speed,
      p["act_w1"], p["act_b1"], p["act_w2"], p["act_b2"],
      p["spd_w1"], p["spd_b1"], p["spd_w2"], p["spd_b2"],
      p["wih0_vis"], p["wih0_as"], p["whh0"], p["b0"],
      p["w1_cat"], p["b1"],
      p["fc_w"], p["fc_b"])

    return out.reshape(-1, C, Hs, Ws), (hn, cn)


# ---------------------------------------------------------------------------
# Deterministic parameter init.  Layouts are the PyTorch parameters transposed
# / split / stacked for the fused kernel:
#   wih0_vis  = weight_ih_l0.T[:V]            wih0_as = weight_ih_l0.T[V:]
#   whh0      = weight_hh_l0.T                b0      = bias_ih_l0 + bias_hh_l0
#   w1_cat    = [weight_ih_l1.T ; weight_hh_l1.T]   b1 = bias_ih_l1 + bias_hh_l1
#   fc_w/fc_b = output_fc.weight.T / bias
# Big matmul weights are bf16 (f32 accumulation in-kernel); biases/MLP f32.
# ---------------------------------------------------------------------------
def init_params(key, vis_dim, action_chn, speed_chn, hidden, out_dim):
    ks = jax.random.split(key, 16)
    f = lambda k, shape, scale=0.05: (scale * jax.random.normal(k, shape)).astype(jnp.float32)
    bf = jnp.bfloat16
    return {
        # action_cod: Linear(3,16) -> ReLU -> Linear(16, action_chn)
        "act_w1": f(ks[0], (3, 16)), "act_b1": f(ks[1], (1, 16)),
        "act_w2": f(ks[2], (16, action_chn)), "act_b2": f(ks[3], (1, action_chn)),
        # speed_cod
        "spd_w1": f(ks[4], (3, 16)), "spd_b1": f(ks[5], (1, 16)),
        "spd_w2": f(ks[6], (16, speed_chn)), "spd_b2": f(ks[7], (1, speed_chn)),
        # LSTM layer 0
        "wih0_vis": f(ks[8], (vis_dim, 4 * hidden)).astype(bf),
        "wih0_as":  f(ks[9], (action_chn + speed_chn, 4 * hidden)).astype(bf),
        "whh0":     f(ks[10], (hidden, 4 * hidden)).astype(bf),
        "b0":       f(ks[11], (1, 4 * hidden)),
        # LSTM layer 1 (input and hidden weights stacked)
        "w1_cat":   f(ks[12], (2 * hidden, 4 * hidden)).astype(bf),
        "b1":       f(ks[13], (1, 4 * hidden)),
        # output_fc: Linear(4*hidden, out_dim)
        "fc_w":     f(ks[14], (4 * hidden, out_dim)).astype(bf),
        "fc_b":     f(ks[15], (1, out_dim)),
    }


if __name__ == "__main__":
    key = jax.random.PRNGKey(0)
    k_emb, k_act, k_spd, k_par = jax.random.split(key, 4)

    # Small, module-consistent shapes: seq len 4, per-timestep NCHW map (32,4,4).
    B, T = 2, 4
    C, Hs, Ws = 32, 4, 4
    hidden = 128
    action_chn = speed_chn = 64
    vis_dim = C * Hs * Ws            # 512
    out_dim = C * Hs * Ws            # output_fc target = C*Hs*Ws

    embedding = jax.random.normal(k_emb, (B, T, C, Hs, Ws), dtype=jnp.float32)
    action = jax.random.normal(k_act, (B, 3), dtype=jnp.float32)
    speed = jax.random.normal(k_spd, (B, 3), dtype=jnp.float32)

    params = init_params(k_par, vis_dim, action_chn, speed_chn, hidden, out_dim)

    (img, (h_n, c_n)) = vanilla_rnn_encoder_forward(embedding, action, speed, params)
    jax.block_until_ready((img, h_n, c_n))

    assert img.shape == (B, C, Hs, Ws)
    assert h_n.shape == (2, B, hidden) and c_n.shape == (2, B, hidden)
    print("KERNEL_OK")
</pallas_src>

<mosaic_0001>
module attributes {stable_mosaic.version = 11 : i64} {
  func.func @_encoder_kernel(%arg0: memref<8x512xf32, #tpu.memory_space<vmem>>, %arg1: memref<2x3xf32, #tpu.memory_space<vmem>>, %arg2: memref<2x3xf32, #tpu.memory_space<vmem>>, %arg3: memref<3x16xf32, #tpu.memory_space<vmem>>, %arg4: memref<1x16xf32, #tpu.memory_space<vmem>>, %arg5: memref<16x64xf32, #tpu.memory_space<vmem>>, %arg6: memref<1x64xf32, #tpu.memory_space<vmem>>, %arg7: memref<3x16xf32, #tpu.memory_space<vmem>>, %arg8: memref<1x16xf32, #tpu.memory_space<vmem>>, %arg9: memref<16x64xf32, #tpu.memory_space<vmem>>, %arg10: memref<1x64xf32, #tpu.memory_space<vmem>>, %arg11: memref<512x512xbf16, #tpu.memory_space<vmem>>, %arg12: memref<128x512xbf16, #tpu.memory_space<vmem>>, %arg13: memref<128x512xbf16, #tpu.memory_space<vmem>>, %arg14: memref<1x512xf32, #tpu.memory_space<vmem>>, %arg15: memref<256x512xbf16, #tpu.memory_space<vmem>>, %arg16: memref<1x512xf32, #tpu.memory_space<vmem>>, %arg17: memref<512x512xbf16, #tpu.memory_space<vmem>>, %arg18: memref<1x512xf32, #tpu.memory_space<vmem>>, %arg19: memref<2x512xf32, #tpu.memory_space<vmem>>, %arg20: memref<2x2x128xf32, #tpu.memory_space<vmem>>, %arg21: memref<2x2x128xf32, #tpu.memory_space<vmem>>, %arg22: memref<2x512xf32, #tpu.memory_space<vmem>>) attributes {dimension_semantics = [], scalar_prefetch = 0 : i64, scratch_operands = 1 : i64, tpu.core_type = #tpu.core_type<tc>} {
    %c0 = arith.constant 0 : index
    %c0_0 = arith.constant 0 : index
    %0 = vector.load %arg1[%c0, %c0_0] : memref<2x3xf32, #tpu.memory_space<vmem>>, vector<2x3xf32>
    %c0_1 = arith.constant 0 : index
    %c0_2 = arith.constant 0 : index
    %1 = vector.load %arg3[%c0_1, %c0_2] : memref<3x16xf32, #tpu.memory_space<vmem>>, vector<3x16xf32>
    %c0_3 = arith.constant 0 : index
    %c0_4 = arith.constant 0 : index
    %2 = vector.load %arg4[%c0_3, %c0_4] : memref<1x16xf32, #tpu.memory_space<vmem>>, vector<1x16xf32>
    %c0_5 = arith.constant 0 : index
    %c0_6 = arith.constant 0 : index
    %3 = vector.load %arg5[%c0_5, %c0_6] : memref<16x64xf32, #tpu.memory_space<vmem>>, vector<16x64xf32>
    %c0_7 = arith.constant 0 : index
    %c0_8 = arith.constant 0 : index
    %4 = vector.load %arg6[%c0_7, %c0_8] : memref<1x64xf32, #tpu.memory_space<vmem>>, vector<1x64xf32>
    %5 = vector.shape_cast %2 : vector<1x16xf32> to vector<1x16xf32>
    %6 = vector.broadcast %5 : vector<1x16xf32> to vector<2x16xf32>
    %7 = vector.extract_strided_slice %0 {offsets = [0, 0], sizes = [2, 1], strides = [1, 1]} : vector<2x3xf32> to vector<2x1xf32>
    %8 = vector.extract_strided_slice %1 {offsets = [0, 0], sizes = [1, 16], strides = [1, 1]} : vector<3x16xf32> to vector<1x16xf32>
    %9 = vector.broadcast %7 : vector<2x1xf32> to vector<2x16xf32>
    %10 = vector.broadcast %8 : vector<1x16xf32> to vector<2x16xf32>
    %11 = arith.mulf %9, %10 : vector<2x16xf32>
    %12 = arith.addf %6, %11 : vector<2x16xf32>
    %13 = vector.extract_strided_slice %0 {offsets = [0, 1], sizes = [2, 1], strides = [1, 1]} : vector<2x3xf32> to vector<2x1xf32>
    %14 = vector.extract_strided_slice %1 {offsets = [1, 0], sizes = [1, 16], strides = [1, 1]} : vector<3x16xf32> to vector<1x16xf32>
    %15 = vector.broadcast %13 : vector<2x1xf32> to vector<2x16xf32>
    %16 = vector.broadcast %14 : vector<1x16xf32> to vector<2x16xf32>
    %17 = arith.mulf %15, %16 : vector<2x16xf32>
    %18 = arith.addf %12, %17 : vector<2x16xf32>
    %19 = vector.extract_strided_slice %0 {offsets = [0, 2], sizes = [2, 1], strides = [1, 1]} : vector<2x3xf32> to vector<2x1xf32>
    %20 = vector.extract_strided_slice %1 {offsets = [2, 0], sizes = [1, 16], strides = [1, 1]} : vector<3x16xf32> to vector<1x16xf32>
    %21 = vector.broadcast %19 : vector<2x1xf32> to vector<2x16xf32>
    %22 = vector.broadcast %20 : vector<1x16xf32> to vector<2x16xf32>
    %23 = arith.mulf %21, %22 : vector<2x16xf32>
    %24 = arith.addf %18, %23 : vector<2x16xf32>
    %cst = arith.constant 0.000000e+00 : f32
    %25 = vector.broadcast %cst : f32 to vector<2x16xf32>
    %26 = arith.maximumf %24, %25 : vector<2x16xf32>
    %27 = vector.shape_cast %4 : vector<1x64xf32> to vector<1x64xf32>
    %28 = vector.broadcast %27 : vector<1x64xf32> to vector<2x64xf32>
    %29 = vector.extract_strided_slice %26 {offsets = [0, 0], sizes = [2, 1], strides = [1, 1]} : vector<2x16xf32> to vector<2x1xf32>
    %30 = vector.extract_strided_slice %3 {offsets = [0, 0], sizes = [1, 64], strides = [1, 1]} : vector<16x64xf32> to vector<1x64xf32>
    %31 = vector.broadcast %29 : vector<2x1xf32> to vector<2x64xf32>
    %32 = vector.broadcast %30 : vector<1x64xf32> to vector<2x64xf32>
    %33 = arith.mulf %31, %32 : vector<2x64xf32>
    %34 = arith.addf %28, %33 : vector<2x64xf32>
    %35 = vector.extract_strided_slice %26 {offsets = [0, 1], sizes = [2, 1], strides = [1, 1]} : vector<2x16xf32> to vector<2x1xf32>
    %36 = vector.extract_strided_slice %3 {offsets = [1, 0], sizes = [1, 64], strides = [1, 1]} : vector<16x64xf32> to vector<1x64xf32>
    %37 = vector.broadcast %35 : vector<2x1xf32> to vector<2x64xf32>
    %38 = vector.broadcast %36 : vector<1x64xf32> to vector<2x64xf32>
    %39 = arith.mulf %37, %38 : vector<2x64xf32>
    %40 = arith.addf %34, %39 : vector<2x64xf32>
    %41 = vector.extract_strided_slice %26 {offsets = [0, 2], sizes = [2, 1], strides = [1, 1]} : vector<2x16xf32> to vector<2x1xf32>
    %42 = vector.extract_strided_slice %3 {offsets = [2, 0], sizes = [1, 64], strides = [1, 1]} : vector<16x64xf32> to vector<1x64xf32>
    %43 = vector.broadcast %41 : vector<2x1xf32> to vector<2x64xf32>
    %44 = vector.broadcast %42 : vector<1x64xf32> to vector<2x64xf32>
    %45 = arith.mulf %43, %44 : vector<2x64xf32>
    %46 = arith.addf %40, %45 : vector<2x64xf32>
    %47 = vector.extract_strided_slice %26 {offsets = [0, 3], sizes = [2, 1], strides = [1, 1]} : vector<2x16xf32> to vector<2x1xf32>
    %48 = vector.extract_strided_slice %3 {offsets = [3, 0], sizes = [1, 64], strides = [1, 1]} : vector<16x64xf32> to vector<1x64xf32>
    %49 = vector.broadcast %47 : vector<2x1xf32> to vector<2x64xf32>
    %50 = vector.broadcast %48 : vector<1x64xf32> to vector<2x64xf32>
    %51 = arith.mulf %49, %50 : vector<2x64xf32>
    %52 = arith.addf %46, %51 : vector<2x64xf32>
    %53 = vector.extract_strided_slice %26 {offsets = [0, 4], sizes = [2, 1], strides = [1, 1]} : vector<2x16xf32> to vector<2x1xf32>
    %54 = vector.extract_strided_slice %3 {offsets = [4, 0], sizes = [1, 64], strides = [1, 1]} : vector<16x64xf32> to vector<1x64xf32>
    %55 = vector.broadcast %53 : vector<2x1xf32> to vector<2x64xf32>
    %56 = vector.broadcast %54 : vector<1x64xf32> to vector<2x64xf32>
    %57 = arith.mulf %55, %56 : vector<2x64xf32>
    %58 = arith.addf %52, %57 : vector<2x64xf32>
    %59 = vector.extract_strided_slice %26 {offsets = [0, 5], sizes = [2, 1], strides = [1, 1]} : vector<2x16xf32> to vector<2x1xf32>
    %60 = vector.extract_strided_slice %3 {offsets = [5, 0], sizes = [1, 64], strides = [1, 1]} : vector<16x64xf32> to vector<1x64xf32>
    %61 = vector.broadcast %59 : vector<2x1xf32> to vector<2x64xf32>
    %62 = vector.broadcast %60 : vector<1x64xf32> to vector<2x64xf32>
    %63 = arith.mulf %61, %62 : vector<2x64xf32>
    %64 = arith.addf %58, %63 : vector<2x64xf32>
    %65 = vector.extract_strided_slice %26 {offsets = [0, 6], sizes = [2, 1], strides = [1, 1]} : vector<2x16xf32> to vector<2x1xf32>
    %66 = vector.extract_strided_slice %3 {offsets = [6, 0], sizes = [1, 64], strides = [1, 1]} : vector<16x64xf32> to vector<1x64xf32>
    %67 = vector.broadcast %65 : vector<2x1xf32> to vector<2x64xf32>
    %68 = vector.broadcast %66 : vector<1x64xf32> to vector<2x64xf32>
    %69 = arith.mulf %67, %68 : vector<2x64xf32>
    %70 = arith.addf %64, %69 : vector<2x64xf32>
    %71 = vector.extract_strided_slice %26 {offsets = [0, 7], sizes = [2, 1], strides = [1, 1]} : vector<2x16xf32> to vector<2x1xf32>
    %72 = vector.extract_strided_slice %3 {offsets = [7, 0], sizes = [1, 64], strides = [1, 1]} : vector<16x64xf32> to vector<1x64xf32>
    %73 = vector.broadcast %71 : vector<2x1xf32> to vector<2x64xf32>
    %74 = vector.broadcast %72 : vector<1x64xf32> to vector<2x64xf32>
    %75 = arith.mulf %73, %74 : vector<2x64xf32>
    %76 = arith.addf %70, %75 : vector<2x64xf32>
    %77 = vector.extract_strided_slice %26 {offsets = [0, 8], sizes = [2, 1], strides = [1, 1]} : vector<2x16xf32> to vector<2x1xf32>
    %78 = vector.extract_strided_slice %3 {offsets = [8, 0], sizes = [1, 64], strides = [1, 1]} : vector<16x64xf32> to vector<1x64xf32>
    %79 = vector.broadcast %77 : vector<2x1xf32> to vector<2x64xf32>
    %80 = vector.broadcast %78 : vector<1x64xf32> to vector<2x64xf32>
    %81 = arith.mulf %79, %80 : vector<2x64xf32>
    %82 = arith.addf %76, %81 : vector<2x64xf32>
    %83 = vector.extract_strided_slice %26 {offsets = [0, 9], sizes = [2, 1], strides = [1, 1]} : vector<2x16xf32> to vector<2x1xf32>
    %84 = vector.extract_strided_slice %3 {offsets = [9, 0], sizes = [1, 64], strides = [1, 1]} : vector<16x64xf32> to vector<1x64xf32>
    %85 = vector.broadcast %83 : vector<2x1xf32> to vector<2x64xf32>
    %86 = vector.broadcast %84 : vector<1x64xf32> to vector<2x64xf32>
    %87 = arith.mulf %85, %86 : vector<2x64xf32>
    %88 = arith.addf %82, %87 : vector<2x64xf32>
    %89 = vector.extract_strided_slice %26 {offsets = [0, 10], sizes = [2, 1], strides = [1, 1]} : vector<2x16xf32> to vector<2x1xf32>
    %90 = vector.extract_strided_slice %3 {offsets = [10, 0], sizes = [1, 64], strides = [1, 1]} : vector<16x64xf32> to vector<1x64xf32>
    %91 = vector.broadcast %89 : vector<2x1xf32> to vector<2x64xf32>
    %92 = vector.broadcast %90 : vector<1x64xf32> to vector<2x64xf32>
    %93 = arith.mulf %91, %92 : vector<2x64xf32>
    %94 = arith.addf %88, %93 : vector<2x64xf32>
    %95 = vector.extract_strided_slice %26 {offsets = [0, 11], sizes = [2, 1], strides = [1, 1]} : vector<2x16xf32> to vector<2x1xf32>
    %96 = vector.extract_strided_slice %3 {offsets = [11, 0], sizes = [1, 64], strides = [1, 1]} : vector<16x64xf32> to vector<1x64xf32>
    %97 = vector.broadcast %95 : vector<2x1xf32> to vector<2x64xf32>
    %98 = vector.broadcast %96 : vector<1x64xf32> to vector<2x64xf32>
    %99 = arith.mulf %97, %98 : vector<2x64xf32>
    %100 = arith.addf %94, %99 : vector<2x64xf32>
    %101 = vector.extract_strided_slice %26 {offsets = [0, 12], sizes = [2, 1], strides = [1, 1]} : vector<2x16xf32> to vector<2x1xf32>
    %102 = vector.extract_strided_slice %3 {offsets = [12, 0], sizes = [1, 64], strides = [1, 1]} : vector<16x64xf32> to vector<1x64xf32>
    %103 = vector.broadcast %101 : vector<2x1xf32> to vector<2x64xf32>
    %104 = vector.broadcast %102 : vector<1x64xf32> to vector<2x64xf32>
    %105 = arith.mulf %103, %104 : vector<2x64xf32>
    %106 = arith.addf %100, %105 : vector<2x64xf32>
    %107 = vector.extract_strided_slice %26 {offsets = [0, 13], sizes = [2, 1], strides = [1, 1]} : vector<2x16xf32> to vector<2x1xf32>
    %108 = vector.extract_strided_slice %3 {offsets = [13, 0], sizes = [1, 64], strides = [1, 1]} : vector<16x64xf32> to vector<1x64xf32>
    %109 = vector.broadcast %107 : vector<2x1xf32> to vector<2x64xf32>
    %110 = vector.broadcast %108 : vector<1x64xf32> to vector<2x64xf32>
    %111 = arith.mulf %109, %110 : vector<2x64xf32>
    %112 = arith.addf %106, %111 : vector<2x64xf32>
    %113 = vector.extract_strided_slice %26 {offsets = [0, 14], sizes = [2, 1], strides = [1, 1]} : vector<2x16xf32> to vector<2x1xf32>
    %114 = vector.extract_strided_slice %3 {offsets = [14, 0], sizes = [1, 64], strides = [1, 1]} : vector<16x64xf32> to vector<1x64xf32>
    %115 = vector.broadcast %113 : vector<2x1xf32> to vector<2x64xf32>
    %116 = vector.broadcast %114 : vector<1x64xf32> to vector<2x64xf32>
    %117 = arith.mulf %115, %116 : vector<2x64xf32>
    %118 = arith.addf %112, %117 : vector<2x64xf32>
    %119 = vector.extract_strided_slice %26 {offsets = [0, 15], sizes = [2, 1], strides = [1, 1]} : vector<2x16xf32> to vector<2x1xf32>
    %120 = vector.extract_strided_slice %3 {offsets = [15, 0], sizes = [1, 64], strides = [1, 1]} : vector<16x64xf32> to vector<1x64xf32>
    %121 = vector.broadcast %119 : vector<2x1xf32> to vector<2x64xf32>
    %122 = vector.broadcast %120 : vector<1x64xf32> to vector<2x64xf32>
    %123 = arith.mulf %121, %122 : vector<2x64xf32>
    %124 = arith.addf %118, %123 : vector<2x64xf32>
    %c0_9 = arith.constant 0 : index
    %c0_10 = arith.constant 0 : index
    %125 = vector.load %arg2[%c0_9, %c0_10] : memref<2x3xf32, #tpu.memory_space<vmem>>, vector<2x3xf32>
    %c0_11 = arith.constant 0 : index
    %c0_12 = arith.constant 0 : index
    %126 = vector.load %arg7[%c0_11, %c0_12] : memref<3x16xf32, #tpu.memory_space<vmem>>, vector<3x16xf32>
    %c0_13 = arith.constant 0 : index
    %c0_14 = arith.constant 0 : index
    %127 = vector.load %arg8[%c0_13, %c0_14] : memref<1x16xf32, #tpu.memory_space<vmem>>, vector<1x16xf32>
    %c0_15 = arith.constant 0 : index
    %c0_16 = arith.constant 0 : index
    %128 = vector.load %arg9[%c0_15, %c0_16] : memref<16x64xf32, #tpu.memory_space<vmem>>, vector<16x64xf32>
    %c0_17 = arith.constant 0 : index
    %c0_18 = arith.constant 0 : index
    %129 = vector.load %arg10[%c0_17, %c0_18] : memref<1x64xf32, #tpu.memory_space<vmem>>, vector<1x64xf32>
    %130 = vector.shape_cast %127 : vector<1x16xf32> to vector<1x16xf32>
    %131 = vector.broadcast %130 : vector<1x16xf32> to vector<2x16xf32>
    %132 = vector.extract_strided_slice %125 {offsets = [0, 0], sizes = [2, 1], strides = [1, 1]} : vector<2x3xf32> to vector<2x1xf32>
    %133 = vector.extract_strided_slice %126 {offsets = [0, 0], sizes = [1, 16], strides = [1, 1]} : vector<3x16xf32> to vector<1x16xf32>
    %134 = vector.broadcast %132 : vector<2x1xf32> to vector<2x16xf32>
    %135 = vector.broadcast %133 : vector<1x16xf32> to vector<2x16xf32>
    %136 = arith.mulf %134, %135 : vector<2x16xf32>
    %137 = arith.addf %131, %136 : vector<2x16xf32>
    %138 = vector.extract_strided_slice %125 {offsets = [0, 1], sizes = [2, 1], strides = [1, 1]} : vector<2x3xf32> to vector<2x1xf32>
    %139 = vector.extract_strided_slice %126 {offsets = [1, 0], sizes = [1, 16], strides = [1, 1]} : vector<3x16xf32> to vector<1x16xf32>
    %140 = vector.broadcast %138 : vector<2x1xf32> to vector<2x16xf32>
    %141 = vector.broadcast %139 : vector<1x16xf32> to vector<2x16xf32>
    %142 = arith.mulf %140, %141 : vector<2x16xf32>
    %143 = arith.addf %137, %142 : vector<2x16xf32>
    %144 = vector.extract_strided_slice %125 {offsets = [0, 2], sizes = [2, 1], strides = [1, 1]} : vector<2x3xf32> to vector<2x1xf32>
    %145 = vector.extract_strided_slice %126 {offsets = [2, 0], sizes = [1, 16], strides = [1, 1]} : vector<3x16xf32> to vector<1x16xf32>
    %146 = vector.broadcast %144 : vector<2x1xf32> to vector<2x16xf32>
    %147 = vector.broadcast %145 : vector<1x16xf32> to vector<2x16xf32>
    %148 = arith.mulf %146, %147 : vector<2x16xf32>
    %149 = arith.addf %143, %148 : vector<2x16xf32>
    %cst_19 = arith.constant 0.000000e+00 : f32
    %150 = vector.broadcast %cst_19 : f32 to vector<2x16xf32>
    %151 = arith.maximumf %149, %150 : vector<2x16xf32>
    %152 = vector.shape_cast %129 : vector<1x64xf32> to vector<1x64xf32>
    %153 = vector.broadcast %152 : vector<1x64xf32> to vector<2x64xf32>
    %154 = vector.extract_strided_slice %151 {offsets = [0, 0], sizes = [2, 1], strides = [1, 1]} : vector<2x16xf32> to vector<2x1xf32>
    %155 = vector.extract_strided_slice %128 {offsets = [0, 0], sizes = [1, 64], strides = [1, 1]} : vector<16x64xf32> to vector<1x64xf32>
    %156 = vector.broadcast %154 : vector<2x1xf32> to vector<2x64xf32>
    %157 = vector.broadcast %155 : vector<1x64xf32> to vector<2x64xf32>
    %158 = arith.mulf %156, %157 : vector<2x64xf32>
    %159 = arith.addf %153, %158 : vector<2x64xf32>
    %160 = vector.extract_strided_slice %151 {offsets = [0, 1], sizes = [2, 1], strides = [1, 1]} : vector<2x16xf32> to vector<2x1xf32>
    %161 = vector.extract_strided_slice %128 {offsets = [1, 0], sizes = [1, 64], strides = [1, 1]} : vector<16x64xf32> to vector<1x64xf32>
    %162 = vector.broadcast %160 : vector<2x1xf32> to vector<2x64xf32>
    %163 = vector.broadcast %161 : vector<1x64xf32> to vector<2x64xf32>
    %164 = arith.mulf %162, %163 : vector<2x64xf32>
    %165 = arith.addf %159, %164 : vector<2x64xf32>
    %166 = vector.extract_strided_slice %151 {offsets = [0, 2], sizes = [2, 1], strides = [1, 1]} : vector<2x16xf32> to vector<2x1xf32>
    %167 = vector.extract_strided_slice %128 {offsets = [2, 0], sizes = [1, 64], strides = [1, 1]} : vector<16x64xf32> to vector<1x64xf32>
    %168 = vector.broadcast %166 : vector<2x1xf32> to vector<2x64xf32>
    %169 = vector.broadcast %167 : vector<1x64xf32> to vector<2x64xf32>
    %170 = arith.mulf %168, %169 : vector<2x64xf32>
    %171 = arith.addf %165, %170 : vector<2x64xf32>
    %172 = vector.extract_strided_slice %151 {offsets = [0, 3], sizes = [2, 1], strides = [1, 1]} : vector<2x16xf32> to vector<2x1xf32>
    %173 = vector.extract_strided_slice %128 {offsets = [3, 0], sizes = [1, 64], strides = [1, 1]} : vector<16x64xf32> to vector<1x64xf32>
    %174 = vector.broadcast %172 : vector<2x1xf32> to vector<2x64xf32>
    %175 = vector.broadcast %173 : vector<1x64xf32> to vector<2x64xf32>
    %176 = arith.mulf %174, %175 : vector<2x64xf32>
    %177 = arith.addf %171, %176 : vector<2x64xf32>
    %178 = vector.extract_strided_slice %151 {offsets = [0, 4], sizes = [2, 1], strides = [1, 1]} : vector<2x16xf32> to vector<2x1xf32>
    %179 = vector.extract_strided_slice %128 {offsets = [4, 0], sizes = [1, 64], strides = [1, 1]} : vector<16x64xf32> to vector<1x64xf32>
    %180 = vector.broadcast %178 : vector<2x1xf32> to vector<2x64xf32>
    %181 = vector.broadcast %179 : vector<1x64xf32> to vector<2x64xf32>
    %182 = arith.mulf %180, %181 : vector<2x64xf32>
    %183 = arith.addf %177, %182 : vector<2x64xf32>
    %184 = vector.extract_strided_slice %151 {offsets = [0, 5], sizes = [2, 1], strides = [1, 1]} : vector<2x16xf32> to vector<2x1xf32>
    %185 = vector.extract_strided_slice %128 {offsets = [5, 0], sizes = [1, 64], strides = [1, 1]} : vector<16x64xf32> to vector<1x64xf32>
    %186 = vector.broadcast %184 : vector<2x1xf32> to vector<2x64xf32>
    %187 = vector.broadcast %185 : vector<1x64xf32> to vector<2x64xf32>
    %188 = arith.mulf %186, %187 : vector<2x64xf32>
    %189 = arith.addf %183, %188 : vector<2x64xf32>
    %190 = vector.extract_strided_slice %151 {offsets = [0, 6], sizes = [2, 1], strides = [1, 1]} : vector<2x16xf32> to vector<2x1xf32>
    %191 = vector.extract_strided_slice %128 {offsets = [6, 0], sizes = [1, 64], strides = [1, 1]} : vector<16x64xf32> to vector<1x64xf32>
    %192 = vector.broadcast %190 : vector<2x1xf32> to vector<2x64xf32>
    %193 = vector.broadcast %191 : vector<1x64xf32> to vector<2x64xf32>
    %194 = arith.mulf %192, %193 : vector<2x64xf32>
    %195 = arith.addf %189, %194 : vector<2x64xf32>
    %196 = vector.extract_strided_slice %151 {offsets = [0, 7], sizes = [2, 1], strides = [1, 1]} : vector<2x16xf32> to vector<2x1xf32>
    %197 = vector.extract_strided_slice %128 {offsets = [7, 0], sizes = [1, 64], strides = [1, 1]} : vector<16x64xf32> to vector<1x64xf32>
    %198 = vector.broadcast %196 : vector<2x1xf32> to vector<2x64xf32>
    %199 = vector.broadcast %197 : vector<1x64xf32> to vector<2x64xf32>
    %200 = arith.mulf %198, %199 : vector<2x64xf32>
    %201 = arith.addf %195, %200 : vector<2x64xf32>
    %202 = vector.extract_strided_slice %151 {offsets = [0, 8], sizes = [2, 1], strides = [1, 1]} : vector<2x16xf32> to vector<2x1xf32>
    %203 = vector.extract_strided_slice %128 {offsets = [8, 0], sizes = [1, 64], strides = [1, 1]} : vector<16x64xf32> to vector<1x64xf32>
    %204 = vector.broadcast %202 : vector<2x1xf32> to vector<2x64xf32>
    %205 = vector.broadcast %203 : vector<1x64xf32> to vector<2x64xf32>
    %206 = arith.mulf %204, %205 : vector<2x64xf32>
    %207 = arith.addf %201, %206 : vector<2x64xf32>
    %208 = vector.extract_strided_slice %151 {offsets = [0, 9], sizes = [2, 1], strides = [1, 1]} : vector<2x16xf32> to vector<2x1xf32>
    %209 = vector.extract_strided_slice %128 {offsets = [9, 0], sizes = [1, 64], strides = [1, 1]} : vector<16x64xf32> to vector<1x64xf32>
    %210 = vector.broadcast %208 : vector<2x1xf32> to vector<2x64xf32>
    %211 = vector.broadcast %209 : vector<1x64xf32> to vector<2x64xf32>
    %212 = arith.mulf %210, %211 : vector<2x64xf32>
    %213 = arith.addf %207, %212 : vector<2x64xf32>
    %214 = vector.extract_strided_slice %151 {offsets = [0, 10], sizes = [2, 1], strides = [1, 1]} : vector<2x16xf32> to vector<2x1xf32>
    %215 = vector.extract_strided_slice %128 {offsets = [10, 0], sizes = [1, 64], strides = [1, 1]} : vector<16x64xf32> to vector<1x64xf32>
    %216 = vector.broadcast %214 : vector<2x1xf32> to vector<2x64xf32>
    %217 = vector.broadcast %215 : vector<1x64xf32> to vector<2x64xf32>
    %218 = arith.mulf %216, %217 : vector<2x64xf32>
    %219 = arith.addf %213, %218 : vector<2x64xf32>
    %220 = vector.extract_strided_slice %151 {offsets = [0, 11], sizes = [2, 1], strides = [1, 1]} : vector<2x16xf32> to vector<2x1xf32>
    %221 = vector.extract_strided_slice %128 {offsets = [11, 0], sizes = [1, 64], strides = [1, 1]} : vector<16x64xf32> to vector<1x64xf32>
    %222 = vector.broadcast %220 : vector<2x1xf32> to vector<2x64xf32>
    %223 = vector.broadcast %221 : vector<1x64xf32> to vector<2x64xf32>
    %224 = arith.mulf %222, %223 : vector<2x64xf32>
    %225 = arith.addf %219, %224 : vector<2x64xf32>
    %226 = vector.extract_strided_slice %151 {offsets = [0, 12], sizes = [2, 1], strides = [1, 1]} : vector<2x16xf32> to vector<2x1xf32>
    %227 = vector.extract_strided_slice %128 {offsets = [12, 0], sizes = [1, 64], strides = [1, 1]} : vector<16x64xf32> to vector<1x64xf32>
    %228 = vector.broadcast %226 : vector<2x1xf32> to vector<2x64xf32>
    %229 = vector.broadcast %227 : vector<1x64xf32> to vector<2x64xf32>
    %230 = arith.mulf %228, %229 : vector<2x64xf32>
    %231 = arith.addf %225, %230 : vector<2x64xf32>
    %232 = vector.extract_strided_slice %151 {offsets = [0, 13], sizes = [2, 1], strides = [1, 1]} : vector<2x16xf32> to vector<2x1xf32>
    %233 = vector.extract_strided_slice %128 {offsets = [13, 0], sizes = [1, 64], strides = [1, 1]} : vector<16x64xf32> to vector<1x64xf32>
    %234 = vector.broadcast %232 : vector<2x1xf32> to vector<2x64xf32>
    %235 = vector.broadcast %233 : vector<1x64xf32> to vector<2x64xf32>
    %236 = arith.mulf %234, %235 : vector<2x64xf32>
    %237 = arith.addf %231, %236 : vector<2x64xf32>
    %238 = vector.extract_strided_slice %151 {offsets = [0, 14], sizes = [2, 1], strides = [1, 1]} : vector<2x16xf32> to vector<2x1xf32>
    %239 = vector.extract_strided_slice %128 {offsets = [14, 0], sizes = [1, 64], strides = [1, 1]} : vector<16x64xf32> to vector<1x64xf32>
    %240 = vector.broadcast %238 : vector<2x1xf32> to vector<2x64xf32>
    %241 = vector.broadcast %239 : vector<1x64xf32> to vector<2x64xf32>
    %242 = arith.mulf %240, %241 : vector<2x64xf32>
    %243 = arith.addf %237, %242 : vector<2x64xf32>
    %244 = vector.extract_strided_slice %151 {offsets = [0, 15], sizes = [2, 1], strides = [1, 1]} : vector<2x16xf32> to vector<2x1xf32>
    %245 = vector.extract_strided_slice %128 {offsets = [15, 0], sizes = [1, 64], strides = [1, 1]} : vector<16x64xf32> to vector<1x64xf32>
    %246 = vector.broadcast %244 : vector<2x1xf32> to vector<2x64xf32>
    %247 = vector.broadcast %245 : vector<1x64xf32> to vector<2x64xf32>
    %248 = arith.mulf %246, %247 : vector<2x64xf32>
    %249 = arith.addf %243, %248 : vector<2x64xf32>
    %250 = tpu.concatenate %124, %249 in 1 : vector<2x64xf32>, vector<2x64xf32> -> vector<2x128xf32>
    %c0_20 = arith.constant 0 : index
    %c0_21 = arith.constant 0 : index
    %251 = vector.load %arg0[%c0_20, %c0_21] : memref<8x512xf32, #tpu.memory_space<vmem>>, vector<8x512xf32>
    %252 = arith.truncf %251 : vector<8x512xf32> to vector<8x512xbf16>
    %c0_22 = arith.constant 0 : index
    %c0_23 = arith.constant 0 : index
    %253 = vector.load %arg11[%c0_22, %c0_23] : memref<512x512xbf16, #tpu.memory_space<vmem>>, vector<512x512xbf16>
    %cst_24 = arith.constant dense<0.000000e+00> : vector<8x512xf32>
    %254 = tpu.matmul %252, %253, %cst_24 {dimension_numbers = #tpu.dot_dimension_numbers<[1], [0], [0], [1], [0, 0, 1, 1], [], []>} : vector<8x512xbf16>, vector<512x512xbf16>, vector<8x512xf32> -> vector<8x512xf32>
    %255 = arith.truncf %250 : vector<2x128xf32> to vector<2x128xbf16>
    %c0_25 = arith.constant 0 : index
    %c0_26 = arith.constant 0 : index
    %256 = vector.load %arg12[%c0_25, %c0_26] : memref<128x512xbf16, #tpu.memory_space<vmem>>, vector<128x512xbf16>
    %cst_27 = arith.constant dense<0.000000e+00> : vector<2x512xf32>
    %257 = tpu.matmul %255, %256, %cst_27 {dimension_numbers = #tpu.dot_dimension_numbers<[1], [0], [0], [1], [0, 0, 1, 1], [], []>} : vector<2x128xbf16>, vector<128x512xbf16>, vector<2x512xf32> -> vector<2x512xf32>
    %c0_28 = arith.constant 0 : index
    %c0_29 = arith.constant 0 : index
    %258 = vector.load %arg14[%c0_28, %c0_29] : memref<1x512xf32, #tpu.memory_space<vmem>>, vector<1x512xf32>
    %259 = vector.broadcast %258 : vector<1x512xf32> to vector<2x512xf32>
    %260 = arith.addf %257, %259 : vector<2x512xf32>
    %c0_30 = arith.constant 0 : index
    %c0_31 = arith.constant 0 : index
    %261 = vector.load %arg16[%c0_30, %c0_31] : memref<1x512xf32, #tpu.memory_space<vmem>>, vector<1x512xf32>
    %c0_32 = arith.constant 0 : index
    %c0_33 = arith.constant 0 : index
    %262 = vector.load %arg13[%c0_32, %c0_33] : memref<128x512xbf16, #tpu.memory_space<vmem>>, vector<128x512xbf16>
    %c0_34 = arith.constant 0 : index
    %c0_35 = arith.constant 0 : index
    %263 = vector.load %arg15[%c0_34, %c0_35] : memref<256x512xbf16, #tpu.memory_space<vmem>>, vector<256x512xbf16>
    %cst_36 = arith.constant 0.000000e+00 : f32
    %264 = vector.broadcast %cst_36 : f32 to vector<2x128xf32>
    %265 = vector.extract_strided_slice %254 {offsets = [0, 0], sizes = [2, 512], strides = [1, 1]} : vector<8x512xf32> to vector<2x512xf32>
    %266 = arith.addf %265, %260 : vector<2x512xf32>
    %267 = arith.truncf %264 : vector<2x128xf32> to vector<2x128xbf16>
    %cst_37 = arith.constant dense<0.000000e+00> : vector<2x512xf32>
    %268 = tpu.matmul %267, %262, %cst_37 {dimension_numbers = #tpu.dot_dimension_numbers<[1], [0], [0], [1], [0, 0, 1, 1], [], []>} : vector<2x128xbf16>, vector<128x512xbf16>, vector<2x512xf32> -> vector<2x512xf32>
    %269 = arith.addf %266, %268 : vector<2x512xf32>
    %270 = vector.extract_strided_slice %269 {offsets = [0, 0], sizes = [2, 128], strides = [1, 1]} : vector<2x512xf32> to vector<2x128xf32>
    %271 = arith.negf %270 : vector<2x128xf32>
    %272 = math.exp %271 : vector<2x128xf32>
    %cst_38 = arith.constant 1.000000e+00 : f32
    %273 = vector.broadcast %cst_38 : f32 to vector<2x128xf32>
    %274 = arith.addf %273, %272 : vector<2x128xf32>
    %275 = arith.divf %273, %274 : vector<2x128xf32>
    %276 = vector.extract_strided_slice %269 {offsets = [0, 128], sizes = [2, 128], strides = [1, 1]} : vector<2x512xf32> to vector<2x128xf32>
    %277 = arith.negf %276 : vector<2x128xf32>
    %278 = math.exp %277 : vector<2x128xf32>
    %cst_39 = arith.constant 1.000000e+00 : f32
    %279 = vector.broadcast %cst_39 : f32 to vector<2x128xf32>
    %280 = arith.addf %279, %278 : vector<2x128xf32>
    %281 = arith.divf %279, %280 : vector<2x128xf32>
    %282 = vector.extract_strided_slice %269 {offsets = [0, 256], sizes = [2, 128], strides = [1, 1]} : vector<2x512xf32> to vector<2x128xf32>
    %283 = math.tanh %282 : vector<2x128xf32>
    %284 = vector.extract_strided_slice %269 {offsets = [0, 384], sizes = [2, 128], strides = [1, 1]} : vector<2x512xf32> to vector<2x128xf32>
    %285 = arith.negf %284 : vector<2x128xf32>
    %286 = math.exp %285 : vector<2x128xf32>
    %cst_40 = arith.constant 1.000000e+00 : f32
    %287 = vector.broadcast %cst_40 : f32 to vector<2x128xf32>
    %288 = arith.addf %287, %286 : vector<2x128xf32>
    %289 = arith.divf %287, %288 : vector<2x128xf32>
    %290 = arith.mulf %281, %264 : vector<2x128xf32>
    %291 = arith.mulf %275, %283 : vector<2x128xf32>
    %292 = arith.addf %290, %291 : vector<2x128xf32>
    %293 = math.tanh %292 : vector<2x128xf32>
    %294 = arith.mulf %289, %293 : vector<2x128xf32>
    %295 = tpu.concatenate %294, %264 in 1 : vector<2x128xf32>, vector<2x128xf32> -> vector<2x256xf32>
    %296 = arith.truncf %295 : vector<2x256xf32> to vector<2x256xbf16>
    %cst_41 = arith.constant dense<0.000000e+00> : vector<2x512xf32>
    %297 = tpu.matmul %296, %263, %cst_41 {dimension_numbers = #tpu.dot_dimension_numbers<[1], [0], [0], [1], [0, 0, 1, 1], [], []>} : vector<2x256xbf16>, vector<256x512xbf16>, vector<2x512xf32> -> vector<2x512xf32>
    %298 = vector.broadcast %261 : vector<1x512xf32> to vector<2x512xf32>
    %299 = arith.addf %297, %298 : vector<2x512xf32>
    %300 = vector.extract_strided_slice %299 {offsets = [0, 0], sizes = [2, 128], strides = [1, 1]} : vector<2x512xf32> to vector<2x128xf32>
    %301 = arith.negf %300 : vector<2x128xf32>
    %302 = math.exp %301 : vector<2x128xf32>
    %cst_42 = arith.constant 1.000000e+00 : f32
    %303 = vector.broadcast %cst_42 : f32 to vector<2x128xf32>
    %304 = arith.addf %303, %302 : vector<2x128xf32>
    %305 = arith.divf %303, %304 : vector<2x128xf32>
    %306 = vector.extract_strided_slice %299 {offsets = [0, 128], sizes = [2, 128], strides = [1, 1]} : vector<2x512xf32> to vector<2x128xf32>
    %307 = arith.negf %306 : vector<2x128xf32>
    %308 = math.exp %307 : vector<2x128xf32>
    %cst_43 = arith.constant 1.000000e+00 : f32
    %309 = vector.broadcast %cst_43 : f32 to vector<2x128xf32>
    %310 = arith.addf %309, %308 : vector<2x128xf32>
    %311 = arith.divf %309, %310 : vector<2x128xf32>
    %312 = vector.extract_strided_slice %299 {offsets = [0, 256], sizes = [2, 128], strides = [1, 1]} : vector<2x512xf32> to vector<2x128xf32>
    %313 = math.tanh %312 : vector<2x128xf32>
    %314 = vector.extract_strided_slice %299 {offsets = [0, 384], sizes = [2, 128], strides = [1, 1]} : vector<2x512xf32> to vector<2x128xf32>
    %315 = arith.negf %314 : vector<2x128xf32>
    %316 = math.exp %315 : vector<2x128xf32>
    %cst_44 = arith.constant 1.000000e+00 : f32
    %317 = vector.broadcast %cst_44 : f32 to vector<2x128xf32>
    %318 = arith.addf %317, %316 : vector<2x128xf32>
    %319 = arith.divf %317, %318 : vector<2x128xf32>
    %320 = arith.mulf %311, %264 : vector<2x128xf32>
    %321 = arith.mulf %305, %313 : vector<2x128xf32>
    %322 = arith.addf %320, %321 : vector<2x128xf32>
    %323 = math.tanh %322 : vector<2x128xf32>
    %324 = arith.mulf %319, %323 : vector<2x128xf32>
    %c0_45 = arith.constant 0 : index
    %c0_46 = arith.constant 0 : index
    %325 = vector.load %arg22[%c0_45, %c0_46] : memref<2x512xf32, #tpu.memory_space<vmem>>, vector<2x128xf32>
    tpu.vector_store %arg22[%c0_45, %c0_46], %324 {strides = array<i32>} : memref<2x512xf32, #tpu.memory_space<vmem>>, vector<2x128xf32>,
    %326 = vector.extract_strided_slice %254 {offsets = [2, 0], sizes = [2, 512], strides = [1, 1]} : vector<8x512xf32> to vector<2x512xf32>
    %327 = arith.addf %326, %260 : vector<2x512xf32>
    %328 = arith.truncf %294 : vector<2x128xf32> to vector<2x128xbf16>
    %cst_47 = arith.constant dense<0.000000e+00> : vector<2x512xf32>
    %329 = tpu.matmul %328, %262, %cst_47 {dimension_numbers = #tpu.dot_dimension_numbers<[1], [0], [0], [1], [0, 0, 1, 1], [], []>} : vector<2x128xbf16>, vector<128x512xbf16>, vector<2x512xf32> -> vector<2x512xf32>
    %330 = arith.addf %327, %329 : vector<2x512xf32>
    %331 = vector.extract_strided_slice %330 {offsets = [0, 0], sizes = [2, 128], strides = [1, 1]} : vector<2x512xf32> to vector<2x128xf32>
    %332 = arith.negf %331 : vector<2x128xf32>
    %333 = math.exp %332 : vector<2x128xf32>
    %cst_48 = arith.constant 1.000000e+00 : f32
    %334 = vector.broadcast %cst_48 : f32 to vector<2x128xf32>
    %335 = arith.addf %334, %333 : vector<2x128xf32>
    %336 = arith.divf %334, %335 : vector<2x128xf32>
    %337 = vector.extract_strided_slice %330 {offsets = [0, 128], sizes = [2, 128], strides = [1, 1]} : vector<2x512xf32> to vector<2x128xf32>
    %338 = arith.negf %337 : vector<2x128xf32>
    %339 = math.exp %338 : vector<2x128xf32>
    %cst_49 = arith.constant 1.000000e+00 : f32
    %340 = vector.broadcast %cst_49 : f32 to vector<2x128xf32>
    %341 = arith.addf %340, %339 : vector<2x128xf32>
    %342 = arith.divf %340, %341 : vector<2x128xf32>
    %343 = vector.extract_strided_slice %330 {offsets = [0, 256], sizes = [2, 128], strides = [1, 1]} : vector<2x512xf32> to vector<2x128xf32>
    %344 = math.tanh %343 : vector<2x128xf32>
    %345 = vector.extract_strided_slice %330 {offsets = [0, 384], sizes = [2, 128], strides = [1, 1]} : vector<2x512xf32> to vector<2x128xf32>
    %346 = arith.negf %345 : vector<2x128xf32>
    %347 = math.exp %346 : vector<2x128xf32>
    %cst_50 = arith.constant 1.000000e+00 : f32
    %348 = vector.broadcast %cst_50 : f32 to vector<2x128xf32>
    %349 = arith.addf %348, %347 : vector<2x128xf32>
    %350 = arith.divf %348, %349 : vector<2x128xf32>
    %351 = arith.mulf %342, %292 : vector<2x128xf32>
    %352 = arith.mulf %336, %344 : vector<2x128xf32>
    %353 = arith.addf %351, %352 : vector<2x128xf32>
    %354 = math.tanh %353 : vector<2x128xf32>
    %355 = arith.mulf %350, %354 : vector<2x128xf32>
    %356 = tpu.concatenate %355, %324 in 1 : vector<2x128xf32>, vector<2x128xf32> -> vector<2x256xf32>
    %357 = arith.truncf %356 : vector<2x256xf32> to vector<2x256xbf16>
    %cst_51 = arith.constant dense<0.000000e+00> : vector<2x512xf32>
    %358 = tpu.matmul %357, %263, %cst_51 {dimension_numbers = #tpu.dot_dimension_numbers<[1], [0], [0], [1], [0, 0, 1, 1], [], []>} : vector<2x256xbf16>, vector<256x512xbf16>, vector<2x512xf32> -> vector<2x512xf32>
    %359 = vector.broadcast %261 : vector<1x512xf32> to vector<2x512xf32>
    %360 = arith.addf %358, %359 : vector<2x512xf32>
    %361 = vector.extract_strided_slice %360 {offsets = [0, 0], sizes = [2, 128], strides = [1, 1]} : vector<2x512xf32> to vector<2x128xf32>
    %362 = arith.negf %361 : vector<2x128xf32>
    %363 = math.exp %362 : vector<2x128xf32>
    %cst_52 = arith.constant 1.000000e+00 : f32
    %364 = vector.broadcast %cst_52 : f32 to vector<2x128xf32>
    %365 = arith.addf %364, %363 : vector<2x128xf32>
    %366 = arith.divf %364, %365 : vector<2x128xf32>
    %367 = vector.extract_strided_slice %360 {offsets = [0, 128], sizes = [2, 128], strides = [1, 1]} : vector<2x512xf32> to vector<2x128xf32>
    %368 = arith.negf %367 : vector<2x128xf32>
    %369 = math.exp %368 : vector<2x128xf32>
    %cst_53 = arith.constant 1.000000e+00 : f32
    %370 = vector.broadcast %cst_53 : f32 to vector<2x128xf32>
    %371 = arith.addf %370, %369 : vector<2x128xf32>
    %372 = arith.divf %370, %371 : vector<2x128xf32>
    %373 = vector.extract_strided_slice %360 {offsets = [0, 256], sizes = [2, 128], strides = [1, 1]} : vector<2x512xf32> to vector<2x128xf32>
    %374 = math.tanh %373 : vector<2x128xf32>
    %375 = vector.extract_strided_slice %360 {offsets = [0, 384], sizes = [2, 128], strides = [1, 1]} : vector<2x512xf32> to vector<2x128xf32>
    %376 = arith.negf %375 : vector<2x128xf32>
    %377 = math.exp %376 : vector<2x128xf32>
    %cst_54 = arith.constant 1.000000e+00 : f32
    %378 = vector.broadcast %cst_54 : f32 to vector<2x128xf32>
    %379 = arith.addf %378, %377 : vector<2x128xf32>
    %380 = arith.divf %378, %379 : vector<2x128xf32>
    %381 = arith.mulf %372, %322 : vector<2x128xf32>
    %382 = arith.mulf %366, %374 : vector<2x128xf32>
    %383 = arith.addf %381, %382 : vector<2x128xf32>
    %384 = math.tanh %383 : vector<2x128xf32>
    %385 = arith.mulf %380, %384 : vector<2x128xf32>
    %c0_55 = arith.constant 0 : index
    %c128 = arith.constant 128 : index
    %386 = vector.load %arg22[%c0_55, %c128] : memref<2x512xf32, #tpu.memory_space<vmem>>, vector<2x128xf32>
    tpu.vector_store %arg22[%c0_55, %c128], %385 {strides = array<i32>} : memref<2x512xf32, #tpu.memory_space<vmem>>, vector<2x128xf32>,
    %387 = vector.extract_strided_slice %254 {offsets = [4, 0], sizes = [2, 512], strides = [1, 1]} : vector<8x512xf32> to vector<2x512xf32>
    %388 = arith.addf %387, %260 : vector<2x512xf32>
    %389 = arith.truncf %355 : vector<2x128xf32> to vector<2x128xbf16>
    %cst_56 = arith.constant dense<0.000000e+00> : vector<2x512xf32>
    %390 = tpu.matmul %389, %262, %cst_56 {dimension_numbers = #tpu.dot_dimension_numbers<[1], [0], [0], [1], [0, 0, 1, 1], [], []>} : vector<2x128xbf16>, vector<128x512xbf16>, vector<2x512xf32> -> vector<2x512xf32>
    %391 = arith.addf %388, %390 : vector<2x512xf32>
    %392 = vector.extract_strided_slice %391 {offsets = [0, 0], sizes = [2, 128], strides = [1, 1]} : vector<2x512xf32> to vector<2x128xf32>
    %393 = arith.negf %392 : vector<2x128xf32>
    %394 = math.exp %393 : vector<2x128xf32>
    %cst_57 = arith.constant 1.000000e+00 : f32
    %395 = vector.broadcast %cst_57 : f32 to vector<2x128xf32>
    %396 = arith.addf %395, %394 : vector<2x128xf32>
    %397 = arith.divf %395, %396 : vector<2x128xf32>
    %398 = vector.extract_strided_slice %391 {offsets = [0, 128], sizes = [2, 128], strides = [1, 1]} : vector<2x512xf32> to vector<2x128xf32>
    %399 = arith.negf %398 : vector<2x128xf32>
    %400 = math.exp %399 : vector<2x128xf32>
    %cst_58 = arith.constant 1.000000e+00 : f32
    %401 = vector.broadcast %cst_58 : f32 to vector<2x128xf32>
    %402 = arith.addf %401, %400 : vector<2x128xf32>
    %403 = arith.divf %401, %402 : vector<2x128xf32>
    %404 = vector.extract_strided_slice %391 {offsets = [0, 256], sizes = [2, 128], strides = [1, 1]} : vector<2x512xf32> to vector<2x128xf32>
    %405 = math.tanh %404 : vector<2x128xf32>
    %406 = vector.extract_strided_slice %391 {offsets = [0, 384], sizes = [2, 128], strides = [1, 1]} : vector<2x512xf32> to vector<2x128xf32>
    %407 = arith.negf %406 : vector<2x128xf32>
    %408 = math.exp %407 : vector<2x128xf32>
    %cst_59 = arith.constant 1.000000e+00 : f32
    %409 = vector.broadcast %cst_59 : f32 to vector<2x128xf32>
    %410 = arith.addf %409, %408 : vector<2x128xf32>
    %411 = arith.divf %409, %410 : vector<2x128xf32>
    %412 = arith.mulf %403, %353 : vector<2x128xf32>
    %413 = arith.mulf %397, %405 : vector<2x128xf32>
    %414 = arith.addf %412, %413 : vector<2x128xf32>
    %415 = math.tanh %414 : vector<2x128xf32>
    %416 = arith.mulf %411, %415 : vector<2x128xf32>
    %417 = tpu.concatenate %416, %385 in 1 : vector<2x128xf32>, vector<2x128xf32> -> vector<2x256xf32>
    %418 = arith.truncf %417 : vector<2x256xf32> to vector<2x256xbf16>
    %cst_60 = arith.constant dense<0.000000e+00> : vector<2x512xf32>
    %419 = tpu.matmul %418, %263, %cst_60 {dimension_numbers = #tpu.dot_dimension_numbers<[1], [0], [0], [1], [0, 0, 1, 1], [], []>} : vector<2x256xbf16>, vector<256x512xbf16>, vector<2x512xf32> -> vector<2x512xf32>
    %420 = vector.broadcast %261 : vector<1x512xf32> to vector<2x512xf32>
    %421 = arith.addf %419, %420 : vector<2x512xf32>
    %422 = vector.extract_strided_slice %421 {offsets = [0, 0], sizes = [2, 128], strides = [1, 1]} : vector<2x512xf32> to vector<2x128xf32>
    %423 = arith.negf %422 : vector<2x128xf32>
    %424 = math.exp %423 : vector<2x128xf32>
    %cst_61 = arith.constant 1.000000e+00 : f32
    %425 = vector.broadcast %cst_61 : f32 to vector<2x128xf32>
    %426 = arith.addf %425, %424 : vector<2x128xf32>
    %427 = arith.divf %425, %426 : vector<2x128xf32>
    %428 = vector.extract_strided_slice %421 {offsets = [0, 128], sizes = [2, 128], strides = [1, 1]} : vector<2x512xf32> to vector<2x128xf32>
    %429 = arith.negf %428 : vector<2x128xf32>
    %430 = math.exp %429 : vector<2x128xf32>
    %cst_62 = arith.constant 1.000000e+00 : f32
    %431 = vector.broadcast %cst_62 : f32 to vector<2x128xf32>
    %432 = arith.addf %431, %430 : vector<2x128xf32>
    %433 = arith.divf %431, %432 : vector<2x128xf32>
    %434 = vector.extract_strided_slice %421 {offsets = [0, 256], sizes = [2, 128], strides = [1, 1]} : vector<2x512xf32> to vector<2x128xf32>
    %435 = math.tanh %434 : vector<2x128xf32>
    %436 = vector.extract_strided_slice %421 {offsets = [0, 384], sizes = [2, 128], strides = [1, 1]} : vector<2x512xf32> to vector<2x128xf32>
    %437 = arith.negf %436 : vector<2x128xf32>
    %438 = math.exp %437 : vector<2x128xf32>
    %cst_63 = arith.constant 1.000000e+00 : f32
    %439 = vector.broadcast %cst_63 : f32 to vector<2x128xf32>
    %440 = arith.addf %439, %438 : vector<2x128xf32>
    %441 = arith.divf %439, %440 : vector<2x128xf32>
    %442 = arith.mulf %433, %383 : vector<2x128xf32>
    %443 = arith.mulf %427, %435 : vector<2x128xf32>
    %444 = arith.addf %442, %443 : vector<2x128xf32>
    %445 = math.tanh %444 : vector<2x128xf32>
    %446 = arith.mulf %441, %445 : vector<2x128xf32>
    %c0_64 = arith.constant 0 : index
    %c256 = arith.constant 256 : index
    %447 = vector.load %arg22[%c0_64, %c256] : memref<2x512xf32, #tpu.memory_space<vmem>>, vector<2x128xf32>
    tpu.vector_store %arg22[%c0_64, %c256], %446 {strides = array<i32>} : memref<2x512xf32, #tpu.memory_space<vmem>>, vector<2x128xf32>,
    %448 = vector.extract_strided_slice %254 {offsets = [6, 0], sizes = [2, 512], strides = [1, 1]} : vector<8x512xf32> to vector<2x512xf32>
    %449 = arith.addf %448, %260 : vector<2x512xf32>
    %450 = arith.truncf %416 : vector<2x128xf32> to vector<2x128xbf16>
    %cst_65 = arith.constant dense<0.000000e+00> : vector<2x512xf32>
    %451 = tpu.matmul %450, %262, %cst_65 {dimension_numbers = #tpu.dot_dimension_numbers<[1], [0], [0], [1], [0, 0, 1, 1], [], []>} : vector<2x128xbf16>, vector<128x512xbf16>, vector<2x512xf32> -> vector<2x512xf32>
    %452 = arith.addf %449, %451 : vector<2x512xf32>
    %453 = vector.extract_strided_slice %452 {offsets = [0, 0], sizes = [2, 128], strides = [1, 1]} : vector<2x512xf32> to vector<2x128xf32>
    %454 = arith.negf %453 : vector<2x128xf32>
    %455 = math.exp %454 : vector<2x128xf32>
    %cst_66 = arith.constant 1.000000e+00 : f32
    %456 = vector.broadcast %cst_66 : f32 to vector<2x128xf32>
    %457 = arith.addf %456, %455 : vector<2x128xf32>
    %458 = arith.divf %456, %457 : vector<2x128xf32>
    %459 = vector.extract_strided_slice %452 {offsets = [0, 128], sizes = [2, 128], strides = [1, 1]} : vector<2x512xf32> to vector<2x128xf32>
    %460 = arith.negf %459 : vector<2x128xf32>
    %461 = math.exp %460 : vector<2x128xf32>
    %cst_67 = arith.constant 1.000000e+00 : f32
    %462 = vector.broadcast %cst_67 : f32 to vector<2x128xf32>
    %463 = arith.addf %462, %461 : vector<2x128xf32>
    %464 = arith.divf %462, %463 : vector<2x128xf32>
    %465 = vector.extract_strided_slice %452 {offsets = [0, 256], sizes = [2, 128], strides = [1, 1]} : vector<2x512xf32> to vector<2x128xf32>
    %466 = math.tanh %465 : vector<2x128xf32>
    %467 = vector.extract_strided_slice %452 {offsets = [0, 384], sizes = [2, 128], strides = [1, 1]} : vector<2x512xf32> to vector<2x128xf32>
    %468 = arith.negf %467 : vector<2x128xf32>
    %469 = math.exp %468 : vector<2x128xf32>
    %cst_68 = arith.constant 1.000000e+00 : f32
    %470 = vector.broadcast %cst_68 : f32 to vector<2x128xf32>
    %471 = arith.addf %470, %469 : vector<2x128xf32>
    %472 = arith.divf %470, %471 : vector<2x128xf32>
    %473 = arith.mulf %464, %414 : vector<2x128xf32>
    %474 = arith.mulf %458, %466 : vector<2x128xf32>
    %475 = arith.addf %473, %474 : vector<2x128xf32>
    %476 = math.tanh %475 : vector<2x128xf32>
    %477 = arith.mulf %472, %476 : vector<2x128xf32>
    %478 = tpu.concatenate %477, %446 in 1 : vector<2x128xf32>, vector<2x128xf32> -> vector<2x256xf32>
    %479 = arith.truncf %478 : vector<2x256xf32> to vector<2x256xbf16>
    %cst_69 = arith.constant dense<0.000000e+00> : vector<2x512xf32>
    %480 = tpu.matmul %479, %263, %cst_69 {dimension_numbers = #tpu.dot_dimension_numbers<[1], [0], [0], [1], [0, 0, 1, 1], [], []>} : vector<2x256xbf16>, vector<256x512xbf16>, vector<2x512xf32> -> vector<2x512xf32>
    %481 = vector.broadcast %261 : vector<1x512xf32> to vector<2x512xf32>
    %482 = arith.addf %480, %481 : vector<2x512xf32>
    %483 = vector.extract_strided_slice %482 {offsets = [0, 0], sizes = [2, 128], strides = [1, 1]} : vector<2x512xf32> to vector<2x128xf32>
    %484 = arith.negf %483 : vector<2x128xf32>
    %485 = math.exp %484 : vector<2x128xf32>
    %cst_70 = arith.constant 1.000000e+00 : f32
    %486 = vector.broadcast %cst_70 : f32 to vector<2x128xf32>
    %487 = arith.addf %486, %485 : vector<2x128xf32>
    %488 = arith.divf %486, %487 : vector<2x128xf32>
    %489 = vector.extract_strided_slice %482 {offsets = [0, 128], sizes = [2, 128], strides = [1, 1]} : vector<2x512xf32> to vector<2x128xf32>
    %490 = arith.negf %489 : vector<2x128xf32>
    %491 = math.exp %490 : vector<2x128xf32>
    %cst_71 = arith.constant 1.000000e+00 : f32
    %492 = vector.broadcast %cst_71 : f32 to vector<2x128xf32>
    %493 = arith.addf %492, %491 : vector<2x128xf32>
    %494 = arith.divf %492, %493 : vector<2x128xf32>
    %495 = vector.extract_strided_slice %482 {offsets = [0, 256], sizes = [2, 128], strides = [1, 1]} : vector<2x512xf32> to vector<2x128xf32>
    %496 = math.tanh %495 : vector<2x128xf32>
    %497 = vector.extract_strided_slice %482 {offsets = [0, 384], sizes = [2, 128], strides = [1, 1]} : vector<2x512xf32> to vector<2x128xf32>
    %498 = arith.negf %497 : vector<2x128xf32>
    %499 = math.exp %498 : vector<2x128xf32>
    %cst_72 = arith.constant 1.000000e+00 : f32
    %500 = vector.broadcast %cst_72 : f32 to vector<2x128xf32>
    %501 = arith.addf %500, %499 : vector<2x128xf32>
    %502 = arith.divf %500, %501 : vector<2x128xf32>
    %503 = arith.mulf %494, %444 : vector<2x128xf32>
    %504 = arith.mulf %488, %496 : vector<2x128xf32>
    %505 = arith.addf %503, %504 : vector<2x128xf32>
    %506 = math.tanh %505 : vector<2x128xf32>
    %507 = arith.mulf %502, %506 : vector<2x128xf32>
    %c0_73 = arith.constant 0 : index
    %c384 = arith.constant 384 : index
    %508 = vector.load %arg22[%c0_73, %c384] : memref<2x512xf32, #tpu.memory_space<vmem>>, vector<2x128xf32>
    tpu.vector_store %arg22[%c0_73, %c384], %507 {strides = array<i32>} : memref<2x512xf32, #tpu.memory_space<vmem>>, vector<2x128xf32>,
    %c0_74 = arith.constant 0 : index
    %c0_75 = arith.constant 0 : index
    %509 = vector.load %arg22[%c0_74, %c0_75] : memref<2x512xf32, #tpu.memory_space<vmem>>, vector<2x512xf32>
    %510 = arith.truncf %509 : vector<2x512xf32> to vector<2x512xbf16>
    %c0_76 = arith.constant 0 : index
    %c0_77 = arith.constant 0 : index
    %511 = vector.load %arg17[%c0_76, %c0_77] : memref<512x512xbf16, #tpu.memory_space<vmem>>, vector<512x512xbf16>
    %cst_78 = arith.constant dense<0.000000e+00> : vector<2x512xf32>
    %512 = tpu.matmul %510, %511, %cst_78 {dimension_numbers = #tpu.dot_dimension_numbers<[1], [0], [0], [1], [0, 0, 1, 1], [], []>} : vector<2x512xbf16>, vector<512x512xbf16>, vector<2x512xf32> -> vector<2x512xf32>
    %c0_79 = arith.constant 0 : index
    %c0_80 = arith.constant 0 : index
    %513 = vector.load %arg18[%c0_79, %c0_80] : memref<1x512xf32, #tpu.memory_space<vmem>>, vector<1x512xf32>
    %514 = vector.broadcast %513 : vector<1x512xf32> to vector<2x512xf32>
    %515 = arith.addf %512, %514 : vector<2x512xf32>
    %c0_81 = arith.constant 0 : index
    %c0_82 = arith.constant 0 : index
    %516 = vector.load %arg19[%c0_81, %c0_82] : memref<2x512xf32, #tpu.memory_space<vmem>>, vector<2x512xf32>
    tpu.vector_store %arg19[%c0_81, %c0_82], %515 {strides = array<i32>} : memref<2x512xf32, #tpu.memory_space<vmem>>, vector<2x512xf32>,
    %c0_83 = arith.constant 0 : index
    %c0_84 = arith.constant 0 : index
    %c0_85 = arith.constant 0 : index
    %517 = vector.load %arg20[%c0_83, %c0_84, %c0_85] : memref<2x2x128xf32, #tpu.memory_space<vmem>>, vector<1x2x128xf32>
    %518 = vector.shape_cast %517 : vector<1x2x128xf32> to vector<2x128xf32>
    %519 = vector.shape_cast %477 : vector<2x128xf32> to vector<1x2x128xf32>
    tpu.vector_store %arg20[%c0_83, %c0_84, %c0_85], %519 {strides = array<i32>} : memref<2x2x128xf32, #tpu.memory_space<vmem>>, vector<1x2x128xf32>,
    %c1 = arith.constant 1 : index
    %c0_86 = arith.constant 0 : index
    %c0_87 = arith.constant 0 : index
    %520 = vector.load %arg20[%c1, %c0_86, %c0_87] : memref<2x2x128xf32, #tpu.memory_space<vmem>>, vector<1x2x128xf32>
    %521 = vector.shape_cast %520 : vector<1x2x128xf32> to vector<2x128xf32>
    %522 = vector.shape_cast %507 : vector<2x128xf32> to vector<1x2x128xf32>
    tpu.vector_store %arg20[%c1, %c0_86, %c0_87], %522 {strides = array<i32>} : memref<2x2x128xf32, #tpu.memory_space<vmem>>, vector<1x2x128xf32>,
    %c0_88 = arith.constant 0 : index
    %c0_89 = arith.constant 0 : index
    %c0_90 = arith.constant 0 : index
    %523 = vector.load %arg21[%c0_88, %c0_89, %c0_90] : memref<2x2x128xf32, #tpu.memory_space<vmem>>, vector<1x2x128xf32>
    %524 = vector.shape_cast %523 : vector<1x2x128xf32> to vector<2x128xf32>
    %525 = vector.shape_cast %475 : vector<2x128xf32> to vector<1x2x128xf32>
    tpu.vector_store %arg21[%c0_88, %c0_89, %c0_90], %525 {strides = array<i32>} : memref<2x2x128xf32, #tpu.memory_space<vmem>>, vector<1x2x128xf32>,
    %c1_91 = arith.constant 1 : index
    %c0_92 = arith.constant 0 : index
    %c0_93 = arith.constant 0 : index
    %526 = vector.load %arg21[%c1_91, %c0_92, %c0_93] : memref<2x2x128xf32, #tpu.memory_space<vmem>>, vector<1x2x128xf32>
    %527 = vector.shape_cast %526 : vector<1x2x128xf32> to vector<2x128xf32>
    %528 = vector.shape_cast %505 : vector<2x128xf32> to vector<1x2x128xf32>
    tpu.vector_store %arg21[%c1_91, %c0_92, %c0_93], %528 {strides = array<i32>} : memref<2x2x128xf32, #tpu.memory_space<vmem>>, vector<1x2x128xf32>,
    return
  }
}

</mosaic_0001>

<bundles_post_ra>
// kernel: tpu_custom_call.1
= control target key start
LH: loop header
LB: loop body
LE: loop exit
PB: predicated region body
PF: predicated region fallthrough
CT: control target
= control target key end

     0   :  { %s7397_s0 = inlined_call_operand.hbm [shape: f32[8,512], index: 0, kind: input, shape index: {}]   ;;  %s7398_s1 = inlined_call_operand.hbm [shape: f32[2,3], index: 1, kind: input, shape index: {}]   ;;  %s7399_s2 = inlined_call_operand.hbm [shape: f32[2,3], index: 2, kind: input, shape index: {}]   ;;  %s7400_s3 = inlined_call_operand.hbm [shape: f32[3,16], index: 3, kind: input, shape index: {}]   ;;  %s7401_s4 = inlined_call_operand.vmem [shape: f32[1,16], index: 4, kind: input, shape index: {}]   ;;  %s7402_s5 = inlined_call_operand.vmem [shape: f32[16,64], index: 5, kind: input, shape index: {}]   ;;  %s7403_s6 = inlined_call_operand.hbm [shape: f32[1,64], index: 6, kind: input, shape index: {}]   ;;  %s7404_s7 = inlined_call_operand.hbm [shape: f32[3,16], index: 7, kind: input, shape index: {}]   ;;  %s7405_s8 = inlined_call_operand.hbm [shape: f32[1,16], index: 8, kind: input, shape index: {}]   ;;  %s7406_s9 = inlined_call_operand.vmem [shape: f32[16,64], index: 9, kind: input, shape index: {}]   ;;  %s7407_s10 = inlined_call_operand.hbm [shape: f32[1,64], index: 10, kind: input, shape index: {}]   ;;  %s7408_s11 = inlined_call_operand.hbm [shape: bf16[512,512], index: 11, kind: input, shape index: {}]   ;;  %s7409_s12 = inlined_call_operand.hbm [shape: bf16[128,512], index: 12, kind: input, shape index: {}]   ;;  %s7410_s13 = inlined_call_operand.hbm [shape: bf16[128,512], index: 13, kind: input, shape index: {}]   ;;  %s7411_s14 = inlined_call_operand.vmem [shape: f32[1,512], index: 14, kind: input, shape index: {}]   ;;  %s7412_s15 = inlined_call_operand.hbm [shape: bf16[256,512], index: 15, kind: input, shape index: {}]   ;;  %s7413_s16 = inlined_call_operand.vmem [shape: f32[1,512], index: 16, kind: input, shape index: {}]   ;;  %s7414_s17 = inlined_call_operand.hbm [shape: bf16[512,512], index: 17, kind: input, shape index: {}]   ;;  %s7415_s18 = inlined_call_operand.vmem [shape: f32[1,512], index: 18, kind: input, shape index: {}]   ;;  %s7416_s19 = inlined_call_operand.hbm [shape: f32[2,512], index: 19, kind: output, shape index: {0}]   ;;  %s7417_s20 = inlined_call_operand.hbm [shape: f32[2,2,128], index: 20, kind: output, shape index: {1}]   ;;  %s7418_s21 = inlined_call_operand.hbm [shape: f32[2,2,128], index: 21, kind: output, shape index: {2}]  }
   0x1   :  { %7558 = sst [smem:[#allocation113_spill]] %s7397_s0 }
   0x2   :  { %7559 = sst [smem:[#allocation114_spill]] %s7398_s1 }
   0x3   :  { %7560 = sst [smem:[#allocation115_spill]] %s7399_s2 }
   0x4   :  { %7561 = sst [smem:[#allocation116_spill]] %s7400_s3 }
   0x5   :  { %7562 = sst [smem:[#allocation117_spill]] %s7401_s4 }
   0x6   :  { %7563 = sst [smem:[#allocation118_spill]] %s7402_s5 }
   0x7   :  { %27 = vsyncpa [#allocation4], 0 }
   0x8   :  { %28 = vsyncpa [#allocation7], 0 }
   0x9   :  { %29 = vsyncpa [#allocation10], 0 }
   0xa   :  { %30 = vsyncpa [#allocation13], 0 }
   0xb   :  { %31 = vsyncpa [#allocation16], 0 }
   0xc   :  { %32 = vsyncpa [#allocation19], 0 }
   0xd   :  { %33 = vsyncpa [#allocation22], 0 }
   0xe   :  { %34 = vsyncpa [#allocation5], 0 }
   0xf   :  { %35 = vsyncpa [#allocation26], 0  ;;  %s6224_s2 = smov [#allocation6]   ;;  %s6225_s26 = smov [#allocation9]  }
  0x10   :  { %s52_s25 = sshll.u32 %s6224_s2, 4  ;;  %s72_s27 = sshll.u32 %s6225_s26, 4  ;;  %s53_s25 = int_to_ptr.vmem [resolvable:$true] %s52_s25  ;;  %s73_s27 = int_to_ptr.vmem [resolvable:$true] %s72_s27 }
  0x11   :  { %s7564_s29 = sld [smem:[#allocation114_spill]] }
  0x17   :  { %s5854_s0 = scalar_lea.hbm %s7564_s29, 32 }
  0x18   :  { %p5855_p0 = scmp.ne.s32.totalorder %s7564_s29, %s5854_s0  ;;  %p5858_p1 = scmp.lt.u32.totalorder %s5854_s0, %s7564_s29 }
  0x1a   :  { %p5860_p2 = pnand %p5858_p1, %p5855_p0 }
  0x1c   :  { %5863 = shalt.err (!%p5860_p2)
}
  0x1d   :  { %s5864_s23 = scalar_lea.vmem %s53_s25, 32  ;;  %p5869_p4 = scmp.lt.s32.totalorder %s53_s25, %s53_s25 }
  0x1e   :  { %p5865_p3 = scmp.ne.s32.totalorder %s53_s25, %s5864_s23  ;;  %p5870_p5 = scmp.lt.s32.totalorder %s5864_s23, %s5864_s23 }
  0x20   :  { %p5871_p6 = por %p5870_p5, %p5869_p4 }
  0x22   :  { %p5872_p7 = pnand %p5871_p6, %p5865_p3 }
  0x24   :  { %5875 = shalt.err (!%p5872_p7)
}
  0x25   :  { %55 = dma.hbm_to_vmem [thread:$0]  %s7564_s29, 32, %s53_s25, [#allocation7]  }
  0x26   :  { %s7565_s3 = sld [smem:[#allocation116_spill]] }
  0x2c   :  { %s5876_s28 = scalar_lea.hbm %s7565_s3, 64 }
  0x2d   :  { %p5877_p8 = scmp.ne.s32.totalorder %s7565_s3, %s5876_s28  ;;  %p5880_p9 = scmp.lt.u32.totalorder %s5876_s28, %s7565_s3 }
  0x2f   :  { %p5882_p10 = pnand %p5880_p9, %p5877_p8 }
  0x31   :  { %5885 = shalt.err (!%p5882_p10)
}
  0x32   :  { %s5886_s22 = scalar_lea.vmem %s73_s27, 64  ;;  %p5891_p12 = scmp.lt.s32.totalorder %s73_s27, %s73_s27 }
  0x33   :  { %p5887_p11 = scmp.ne.s32.totalorder %s73_s27, %s5886_s22  ;;  %p5892_p13 = scmp.lt.s32.totalorder %s5886_s22, %s5886_s22 }
  0x35   :  { %p5893_p0 = por %p5892_p13, %p5891_p12 }
  0x37   :  { %p5894_p1 = pnand %p5893_p0, %p5887_p11 }
  0x39   :  { %5897 = shalt.err (!%p5894_p1)
}
  0x3a   :  { %75 = dma.hbm_to_vmem [thread:$0]  %s7565_s3, 64, %s73_s27, [#allocation10]  }
  0x3b   :  { %s6226_s23 = smov [#allocation12]   ;;  %s6227_s24 = smov [#allocation15]  }
  0x3c   :  { %s96_s1 = sshll.u32 %s6226_s23, 4  ;;  %s118_s2 = sshll.u32 %s6227_s24, 4  ;;  %s97_s1 = int_to_ptr.vmem [resolvable:$true] %s96_s1  ;;  %s119_s2 = int_to_ptr.vmem [resolvable:$true] %s118_s2 }
  0x3d   :  { %s5898_s4 = scalar_lea.hbm %s7404_s7, 64 }
  0x3e   :  { %p5899_p2 = scmp.ne.s32.totalorder %s7404_s7, %s5898_s4  ;;  %p5902_p3 = scmp.lt.u32.totalorder %s5898_s4, %s7404_s7 }
  0x40   :  { %p5904_p4 = pnand %p5902_p3, %p5899_p2 }
  0x42   :  { %5907 = shalt.err (!%p5904_p4)
}
  0x43   :  { %s5908_s27 = scalar_lea.vmem %s97_s1, 64  ;;  %p5913_p6 = scmp.lt.s32.totalorder %s97_s1, %s97_s1 }
  0x44   :  { %p5909_p5 = scmp.ne.s32.totalorder %s97_s1, %s5908_s27  ;;  %p5914_p7 = scmp.lt.s32.totalorder %s5908_s27, %s5908_s27 }
  0x46   :  { %p5915_p8 = por %p5914_p7, %p5913_p6 }
  0x48   :  { %p5916_p9 = pnand %p5915_p8, %p5909_p5 }
  0x4a   :  { %5919 = shalt.err (!%p5916_p9)
}
  0x4b   :  { %99 = dma.hbm_to_vmem [thread:$0]  %s7404_s7, 64, %s97_s1, [#allocation13]  }
  0x4c   :  { %s5920_s24 = scalar_lea.hbm %s7407_s10, 16 }
  0x4d   :  { %p5921_p10 = scmp.ne.s32.totalorder %s7407_s10, %s5920_s24  ;;  %p5924_p11 = scmp.lt.u32.totalorder %s5920_s24, %s7407_s10 }
  0x4f   :  { %p5926_p12 = pnand %p5924_p11, %p5921_p10 }
  0x51   :  { %5929 = shalt.err (!%p5926_p12)
}
  0x52   :  { %s5930_s0 = scalar_lea.vmem %s119_s2, 16  ;;  %s5934_s5 = scalar_lea.vmem %s119_s2, 32 }
  0x53   :  { %p5931_p13 = scmp.ne.s32.totalorder %s119_s2, %s5930_s0  ;;  %p5935_p0 = scmp.lt.s32.totalorder %s119_s2, %s119_s2 }
  0x54   :  { %p5936_p1 = scmp.lt.s32.totalorder %s5934_s5, %s5930_s0 }
  0x56   :  { %p5937_p2 = por %p5936_p1, %p5935_p0 }
  0x58   :  { %p5938_p3 = pnand %p5937_p2, %p5931_p13 }
  0x5a   :  { %5941 = shalt.err (!%p5938_p3)
}
  0x5b   :  { %121 = dma.hbm_to_vmem [thread:$0]  %s7407_s10, 16, %s119_s2, [#allocation16]  }
  0x5c   :  { %s6228_s22 = smov [#allocation18]   ;;  %s6229_s3 = smov [#allocation21]  }
  0x5d   :  { %s139_s27 = sshll.u32 %s6228_s22, 4  ;;  %s165_s25 = sshll.u32 %s6229_s3, 4  ;;  %s140_s27 = int_to_ptr.vmem [resolvable:$true] %s139_s27  ;;  %s6421_s25 = int_to_ptr.vmem [resolvable:$true] %s165_s25 }
  0x5e   :  { %s5942_s24 = scalar_lea.hbm %s7409_s12, 4096 }
  0x5f   :  { %p5943_p4 = scmp.ne.s32.totalorder %s7409_s12, %s5942_s24  ;;  %p5946_p5 = scmp.lt.u32.totalorder %s5942_s24, %s7409_s12 }
  0x61   :  { %p5948_p6 = pnand %p5946_p5, %p5943_p4 }
  0x63   :  { %5951 = shalt.err (!%p5948_p6)
}
  0x64   :  { %s5952_s10 = scalar_lea.vmem %s140_s27, 4096  ;;  %p5957_p8 = scmp.lt.s32.totalorder %s140_s27, %s140_s27 }
  0x65   :  { %p5953_p7 = scmp.ne.s32.totalorder %s140_s27, %s5952_s10  ;;  %p5958_p9 = scmp.lt.s32.totalorder %s5952_s10, %s5952_s10 }
  0x67   :  { %p5959_p10 = por %p5958_p9, %p5957_p8 }
  0x69   :  { %p5960_p11 = pnand %p5959_p10, %p5953_p7 }
  0x6b   :  { %5963 = shalt.err (!%p5960_p11)
}
  0x6c   :  { %s6230_s2 = smov 256   ;;  %s6231_s0 = smov 16  }
  0x6d   :  { %145 = dma.hbm_to_vmem [thread:$0]  %s7409_s12, 4096, %s140_s27, [#allocation19], %s6230_s2, %s6230_s2, %s6231_s0  }
  0x6e   :  { %s5964_s3 = scalar_lea.hbm %s7412_s15, 8192 }
  0x6f   :  { %p5965_p12 = scmp.ne.s32.totalorder %s7412_s15, %s5964_s3  ;;  %p5968_p13 = scmp.lt.u32.totalorder %s5964_s3, %s7412_s15 }
  0x71   :  { %p5970_p0 = pnand %p5968_p13, %p5965_p12 }
  0x73   :  { %5973 = shalt.err (!%p5970_p0)
}
  0x74   :  { %s5974_s28 = scalar_lea.vmem %s6421_s25, 8192  ;;  %p5979_p2 = scmp.lt.s32.totalorder %s6421_s25, %s6421_s25 }
  0x75   :  { %p5975_p1 = scmp.ne.s32.totalorder %s6421_s25, %s5974_s28  ;;  %p5980_p3 = scmp.lt.s32.totalorder %s5974_s28, %s5974_s28 }
  0x77   :  { %p5981_p4 = por %p5980_p3, %p5979_p2 }
  0x79   :  { %p5982_p5 = pnand %p5981_p4, %p5975_p1 }
  0x7b   :  { %5985 = shalt.err (!%p5982_p5)
}
  0x7c   :  { %171 = dma.hbm_to_vmem [thread:$0]  %s7412_s15, 8192, %s6421_s25, [#allocation22], %s6230_s2, %s6230_s2, %s6231_s0  }
  0x7d   :  { %s6232_s4 = smov [#allocation3]   ;;  %s6233_s10 = smov [#allocation8]  }
  0x7e   :  { %s42_s30 = sshll.u32 %s6232_s4, 4  ;;  %s62_s5 = sshll.u32 %s6233_s10, 4  ;;  %s43_s30 = int_to_ptr.vmem [resolvable:$true] %s42_s30  ;;  %s63_s5 = int_to_ptr.vmem [resolvable:$true] %s62_s5 }
  0x7f   :  { %s7566_s22 = sld [smem:[#allocation113_spill]] }
  0x85   :  { %s5986_s3 = scalar_lea.hbm %s7566_s22, 512 }
  0x86   :  { %p5987_p6 = scmp.ne.s32.totalorder %s7566_s22, %s5986_s3  ;;  %p5990_p7 = scmp.lt.u32.totalorder %s5986_s3, %s7566_s22 }
  0x88   :  { %p5992_p8 = pnand %p5990_p7, %p5987_p6 }
  0x8a   :  { %5995 = shalt.err (!%p5992_p8)
}
  0x8b   :  { %s5996_s15 = scalar_lea.vmem %s43_s30, 512  ;;  %p6001_p10 = scmp.lt.s32.totalorder %s43_s30, %s43_s30 }
  0x8c   :  { %p5997_p9 = scmp.ne.s32.totalorder %s43_s30, %s5996_s15  ;;  %p6002_p11 = scmp.lt.s32.totalorder %s5996_s15, %s5996_s15 }
  0x8e   :  { %p6003_p12 = por %p6002_p11, %p6001_p10 }
  0x90   :  { %p6004_p13 = pnand %p6003_p12, %p5997_p9 }
  0x92   :  { %6007 = shalt.err (!%p6004_p13)
}
  0x93   :  { %45 = dma.hbm_to_vmem [thread:$0]  %s7566_s22, 512, %s43_s30, [#allocation4]  }
  0x94   :  { %s7567_s4 = sld [smem:[#allocation115_spill]] }
  0x9a   :  { %s6008_s10 = scalar_lea.hbm %s7567_s4, 32 }
  0x9b   :  { %p6009_p0 = scmp.ne.s32.totalorder %s7567_s4, %s6008_s10  ;;  %p6012_p1 = scmp.lt.u32.totalorder %s6008_s10, %s7567_s4 }
  0x9d   :  { %p6014_p2 = pnand %p6012_p1, %p6009_p0 }
  0x9f   :  { %6017 = shalt.err (!%p6014_p2)
}
  0xa0   :  { %s6018_s23 = scalar_lea.vmem %s63_s5, 32  ;;  %p6023_p4 = scmp.lt.s32.totalorder %s63_s5, %s63_s5 }
  0xa1   :  { %p6019_p3 = scmp.ne.s32.totalorder %s63_s5, %s6018_s23  ;;  %p6024_p5 = scmp.lt.s32.totalorder %s6018_s23, %s6018_s23 }
  0xa3   :  { %p6025_p6 = por %p6024_p5, %p6023_p4 }
  0xa5   :  { %p6026_p7 = pnand %p6025_p6, %p6019_p3 }
  0xa7   :  { %6029 = shalt.err (!%p6026_p7)
}
  0xa8   :  { %65 = dma.hbm_to_vmem [thread:$0]  %s7567_s4, 32, %s63_s5, [#allocation7]  }
  0xa9   :  { %s6234_s24 = smov [#allocation11]   ;;  %s6235_s15 = smov [#allocation14]  }
  0xaa   :  { %s86_s26 = sshll.u32 %s6234_s24, 4  ;;  %s106_s25 = sshll.u32 %s6235_s15, 4  ;;  %s87_s26 = int_to_ptr.vmem [resolvable:$true] %s86_s26  ;;  %s107_s25 = int_to_ptr.vmem [resolvable:$true] %s106_s25 }
  0xab   :  { %s6030_s27 = scalar_lea.hbm %s7403_s6, 16 }
  0xac   :  { %p6031_p8 = scmp.ne.s32.totalorder %s7403_s6, %s6030_s27  ;;  %p6034_p9 = scmp.lt.u32.totalorder %s6030_s27, %s7403_s6 }
  0xae   :  { %p6036_p10 = pnand %p6034_p9, %p6031_p8 }
  0xb0   :  { %6039 = shalt.err (!%p6036_p10)
}
  0xb1   :  { %s6040_s5 = scalar_lea.vmem %s87_s26, 16  ;;  %s6044_s4 = scalar_lea.vmem %s87_s26, 32 }
  0xb2   :  { %p6041_p11 = scmp.ne.s32.totalorder %s87_s26, %s6040_s5  ;;  %p6045_p12 = scmp.lt.s32.totalorder %s87_s26, %s87_s26 }
  0xb3   :  { %p6046_p13 = scmp.lt.s32.totalorder %s6044_s4, %s6040_s5 }
  0xb5   :  { %p6047_p0 = por %p6046_p13, %p6045_p12 }
  0xb7   :  { %p6048_p1 = pnand %p6047_p0, %p6041_p11 }
  0xb9   :  { %6051 = shalt.err (!%p6048_p1)
}
  0xba   :  { %89 = dma.hbm_to_vmem [thread:$0]  %s7403_s6, 16, %s87_s26, [#allocation10]  }
  0xbb   :  { %s6052_s24 = scalar_lea.hbm %s7405_s8, 16 }
  0xbc   :  { %p6053_p2 = scmp.ne.s32.totalorder %s7405_s8, %s6052_s24  ;;  %p6056_p3 = scmp.lt.u32.totalorder %s6052_s24, %s7405_s8 }
  0xbe   :  { %p6058_p4 = pnand %p6056_p3, %p6053_p2 }
  0xc0   :  { %6061 = shalt.err (!%p6058_p4)
}
  0xc1   :  { %s6062_s10 = scalar_lea.vmem %s107_s25, 16  ;;  %s6066_s7 = scalar_lea.vmem %s107_s25, 32 }
  0xc2   :  { %p6063_p5 = scmp.ne.s32.totalorder %s107_s25, %s6062_s10  ;;  %p6067_p6 = scmp.lt.s32.totalorder %s107_s25, %s107_s25 }
  0xc3   :  { %p6068_p7 = scmp.lt.s32.totalorder %s6066_s7, %s6062_s10 }
  0xc5   :  { %p6069_p8 = por %p6068_p7, %p6067_p6 }
  0xc7   :  { %p6070_p9 = pnand %p6069_p8, %p6063_p5 }
  0xc9   :  { %6073 = shalt.err (!%p6070_p9)
}
  0xca   :  { %109 = dma.hbm_to_vmem [thread:$0]  %s7405_s8, 16, %s107_s25, [#allocation13]  }
  0xcb   :  { %s6236_s1 = smov [#allocation17]   ;;  %s6237_s5 = smov [#allocation20]  }
  0xcc   :  { %s127_s3 = sshll.u32 %s6236_s1, 4  ;;  %s151_s4 = sshll.u32 %s6237_s5, 4  ;;  %s128_s3 = int_to_ptr.vmem [resolvable:$true] %s127_s3  ;;  %s6506_s4 = int_to_ptr.vmem [resolvable:$true] %s151_s4 }
  0xcd   :  { %s6074_s30 = scalar_lea.hbm %s7408_s11, 16384 }
  0xce   :  { %p6075_p10 = scmp.ne.s32.totalorder %s7408_s11, %s6074_s30  ;;  %p6078_p11 = scmp.lt.u32.totalorder %s6074_s30, %s7408_s11 }
  0xd0   :  { %p6080_p12 = pnand %p6078_p11, %p6075_p10 }
  0xd2   :  { %6083 = shalt.err (!%p6080_p12)
}
  0xd3   :  { %s6084_s8 = scalar_lea.vmem %s128_s3, 16384  ;;  %p6089_p0 = scmp.lt.s32.totalorder %s128_s3, %s128_s3 }
  0xd4   :  { %p6085_p13 = scmp.ne.s32.totalorder %s128_s3, %s6084_s8  ;;  %p6090_p1 = scmp.lt.s32.totalorder %s6084_s8, %s6084_s8 }
  0xd6   :  { %p6091_p2 = por %p6090_p1, %p6089_p0 }
  0xd8   :  { %p6092_p3 = pnand %p6091_p2, %p6085_p13 }
  0xda   :  { %6095 = shalt.err (!%p6092_p3)
}
  0xdb   :  { %133 = dma.hbm_to_vmem [thread:$0]  %s7408_s11, 16384, %s128_s3, [#allocation16], %s6230_s2, %s6230_s2, %s6231_s0  }
  0xdc   :  { %s6096_s7 = scalar_lea.hbm %s7410_s13, 4096 }
  0xdd   :  { %p6097_p4 = scmp.ne.s32.totalorder %s7410_s13, %s6096_s7  ;;  %p6100_p5 = scmp.lt.u32.totalorder %s6096_s7, %s7410_s13 }
  0xdf   :  { %p6102_p6 = pnand %p6100_p5, %p6097_p4 }
  0xe1   :  { %6105 = shalt.err (!%p6102_p6)
}
  0xe2   :  { %s6106_s29 = scalar_lea.vmem %s6506_s4, 4096  ;;  %p6111_p8 = scmp.lt.s32.totalorder %s6506_s4, %s6506_s4 }
  0xe3   :  { %p6107_p7 = scmp.ne.s32.totalorder %s6506_s4, %s6106_s29  ;;  %p6112_p9 = scmp.lt.s32.totalorder %s6106_s29, %s6106_s29 }
  0xe5   :  { %p6113_p10 = por %p6112_p9, %p6111_p8 }
  0xe7   :  { %p6114_p11 = pnand %p6113_p10, %p6107_p7 }
  0xe9   :  { %6117 = shalt.err (!%p6114_p11)
}
  0xea   :  { %157 = dma.hbm_to_vmem [thread:$0]  %s7410_s13, 4096, %s6506_s4, [#allocation19], %s6230_s2, %s6230_s2, %s6231_s0  }
  0xeb   :  { %s6238_s23 = smov [#allocation23]   ;;  %s6118_s15 = scalar_lea.hbm %s7414_s17, 16384 }
  0xec   :  { %s179_s30 = sshll.u32 %s6238_s23, 4  ;;  %p6119_p12 = scmp.ne.s32.totalorder %s7414_s17, %s6118_s15  ;;  %s180_s30 = int_to_ptr.vmem [resolvable:$true] %s179_s30 }
  0xed   :  { %p6122_p13 = scmp.lt.u32.totalorder %s6118_s15, %s7414_s17 }
  0xef   :  { %p6124_p0 = pnand %p6122_p13, %p6119_p12 }
  0xf1   :  { %6127 = shalt.err (!%p6124_p0)
}
  0xf2   :  { %s6128_s27 = scalar_lea.vmem %s180_s30, 16384  ;;  %p6133_p2 = scmp.lt.s32.totalorder %s180_s30, %s180_s30 }
  0xf3   :  { %p6129_p1 = scmp.ne.s32.totalorder %s180_s30, %s6128_s27  ;;  %p6134_p3 = scmp.lt.s32.totalorder %s6128_s27, %s6128_s27 }
  0xf5   :  { %p6135_p4 = por %p6134_p3, %p6133_p2 }
  0xf7   :  { %p6136_p5 = pnand %p6135_p4, %p6129_p1 }
  0xf9   :  { %6139 = shalt.err (!%p6136_p5)
}
  0xfa   :  { %185 = dma.hbm_to_vmem [thread:$0]  %s7414_s17, 16384, %s180_s30, [#allocation22], %s6230_s2, %s6230_s2, %s6231_s0  }
  0xfb   :  { %6206 = dma.done.wait [#allocation4], 512  }
  0xfc   :  { %6207 = vsyncadd [#allocation4], 4294966784 }
  0xfd   :  { %6208 = dma.done.wait [#allocation7], 64  }
  0xfe   :  { %6209 = vsyncadd [#allocation7], 4294967232 }
  0xff   :  { %6210 = dma.done.wait [#allocation10], 80  }
 0x100   :  { %6211 = vsyncadd [#allocation10], 4294967216 }
 0x101   :  { %6212 = dma.done.wait [#allocation13], 80  }
 0x102   :  { %6213 = vsyncadd [#allocation13], 4294967216 }
 0x103   :  { %6214 = dma.done.wait [#allocation16], 16400  }
 0x104   :  { %6215 = vsyncadd [#allocation16], 4294950896 }
 0x105   :  { %6216 = dma.done.wait [#allocation19], 8192  }
 0x106   :  { %6217 = vsyncadd [#allocation19], 4294959104 }
 0x107   :  { %6218 = dma.done.wait [#allocation22], 24576  }
 0x108   :  { %6219 = vsyncadd [#allocation22], 4294942720  ;;  %v7424_v0 = vmov 0   ;;  %v6240_v1 = vmov 2   ;;  %v439_v2 = vld [vmem:[#allocation8] sm:$0x3]  ;;  %v245_v40 = vlaneseq }
 0x109   :  { %5016 = vset.pattern.permute.xlu0 %v7424_v0  ;;  %5018 = vset.pattern.permute.xlu1 %v6240_v1  ;;  %v228_v3 = vld [vmem:[#allocation6] sm:$0x3]  ;;  %v6241_v4 = vmov 1   ;;  %v5053_v5 = vld [vmem:[#allocation17 + $0x4] ss:$16 sps:$4 sm:$0xff]   ;;  %s7572_s0 = sld [smem:[#allocation117_spill]] }
 0x10a   :  { %453 = vperm.xlu0 %5016, %v439_v2   ;;  %473 = vperm.xlu1 %5018, %v439_v2   ;;  %v5055_v6 = vld [vmem:[#allocation17] ss:$16 sps:$4 sm:$0xff]   ;;  %v5056_v7 = vld [vmem:[#allocation17 + $0x24] ss:$16 sps:$4 sm:$0xff]   ;;  %v5065_v13 = vld [vmem:[#allocation17 + $0xc] ss:$16 sps:$4 sm:$0xff]  }
 0x10b   :  { %1432 = vmatprep.subr.bf16.mxu0 %v5053_v5  ;;  %v5058_v8 = vld [vmem:[#allocation17 + $0x20] ss:$16 sps:$4 sm:$0xff]   ;;  %v5059_v9 = vld [vmem:[#allocation17 + $0x44] ss:$16 sps:$4 sm:$0xff]   ;;  %v5069_v15 = vld [vmem:[#allocation17 + $0x8] ss:$16 sps:$4 sm:$0xff]   ;;  %1514 = vmatprep.subr.bf16.mxu1 %v5065_v13 }
 0x10c   :  { %1433 = vmatpush1.bf16.msra.mxu0 %v5055_v6  ;;  %v5061_v10 = vld [vmem:[#allocation17 + $0x40] ss:$16 sps:$4 sm:$0xff]   ;;  %v5062_v11 = vld [vmem:[#allocation17 + $0x64] ss:$16 sps:$4 sm:$0xff]   ;;  %v5071_v17 = vld [vmem:[#allocation17 + $0x2c] ss:$16 sps:$4 sm:$0xff]   ;;  %1515 = vmatpush1.bf16.msra.mxu1 %v5069_v15 }
 0x10d   :  { %1434 = vmatprep.subr.bf16.mxu0 %v5056_v7  ;;  %v5064_v12 = vld [vmem:[#allocation17 + $0x60] ss:$16 sps:$4 sm:$0xff]   ;;  %v5067_v14 = vld [vmem:[#allocation17 + $0x84] ss:$16 sps:$4 sm:$0xff]   ;;  %1516 = vmatprep.subr.bf16.mxu1 %v5071_v17  ;;  %v5075_v19 = vld [vmem:[#allocation17 + $0x28] ss:$16 sps:$4 sm:$0xff]  }
 0x10e   :  { %5017 = vset.pattern.permute.xlu0 %v6241_v4  ;;  %5019 = vset.pattern.permute.xlu1 %v7424_v0  ;;  %v5070_v16 = vld [vmem:[#allocation17 + $0x80] ss:$16 sps:$4 sm:$0xff]   ;;  %v5073_v18 = vld [vmem:[#allocation17 + $0xa4] ss:$16 sps:$4 sm:$0xff]   ;;  %v5077_v21 = vld [vmem:[#allocation17 + $0x4c] ss:$16 sps:$4 sm:$0xff]  }
 0x10f   :  { %463 = vperm.xlu0 %5017, %v439_v2   ;;  %242 = vperm.xlu1 %5019, %v228_v3   ;;  %v5076_v20 = vld [vmem:[#allocation17 + $0xa0] ss:$16 sps:$4 sm:$0xff]   ;;  %v5079_v22 = vld [vmem:[#allocation17 + $0xc4] ss:$16 sps:$4 sm:$0xff]   ;;  %v5081_v23 = vld [vmem:[#allocation17 + $0x48] ss:$16 sps:$4 sm:$0xff]  }
 0x110   :  { %1435 = vmatpush1.bf16.msra.mxu0 %v5058_v8  ;;  %1517 = vmatpush1.bf16.msra.mxu1 %v5075_v19  ;;  %v5082_v24 = vld [vmem:[#allocation17 + $0xc0] ss:$16 sps:$4 sm:$0xff]   ;;  %v5083_v25 = vld [vmem:[#allocation17 + $0x6c] ss:$16 sps:$4 sm:$0xff]   ;;  %v5085_v26 = vld [vmem:[#allocation17 + $0xe4] ss:$16 sps:$4 sm:$0xff]  }
 0x111   :  { %1436 = vmatprep.subr.bf16.mxu0 %v5059_v9  ;;  %1518 = vmatprep.subr.bf16.mxu1 %v5077_v21  ;;  %v5087_v27 = vld [vmem:[#allocation17 + $0x68] ss:$16 sps:$4 sm:$0xff]   ;;  %v5088_v28 = vld [vmem:[#allocation17 + $0xe0] ss:$16 sps:$4 sm:$0xff]   ;;  %v5089_v29 = vld [vmem:[#allocation17 + $0x8c] ss:$16 sps:$4 sm:$0xff]  }
 0x112   :  { %v5091_v30 = vld [vmem:[#allocation17 + $0x104] ss:$16 sps:$4 sm:$0xff]   ;;  %v5093_v31 = vld [vmem:[#allocation17 + $0x88] ss:$16 sps:$4 sm:$0xff]   ;;  %v5094_v32 = vld [vmem:[#allocation17 + $0x100] ss:$16 sps:$4 sm:$0xff]  }
 0x113   :  { %5020 = vset.pattern.permute.xlu1 %v6241_v4  ;;  %5021 = vset.pattern.permute.xlu0 %v6240_v1  ;;  %v5095_v33 = vld [vmem:[#allocation17 + $0xac] ss:$16 sps:$4 sm:$0xff]   ;;  %v5097_v34 = vld [vmem:[#allocation17 + $0x124] ss:$16 sps:$4 sm:$0xff]   ;;  %v5099_v35 = vld [vmem:[#allocation17 + $0xa8] ss:$16 sps:$4 sm:$0xff]  }
 0x114   :  { %252 = vperm.xlu1 %5020, %v228_v3   ;;  %262 = vperm.xlu0 %5021, %v228_v3   ;;  %v5100_v36 = vld [vmem:[#allocation17 + $0x120] ss:$16 sps:$4 sm:$0xff]   ;;  %v5101_v37 = vld [vmem:[#allocation17 + $0xcc] ss:$16 sps:$4 sm:$0xff]   ;;  %v5103_v38 = vld [vmem:[#allocation17 + $0x144] ss:$16 sps:$4 sm:$0xff]  }
 0x115   :  { %1437 = vmatpush1.bf16.msra.mxu0 %v5061_v10  ;;  %1519 = vmatpush1.bf16.msra.mxu1 %v5081_v23  ;;  %v5105_v39 = vld [vmem:[#allocation17 + $0xc8] ss:$16 sps:$4 sm:$0xff]   ;;  %v5106_v41 = vld [vmem:[#allocation17 + $0x140] ss:$16 sps:$4 sm:$0xff]   ;;  %v5107_v42 = vld [vmem:[#allocation17 + $0xec] ss:$16 sps:$4 sm:$0xff]  }
 0x116   :  { %1438 = vmatprep.subr.bf16.mxu0 %v5062_v11  ;;  %1520 = vmatprep.subr.bf16.mxu1 %v5083_v25  ;;  %v5109_v43 = vld [vmem:[#allocation17 + $0x164] ss:$16 sps:$4 sm:$0xff]   ;;  %v5111_v44 = vld [vmem:[#allocation17 + $0xe8] ss:$16 sps:$4 sm:$0xff]   ;;  %v5112_v45 = vld [vmem:[#allocation17 + $0x160] ss:$16 sps:$4 sm:$0xff]  }
 0x117   :  { %v5113_v46 = vld [vmem:[#allocation17 + $0x10c] ss:$16 sps:$4 sm:$0xff]   ;;  %v5115_v47 = vld [vmem:[#allocation17 + $0x184] ss:$16 sps:$4 sm:$0xff]   ;;  %v5117_v48 = vld [vmem:[#allocation17 + $0x108] ss:$16 sps:$4 sm:$0xff]  }
 0x118   :  { %5022 = vset.pattern.permute.xlu1 %v7424_v0  ;;  %v6565_v49 = vshrl.u32 %v245_v40, 7  ;;  %v5118_v50 = vld [vmem:[#allocation17 + $0x180] ss:$16 sps:$4 sm:$0xff]   ;;  %v5119_v51 = vld [vmem:[#allocation17 + $0x12c] ss:$16 sps:$4 sm:$0xff]   ;;  %s7576_s29 = sld [smem:[#allocation118_spill]] }
 0x119   :  { %1439 = vmatpush1.bf16.msra.mxu0 %v5064_v12  ;;  %1521 = vmatpush1.bf16.msra.mxu1 %v5087_v27  ;;  %v5121_v52 = vld [vmem:[#allocation17 + $0x1a4] ss:$16 sps:$4 sm:$0xff]   ;;  %v440_v53 = vld [vmem:[#allocation12] sm:$0x7]  ;;  %v5124_v56 = vld [vmem:[#allocation17 + $0x1a0] ss:$16 sps:$4 sm:$0xff]  }
 0x11a   :  { %1440 = vmatprep.subr.bf16.mxu0 %v5067_v14  ;;  %1522 = vmatprep.subr.bf16.mxu1 %v5089_v29  ;;  %7568 = vst [vmem:[#allocation37_spill] sm:$0xff] %v6565_v49  ;;  %v5123_v54 = vld [vmem:[#allocation17 + $0x128] ss:$16 sps:$4 sm:$0xff]   ;;  %v6568_v55 = vsub.s32 0, %v6565_v49  ;;  %v6572_v58 = vsub.s32 1, %v6565_v49  ;;  %v6575_v59 = vsub.s32 2, %v6565_v49 }
 0x11b   :  { %v4547_v61 = vld [vmem:[#allocation14] ss:$0 sm:$0xff]  ;;  %v5127_v13 = vld [vmem:[#allocation17 + $0x1c4] ss:$16 sps:$4 sm:$0xff]   ;;  %v5129_v14 = vld [vmem:[#allocation17 + $0x148] ss:$16 sps:$4 sm:$0xff]  }
 0x11c   :  { %7569 = vst [vmem:[#allocation38_spill] sm:$0xff] %v6568_v55  ;;  %v459_v57 = vrot.slane %v440_v53, %v6568_v55  ;;  %7570 = vst [vmem:[#allocation39_spill] sm:$0xff] %v6572_v58  ;;  %v469_v63 = vrot.slane %v440_v53, %v6572_v58  ;;  %v479_v2 = vrot.slane %v440_v53, %v6575_v59  ;;  %v5125_v12 = vld [vmem:[#allocation17 + $0x14c] ss:$16 sps:$4 sm:$0xff]   ;;  %v6583_v15 = vld [vmem:[#allocation9] sm:$0x7] }
 0x11d   :  { %1441 = vmatpush1.bf16.msra.mxu0 %v5070_v16  ;;  %1523 = vmatpush1.bf16.msra.mxu1 %v5093_v31  ;;  %7571 = vst [vmem:[#allocation40_spill] sm:$0xff] %v6575_v59  ;;  %v5130_v16 = vld [vmem:[#allocation17 + $0x1c0] ss:$16 sps:$4 sm:$0xff]   ;;  %v248_v19 = vrot.slane %v6583_v15, %v6568_v55  ;;  %v5135_v21 = vld [vmem:[#allocation17 + $0x168] ss:$16 sps:$4 sm:$0xff]   ;;  %vm654_vm0 = vcmask 523264  }
 0x11e   :  { %1442 = vmatprep.subr.bf16.mxu0 %v5073_v18  ;;  %1524 = vmatprep.subr.bf16.mxu1 %v5095_v33  ;;  %v5131_v18 = vld [vmem:[#allocation17 + $0x16c] ss:$16 sps:$4 sm:$0xff]   ;;  %v5136_v23 = vld [vmem:[#allocation17 + $0x1e0] ss:$16 sps:$4 sm:$0xff]   ;;  %v5142_v31 = vld [vmem:[#allocation17 + $0x188] ss:$16 sps:$4 sm:$0xff]  }
 0x11f   :  { %v657_v25 = vld [vmem:[#allocation3 + $0x8] sm:$0xff]  ;;  %v656_v33 = vld [vmem:[#allocation3] sm:$0xff] }
 0x120   :  { %v661_v29 = vpack.c.bf16 %v657_v25, %v657_v25  ;;  %v5151_v53 = vld [vmem:[#allocation17 + $0x240] ss:$16 sps:$4 sm:$0xff]   ;;  %v5179_v25 = vld [vmem:[#allocation17 + $0x268] ss:$16 sps:$4 sm:$0xff]  }
 0x121   :  { %1443 = vmatpush1.bf16.msra.mxu0 %v5076_v20  ;;  %1525 = vmatpush1.bf16.msra.mxu1 %v5099_v35  ;;  %v5133_v20 = vld [vmem:[#allocation17 + $0x1e4] ss:$16 sps:$4 sm:$0xff]   ;;  %v6244_v35 = vmov 3  }
 0x122   :  { %1444 = vmatprep.subr.bf16.mxu0 %v5079_v22  ;;  %1526 = vmatprep.subr.bf16.mxu1 %v5101_v37  ;;  %v6242_v22 = vmov 4   ;;  %v6598_v37 = vpack.c.bf16 %v656_v33, %v656_v33  ;;  %v5196_v33 = vld [vmem:[#allocation17 + $0x324] ss:$16 sps:$4 sm:$0xff]  }
 0x123   :  { %1464 = vmatprep.mubr.bf16.mxu0 %v661_v29  ;;  %1546 = vmatprep.mubr.bf16.mxu1 %v661_v29  ;;  %v6253_v29 = vmov 14  }
 0x125   :  { %1445 = vmatpush1.bf16.msra.mxu0 %v5082_v24  ;;  %1527 = vmatpush1.bf16.msra.mxu1 %v5105_v39  ;;  %v5137_v24 = vld [vmem:[#allocation17 + $0x18c] ss:$16 sps:$4 sm:$0xff]  }
 0x126   :  { %1446 = vmatprep.subr.bf16.mxu0 %v5085_v26  ;;  %1528 = vmatprep.subr.bf16.mxu1 %v5107_v42  ;;  %v4545_v26 = vld [vmem:[%s7572_s0] ss:$0 sm:$0xff] }
 0x129   :  { %1447 = vmatpush1.bf16.msra.mxu0 %v5088_v28  ;;  %1529 = vmatpush1.bf16.msra.mxu1 %v5111_v44  ;;  %v258_v28 = vrot.slane %v6583_v15, %v6572_v58  ;;  %v5148_v44 = vld [vmem:[#allocation17 + $0x1a8] ss:$16 sps:$4 sm:$0xff]  }
 0x12a   :  { %1448 = vmatprep.subr.bf16.mxu0 %v5091_v30  ;;  %1530 = vmatprep.subr.bf16.mxu1 %v5113_v46  ;;  %v5141_v30 = vld [vmem:[#allocation17 + $0x204] ss:$16 sps:$4 sm:$0xff]   ;;  %v6245_v46 = vmov 10  }
 0x12d   :  { %1449 = vmatpush1.bf16.msra.mxu0 %v5094_v32  ;;  %1531 = vmatpush1.bf16.msra.mxu1 %v5117_v48  ;;  %v5149_v48 = vld [vmem:[#allocation17 + $0x1cc] ss:$16 sps:$4 sm:$0xff]  }
 0x12e   :  { %1450 = vmatprep.subr.bf16.mxu0 %v5097_v34  ;;  %1532 = vmatprep.subr.bf16.mxu1 %v5119_v51  ;;  %v6243_v34 = vmov 7  }
 0x131   :  { %1451 = vmatpush1.bf16.msra.mxu0 %v5100_v36  ;;  %1533 = vmatpush1.bf16.msra.mxu1 %v5123_v54  ;;  %v5139_v36 = vld [vmem:[#allocation17 + $0x200] ss:$16 sps:$4 sm:$0xff]   ;;  %v5154_v54 = vld [vmem:[#allocation17 + $0x1c8] ss:$16 sps:$4 sm:$0xff]  }
 0x132   :  { %1452 = vmatprep.subr.bf16.mxu0 %v5103_v38  ;;  %1534 = vmatprep.subr.bf16.mxu1 %v5125_v12  ;;  %v5143_v38 = vld [vmem:[#allocation17 + $0x1ac] ss:$16 sps:$4 sm:$0xff]   ;;  %v6250_v12 = vmov 9  }
 0x135   :  { %1453 = vmatpush1.bf16.msra.mxu0 %v5106_v41  ;;  %1535 = vmatpush1.bf16.msra.mxu1 %v5129_v14  ;;  %v268_v41 = vrot.slane %v6583_v15, %v6575_v59  ;;  %v5167_v14 = vld [vmem:[#allocation17 + $0x228] ss:$16 sps:$4 sm:$0xff]   ;;  %v5170_v15 = vld [vmem:[#allocation17 + $0x2a0] ss:$16 sps:$4 sm:$0xff]  }
 0x136   :  { %1454 = vmatprep.subr.bf16.mxu0 %v5109_v43  ;;  %1536 = vmatprep.subr.bf16.mxu1 %v5131_v18  ;;  %v5147_v43 = vld [vmem:[#allocation17 + $0x224] ss:$16 sps:$4 sm:$0xff]   ;;  %v6251_v18 = vmov 11  }
 0x139   :  { %1455 = vmatpush1.bf16.msra.mxu0 %v5112_v45  ;;  %1537 = vmatpush1.bf16.msra.mxu1 %v5135_v21  ;;  %v5145_v45 = vld [vmem:[#allocation17 + $0x220] ss:$16 sps:$4 sm:$0xff]   ;;  %v5181_v21 = vld [vmem:[#allocation17 + $0x26c] ss:$16 sps:$4 sm:$0xff]  }
 0x13a   :  { %1456 = vmatprep.subr.bf16.mxu0 %v5115_v47  ;;  %1538 = vmatprep.subr.bf16.mxu1 %v5137_v24  ;;  %v6246_v47 = vmov 5   ;;  %v6252_v24 = vmov 12  }
 0x13d   :  { %1457 = vmatpush1.bf16.msra.mxu0 %v5118_v50  ;;  %1539 = vmatpush1.bf16.msra.mxu1 %v5142_v31  ;;  %v5188_v31 = vld [vmem:[#allocation17 + $0x300] ss:$16 sps:$4 sm:$0xff]  }
 0x13e   :  { %1458 = vmatprep.subr.bf16.mxu0 %v5121_v52  ;;  %1540 = vmatprep.subr.bf16.mxu1 %v5143_v38  ;;  %v5153_v52 = vld [vmem:[#allocation17 + $0x244] ss:$16 sps:$4 sm:$0xff]   ;;  %v5199_v38 = vld [vmem:[#allocation17 + $0x2cc] ss:$16 sps:$4 sm:$0xff]  }
 0x141   :  { %1459 = vmatpush1.bf16.msra.mxu0 %v5124_v56  ;;  %1541 = vmatpush1.bf16.msra.mxu1 %v5148_v44  ;;  %v5155_v56 = vld [vmem:[#allocation17 + $0x1ec] ss:$16 sps:$4 sm:$0xff]  }
 0x142   :  { %1460 = vmatprep.subr.bf16.mxu0 %v5127_v13  ;;  %1542 = vmatprep.subr.bf16.mxu1 %v5149_v48  ;;  %v5169_v13 = vld [vmem:[#allocation17 + $0x22c] ss:$16 sps:$4 sm:$0xff]  }
 0x143   :  { %v659_v44 = vld [vmem:[#allocation3 + $0x18] sm:$0xff] }
 0x144   :  { %v5211_v48 = vld [vmem:[#allocation17 + $0x30c] ss:$16 sps:$4 sm:$0xff]  }
 0x145   :  { %1461 = vmatpush1.bf16.msra.mxu0 %v5130_v16  ;;  %1543 = vmatpush1.bf16.msra.mxu1 %v5154_v54  ;;  %v5175_v16 = vld [vmem:[#allocation17 + $0x24c] ss:$16 sps:$4 sm:$0xff]   ;;  %v5215_v54 = vld [vmem:[#allocation17 + $0x328] ss:$16 sps:$4 sm:$0xff]  }
 0x146   :  { %1462 = vmatprep.subr.bf16.mxu0 %v5133_v20  ;;  %1544 = vmatprep.subr.bf16.mxu1 %v5155_v56  ;;  %v5176_v20 = vld [vmem:[#allocation17 + $0x2c0] ss:$16 sps:$4 sm:$0xff]  }
 0x147   :  { %v5218_v56 = vld [vmem:[#allocation17 + $0x3a0] ss:$16 sps:$4 sm:$0xff]  }
 0x149   :  { %1463 = vmatpush1.bf16.msra.mxu0 %v5136_v23  ;;  %v5184_v23 = vld [vmem:[#allocation17 + $0x2e4] ss:$16 sps:$4 sm:$0xff]  }
 0x14a   :  { %1473 = vmatprep.subr.bf16.mxu0 %v5141_v30  ;;  %v5185_v30 = vld [vmem:[#allocation17 + $0x288] ss:$16 sps:$4 sm:$0xff]  }
 0x14c   :  { %1465 = vmatmul.mubr.bf16.vlgmr.msra.gmra.mrb[0].mxu0 %v6598_v37 }
 0x14d   :  { %1474 = vmatpush1.bf16.msra.mxu0 %v5139_v36  ;;  %v5191_v36 = vld [vmem:[#allocation17 + $0x2a8] ss:$16 sps:$4 sm:$0xff]  }
 0x14e   :  { %1475 = vmatprep.subr.bf16.mxu0 %v5147_v43  ;;  %v5203_v43 = vld [vmem:[#allocation17 + $0x2e8] ss:$16 sps:$4 sm:$0xff]  }
 0x151   :  { %1476 = vmatpush1.bf16.msra.mxu0 %v5145_v45  ;;  %v5206_v45 = vld [vmem:[#allocation17 + $0x360] ss:$16 sps:$4 sm:$0xff]  }
 0x152   :  { %1477 = vmatprep.subr.bf16.mxu0 %v5153_v52  ;;  %v5217_v52 = vld [vmem:[#allocation17 + $0x32c] ss:$16 sps:$4 sm:$0xff]  }
 0x155   :  { %1478 = vmatpush1.bf16.msra.mxu0 %v5151_v53  ;;  %v5220_v53 = vld [vmem:[#allocation17 + $0x3a4] ss:$16 sps:$4 sm:$0xff]  }
 0x189   :  { %v454_v60 = vpop.permute.xlu0 %453  ;;  %v474_v3 = vpop.permute.xlu1 %473 }
 0x18a   :  { %v460_v62 = vmul.f32 %v459_v57, %v454_v60  ;;  %v480_v8 = vmul.f32 %v479_v2, %v474_v3  ;;  %v6247_v57 = vmov 13   ;;  %v6248_v60 = vmov 6   ;;  %v5160_v2 = vld [vmem:[#allocation17 + $0x1e8] ss:$16 sps:$4 sm:$0xff]  }
 0x18b   :  { %1545 = vmatpush1.bf16.msra.mxu1 %v5160_v2  ;;  %v5232_v2 = vld [vmem:[#allocation17 + $0x3e4] ss:$16 sps:$4 sm:$0xff]  }
 0x18c   :  { %v461_v6 = vadd.f32 %v4547_v61, %v460_v62  ;;  %v5159_v62 = vld [vmem:[#allocation17 + $0x264] ss:$16 sps:$4 sm:$0xff]  }
 0x18d   :  { %1479 = vmatprep.subr.bf16.mxu0 %v5159_v62  ;;  %v5224_v62 = vld [vmem:[#allocation17 + $0x3c0] ss:$16 sps:$4 sm:$0xff]  }
 0x18e   :  { %v464_v5 = vpop.permute.xlu0 %463  ;;  %v243_v17 = vpop.permute.xlu1 %242  ;;  %1547 = vmatmul.mubr.bf16.vlgmr.msra.gmra.mrb[0].mxu1 %v6598_v37  ;;  %v5194_v37 = vld [vmem:[#allocation17 + $0x320] ss:$16 sps:$4 sm:$0xff]  }
 0x18f   :  { %v470_v7 = vmul.f32 %v469_v63, %v464_v5  ;;  %v249_v27 = vmul.f32 %v248_v19, %v243_v17  ;;  %v5157_v63 = vld [vmem:[#allocation17 + $0x260] ss:$16 sps:$4 sm:$0xff]   ;;  %v5163_v5 = vld [vmem:[#allocation17 + $0x20c] ss:$16 sps:$4 sm:$0xff]   ;;  %v5178_v17 = vld [vmem:[#allocation17 + $0x2c4] ss:$16 sps:$4 sm:$0xff]  }
 0x190   :  { %1480 = vmatpush1.bf16.msra.mxu0 %v5157_v63  ;;  %1555 = vmatprep.subr.bf16.mxu1 %v5163_v5  ;;  %v5173_v19 = vld [vmem:[#allocation17 + $0x248] ss:$16 sps:$4 sm:$0xff]   ;;  %v5229_v63 = vld [vmem:[#allocation17 + $0x36c] ss:$16 sps:$4 sm:$0xff]  }
 0x191   :  { %v471_v9 = vadd.f32 %v470_v7, %v461_v6  ;;  %v250_v39 = vadd.f32 %v4545_v26, %v249_v27  ;;  %v5166_v6 = vld [vmem:[#allocation17 + $0x284] ss:$16 sps:$4 sm:$0xff]   ;;  %v6249_v7 = vmov 8   ;;  %v5182_v26 = vld [vmem:[#allocation17 + $0x2e0] ss:$16 sps:$4 sm:$0xff]  }
 0x192   :  { %1481 = vmatprep.subr.bf16.mxu0 %v5166_v6  ;;  %v5187_v27 = vld [vmem:[#allocation17 + $0x28c] ss:$16 sps:$4 sm:$0xff]   ;;  %v5227_v5 = vld [vmem:[#allocation17 + $0x368] ss:$16 sps:$4 sm:$0xff]  }
 0x193   :  { %v481_v10 = vadd.f32 %v480_v8, %v471_v9  ;;  %v253_v32 = vpop.permute.xlu1 %252  ;;  %v263_v42 = vpop.permute.xlu0 %262  ;;  %v5164_v8 = vld [vmem:[#allocation17 + $0x280] ss:$16 sps:$4 sm:$0xff]   ;;  %v5161_v9 = vld [vmem:[#allocation17 + $0x208] ss:$16 sps:$4 sm:$0xff]  }
 0x194   :  { %v259_v40 = vmul.f32 %v258_v28, %v253_v32  ;;  %v269_v51 = vmul.f32 %v268_v41, %v263_v42  ;;  %1482 = vmatpush1.bf16.msra.mxu0 %v5164_v8  ;;  %1556 = vmatpush1.bf16.msra.mxu1 %v5161_v9  ;;  %v5190_v28 = vld [vmem:[#allocation17 + $0x304] ss:$16 sps:$4 sm:$0xff]   ;;  %v5193_v32 = vld [vmem:[#allocation17 + $0x2ac] ss:$16 sps:$4 sm:$0xff]   ;;  %v5200_v41 = vld [vmem:[#allocation17 + $0x340] ss:$16 sps:$4 sm:$0xff]  }
 0x195   :  { %v6579_v11 = vmax.f32 %v481_v10, 0.0  ;;  %v5172_v10 = vld [vmem:[#allocation17 + $0x2a4] ss:$16 sps:$4 sm:$0xff]   ;;  %1557 = vmatprep.subr.bf16.mxu1 %v5169_v13  ;;  %v5235_v8 = vld [vmem:[#allocation17 + $0x38c] ss:$16 sps:$4 sm:$0xff]  }
 0x196   :  { %v260_v50 = vadd.f32 %v259_v40, %v250_v39  ;;  %1483 = vmatprep.subr.bf16.mxu0 %v5172_v10  ;;  %v5202_v39 = vld [vmem:[#allocation17 + $0x344] ss:$16 sps:$4 sm:$0xff]   ;;  %v5197_v40 = vld [vmem:[#allocation17 + $0x2c8] ss:$16 sps:$4 sm:$0xff]   ;;  %v5241_v13 = vld [vmem:[#allocation17 + $0x3cc] ss:$16 sps:$4 sm:$0xff]  }
 0x197   :  { %511 = vperm.xlu0 %5021, %v6579_v11   ;;  %491 = vperm.xlu1 %5022, %v6579_v11   ;;  %v5208_v42 = vld [vmem:[#allocation17 + $0x364] ss:$16 sps:$4 sm:$0xff]   ;;  %v5233_v9 = vld [vmem:[#allocation17 + $0x388] ss:$16 sps:$4 sm:$0xff]  }
 0x198   :  { %v270_v61 = vadd.f32 %v269_v51, %v260_v50  ;;  %1558 = vmatpush1.bf16.msra.mxu1 %v5167_v14  ;;  %1484 = vmatpush1.bf16.msra.mxu0 %v5170_v15  ;;  %v5214_v50 = vld [vmem:[#allocation17 + $0x384] ss:$16 sps:$4 sm:$0xff]   ;;  %v5209_v51 = vld [vmem:[#allocation17 + $0x308] ss:$16 sps:$4 sm:$0xff]   ;;  %v5244_v14 = vld [vmem:[#allocation17 + $0x3ec] ss:$16 sps:$4 sm:$0xff]  }
 0x199   :  { %1559 = vmatprep.subr.bf16.mxu1 %v5175_v16  ;;  %1485 = vmatprep.subr.bf16.mxu0 %v5178_v17  ;;  %v658_v6 = vld [vmem:[#allocation3 + $0x10] sm:$0xff]  ;;  %v5242_v15 = vld [vmem:[#allocation17 + $0x3e8] ss:$16 sps:$4 sm:$0xff]  }
 0x19a   :  { %v6612_v3 = vmax.f32 %v270_v61, 0.0  ;;  %v5226_v61 = vld [vmem:[#allocation17 + $0x3c4] ss:$16 sps:$4 sm:$0xff]   ;;  %v662_v10 = vpack.c.bf16 %v658_v6, %v658_v6  ;;  %v5248_v17 = vld [vmem:[#allocation18 + $0x8] ss:$16 sps:$4 sm:$0xff]  }
 0x19b   :  { %5025 = vset.pattern.permute.xlu0 %v6242_v22  ;;  %5023 = vset.pattern.permute.xlu1 %v6241_v4  ;;  %v5247_v16 = vld [vmem:[#allocation18 + $0x4] ss:$16 sps:$4 sm:$0xff]  }
 0x19c   :  { %531 = vperm.xlu0 %5025, %v6579_v11   ;;  %501 = vperm.xlu1 %5023, %v6579_v11  }
 0x19d   :  { %1560 = vmatpush1.bf16.msra.mxu1 %v5173_v19  ;;  %1486 = vmatpush1.bf16.msra.mxu0 %v5176_v20  ;;  %v5253_v19 = vld [vmem:[#allocation18 + $0x24] ss:$16 sps:$4 sm:$0xff]   ;;  %v5256_v20 = vld [vmem:[#allocation18 + $0x2c] ss:$16 sps:$4 sm:$0xff]  }
 0x19e   :  { %1561 = vmatprep.subr.bf16.mxu1 %v5181_v21  ;;  %1487 = vmatprep.subr.bf16.mxu0 %v5184_v23  ;;  %v5254_v21 = vld [vmem:[#allocation18 + $0x28] ss:$16 sps:$4 sm:$0xff]   ;;  %v5259_v23 = vld [vmem:[#allocation18 + $0x44] ss:$16 sps:$4 sm:$0xff]  }
 0x1a0   :  { %5028 = vset.pattern.permute.xlu0 %v6243_v34  ;;  %5024 = vset.pattern.permute.xlu1 %v6244_v35 }
 0x1a1   :  { %561 = vperm.xlu0 %5028, %v6579_v11   ;;  %521 = vperm.xlu1 %5024, %v6579_v11  }
 0x1a2   :  { %1562 = vmatpush1.bf16.msra.mxu1 %v5179_v25  ;;  %1488 = vmatpush1.bf16.msra.mxu0 %v5182_v26  ;;  %v5257_v25 = vld [vmem:[#allocation18 + $0x40] ss:$16 sps:$4 sm:$0xff]   ;;  %v5265_v26 = vld [vmem:[#allocation18 + $0x64] ss:$16 sps:$4 sm:$0xff]  }
 0x1a3   :  { %1563 = vmatprep.subr.bf16.mxu1 %v5187_v27  ;;  %1489 = vmatprep.subr.bf16.mxu0 %v5190_v28  ;;  %v5268_v27 = vld [vmem:[#allocation18 + $0x6c] ss:$16 sps:$4 sm:$0xff]   ;;  %v5263_v28 = vld [vmem:[#allocation18 + $0x60] ss:$16 sps:$4 sm:$0xff]  }
 0x1a5   :  { %5031 = vset.pattern.permute.xlu0 %v6245_v46  ;;  %5026 = vset.pattern.permute.xlu1 %v6246_v47 }
 0x1a6   :  { %591 = vperm.xlu0 %5031, %v6579_v11   ;;  %541 = vperm.xlu1 %5026, %v6579_v11  }
 0x1a7   :  { %1564 = vmatpush1.bf16.msra.mxu1 %v5185_v30  ;;  %1490 = vmatpush1.bf16.msra.mxu0 %v5188_v31  ;;  %v5271_v30 = vld [vmem:[#allocation18 + $0x84] ss:$16 sps:$4 sm:$0xff]   ;;  %v5274_v31 = vld [vmem:[#allocation18 + $0x8c] ss:$16 sps:$4 sm:$0xff]  }
 0x1a8   :  { %1565 = vmatprep.subr.bf16.mxu1 %v5193_v32  ;;  %1491 = vmatprep.subr.bf16.mxu0 %v5196_v33  ;;  %v5269_v32 = vld [vmem:[#allocation18 + $0x80] ss:$16 sps:$4 sm:$0xff]   ;;  %v5272_v33 = vld [vmem:[#allocation18 + $0x88] ss:$16 sps:$4 sm:$0xff]  }
 0x1aa   :  { %5034 = vset.pattern.permute.xlu0 %v6247_v57  ;;  %5027 = vset.pattern.permute.xlu1 %v6248_v60 }
 0x1ab   :  { %621 = vperm.xlu0 %5034, %v6579_v11   ;;  %551 = vperm.xlu1 %5027, %v6579_v11  }
 0x1ac   :  { %1566 = vmatpush1.bf16.msra.mxu1 %v5191_v36  ;;  %1492 = vmatpush1.bf16.msra.mxu0 %v5194_v37  ;;  %v5280_v36 = vld [vmem:[#allocation18 + $0xac] ss:$16 sps:$4 sm:$0xff]  }
 0x1ad   :  { %1567 = vmatprep.subr.bf16.mxu1 %v5199_v38  ;;  %1493 = vmatprep.subr.bf16.mxu0 %v5202_v39  ;;  %v6657_v37 = vld [vmem:[%s7406_s9] sm:$0xff]  ;;  %v5275_v38 = vld [vmem:[#allocation18 + $0xa0] ss:$16 sps:$4 sm:$0xff]  }
 0x1ae   :  { %v5278_v39 = vld [vmem:[#allocation18 + $0xa8] ss:$16 sps:$4 sm:$0xff]  }
 0x1af   :  { %5029 = vset.pattern.permute.xlu1 %v6249_v7  ;;  %5037 = vset.pattern.permute.xlu0 %v7424_v0 }
 0x1b0   :  { %571 = vperm.xlu1 %5029, %v6579_v11   ;;  %280 = vperm.xlu0 %5037, %v6612_v3  }
 0x1b1   :  { %1568 = vmatpush1.bf16.msra.mxu1 %v5197_v40  ;;  %1494 = vmatpush1.bf16.msra.mxu0 %v5200_v41  ;;  %v5283_v40 = vld [vmem:[#allocation18 + $0xc4] ss:$16 sps:$4 sm:$0xff]   ;;  %v497_v41 = vrot.slane %v6657_v37, %v6568_v55 }
 0x1b2   :  { %1495 = vmatprep.subr.bf16.mxu0 %v5208_v42 }
 0x1b4   :  { %5030 = vset.pattern.permute.xlu1 %v6250_v12  ;;  %5040 = vset.pattern.permute.xlu0 %v6244_v35  ;;  %v6254_v35 = vmov 15  }
 0x1b5   :  { %581 = vperm.xlu1 %5030, %v6579_v11   ;;  %310 = vperm.xlu0 %5040, %v6612_v3  }
 0x1b6   :  { %1496 = vmatpush1.bf16.msra.mxu0 %v5206_v45  ;;  %v5289_v45 = vld [vmem:[#allocation18 + $0xe4] ss:$16 sps:$4 sm:$0xff]  }
 0x1b7   :  { %1497 = vmatprep.subr.bf16.mxu0 %v5214_v50  ;;  %v5292_v50 = vld [vmem:[#allocation18 + $0xec] ss:$16 sps:$4 sm:$0xff]  }
 0x1b9   :  { %5032 = vset.pattern.permute.xlu1 %v6251_v18  ;;  %5043 = vset.pattern.permute.xlu0 %v6248_v60  ;;  %v5223_v60 = vld [vmem:[#allocation17 + $0x34c] ss:$16 sps:$4 sm:$0xff]  }
 0x1ba   :  { %601 = vperm.xlu1 %5032, %v6579_v11   ;;  %340 = vperm.xlu0 %5043, %v6612_v3  }
 0x1be   :  { %5033 = vset.pattern.permute.xlu1 %v6252_v24  ;;  %5046 = vset.pattern.permute.xlu0 %v6250_v12  ;;  %v5238_v12 = vld [vmem:[#allocation17 + $0x3ac] ss:$16 sps:$4 sm:$0xff]  }
 0x1bf   :  { %611 = vperm.xlu1 %5033, %v6579_v11   ;;  %370 = vperm.xlu0 %5046, %v6612_v3  }
 0x1c3   :  { %5035 = vset.pattern.permute.xlu1 %v6253_v29  ;;  %5049 = vset.pattern.permute.xlu0 %v6252_v24  ;;  %v5262_v24 = vld [vmem:[#allocation18 + $0x4c] ss:$16 sps:$4 sm:$0xff]  }
 0x1c4   :  { %631 = vperm.xlu1 %5035, %v6579_v11   ;;  %400 = vperm.xlu0 %5049, %v6612_v3  }
 0x1c8   :  { %5036 = vset.pattern.permute.xlu1 %v6254_v35  ;;  %5052 = vset.pattern.permute.xlu0 %v6254_v35  ;;  %v5277_v35 = vld [vmem:[#allocation18 + $0xa4] ss:$16 sps:$4 sm:$0xff]  }
 0x1c9   :  { %641 = vperm.xlu1 %5036, %v6579_v11   ;;  %430 = vperm.xlu0 %5052, %v6612_v3   ;;  %v5205_v11 = vld [vmem:[#allocation17 + $0x2ec] ss:$16 sps:$4 sm:$0xff]  }
 0x1ca   :  { %1569 = vmatprep.subr.bf16.mxu1 %v5205_v11  ;;  %v5286_v11 = vld [vmem:[#allocation18 + $0xcc] ss:$16 sps:$4 sm:$0xff]  }
 0x1cb   :  { %1570 = vmatpush1.bf16.msra.mxu1 %v5203_v43  ;;  %v5281_v43 = vld [vmem:[#allocation18 + $0xc0] ss:$16 sps:$4 sm:$0xff]  }
 0x1cc   :  { %1571 = vmatprep.subr.bf16.mxu1 %v5211_v48  ;;  %v507_v48 = vrot.slane %v6657_v37, %v6572_v58 }
 0x1cd   :  { %5038 = vset.pattern.permute.xlu1 %v6241_v4  ;;  %v663_v4 = vpack.c.bf16 %v659_v44, %v659_v44  ;;  %v5284_v44 = vld [vmem:[#allocation18 + $0xc8] ss:$16 sps:$4 sm:$0xff]  }
 0x1ce   :  { %290 = vperm.xlu1 %5038, %v6612_v3  }
 0x1cf   :  { %1505 = vmatprep.mubr.bf16.mxu0 %v663_v4  ;;  %1587 = vmatprep.mubr.bf16.mxu1 %v663_v4 }
 0x1d0   :  { %1572 = vmatpush1.bf16.msra.mxu1 %v5209_v51  ;;  %v4548_v51 = vld [vmem:[#allocation15] ss:$0 sm:$0xff] }
 0x1d1   :  { %1573 = vmatprep.subr.bf16.mxu1 %v5217_v52  ;;  %v517_v52 = vrot.slane %v6657_v37, %v6575_v59 }
 0x1d2   :  { %5039 = vset.pattern.permute.xlu1 %v6240_v1  ;;  %v5212_v1 = vld [vmem:[#allocation17 + $0x380] ss:$16 sps:$4 sm:$0xff]  }
 0x1d3   :  { %300 = vperm.xlu1 %5039, %v6612_v3   ;;  %1498 = vmatpush1.bf16.msra.mxu0 %v5212_v1  ;;  %v6664_v1 = vsub.s32 3, %v6565_v49 }
 0x1d4   :  { %1499 = vmatprep.subr.bf16.mxu0 %v5220_v53  ;;  %1574 = vmatpush1.bf16.msra.mxu1 %v5215_v54  ;;  %v5287_v53 = vld [vmem:[#allocation18 + $0xe0] ss:$16 sps:$4 sm:$0xff]  }
 0x1d5   :  { %1575 = vmatprep.subr.bf16.mxu1 %v5223_v60  ;;  %7573 = vst [vmem:[#allocation41_spill] sm:$0xff] %v6664_v1  ;;  %v5290_v60 = vld [vmem:[#allocation18 + $0xe8] ss:$16 sps:$4 sm:$0xff]  }
 0x1d7   :  { %5041 = vset.pattern.permute.xlu1 %v6242_v22  ;;  %v5221_v22 = vld [vmem:[#allocation17 + $0x348] ss:$16 sps:$4 sm:$0xff]   ;;  %1500 = vmatpush1.bf16.msra.mxu0 %v5218_v56 }
 0x1d8   :  { %320 = vperm.xlu1 %5041, %v6612_v3   ;;  %1501 = vmatprep.subr.bf16.mxu0 %v5226_v61 }
 0x1d9   :  { %1576 = vmatpush1.bf16.msra.mxu1 %v5221_v22 }
 0x1da   :  { %1577 = vmatprep.subr.bf16.mxu1 %v5229_v63  ;;  %v527_v63 = vrot.slane %v6657_v37, %v6664_v1 }
 0x1db   :  { %1502 = vmatpush1.bf16.msra.mxu0 %v5224_v62  ;;  %v6669_v62 = vsub.s32 4, %v6565_v49 }
 0x1dc   :  { %5042 = vset.pattern.permute.xlu1 %v6246_v47  ;;  %v5230_v47 = vld [vmem:[#allocation17 + $0x3e0] ss:$16 sps:$4 sm:$0xff]   ;;  %1503 = vmatprep.subr.bf16.mxu0 %v5232_v2 }
 0x1dd   :  { %330 = vperm.xlu1 %5042, %v6612_v3   ;;  %1578 = vmatpush1.bf16.msra.mxu1 %v5227_v5 }
 0x1de   :  { %1579 = vmatprep.subr.bf16.mxu1 %v5235_v8 }
 0x1df   :  { %1504 = vmatpush1.bf16.msra.mxu0 %v5230_v47  ;;  %v6674_v47 = vsub.s32 5, %v6565_v49 }
 0x1e0   :  { %1811 = vmatprep.subr.bf16.mxu0 %v5247_v16 }
 0x1e1   :  { %5044 = vset.pattern.permute.xlu1 %v6243_v34  ;;  %1580 = vmatpush1.bf16.msra.mxu1 %v5233_v9  ;;  %v5236_v34 = vld [vmem:[#allocation17 + $0x3a8] ss:$16 sps:$4 sm:$0xff]   ;;  %v537_v9 = vrot.slane %v6657_v37, %v6669_v62 }
 0x1e2   :  { %350 = vperm.xlu1 %5044, %v6612_v3   ;;  %1506 = vmatmul.mubr.bf16.vlgmr.msra.gmra.mrb[0].mxu0 %v662_v10 }
 0x1e3   :  { %1581 = vmatprep.subr.bf16.mxu1 %v5238_v12  ;;  %1843 = vmatprep.mubr.bf16.mxu0 %v7424_v0 }
 0x1e5   :  { %1582 = vmatpush1.bf16.msra.mxu1 %v5236_v34 }
 0x1e6   :  { %5045 = vset.pattern.permute.xlu1 %v6249_v7  ;;  %v5239_v7 = vld [vmem:[#allocation17 + $0x3c8] ss:$16 sps:$4 sm:$0xff]   ;;  %1583 = vmatprep.subr.bf16.mxu1 %v5241_v13  ;;  %v547_v13 = vrot.slane %v6657_v37, %v6674_v47 }
 0x1e7   :  { %360 = vperm.xlu1 %5045, %v6612_v3  }
 0x1e9   :  { %1584 = vmatpush1.bf16.msra.mxu1 %v5239_v7  ;;  %v6681_v7 = vsub.s32 6, %v6565_v49 }
 0x1ea   :  { %1585 = vmatprep.subr.bf16.mxu1 %v5244_v14 }
 0x1eb   :  { %5047 = vset.pattern.permute.xlu1 %v6245_v46  ;;  %v5245_v46 = vld [vmem:[#allocation18] ss:$16 sps:$4 sm:$0xff]  }
 0x1ec   :  { %380 = vperm.xlu1 %5047, %v6612_v3   ;;  %1812 = vmatpush1.bf16.msra.mxu0 %v5245_v46  ;;  %v6684_v46 = vsub.s32 7, %v6565_v49  ;;  %v6897_v49 = vld [vmem:[#allocation21 + $0xa8] ss:$16 sps:$4 sm:$0xff]  }
 0x1ed   :  { %1586 = vmatpush1.bf16.msra.mxu1 %v5242_v15  ;;  %1813 = vmatprep.subr.bf16.mxu0 %v5253_v19  ;;  %7592 = vst [vmem:[#allocation59_spill] sm:$0xff] %v6897_v49 }
 0x1f0   :  { %5048 = vset.pattern.permute.xlu1 %v6251_v18  ;;  %1588 = vmatmul.mubr.bf16.vlgmr.msra.gmra.mrb[0].mxu1 %v662_v10  ;;  %v5250_v18 = vld [vmem:[#allocation18 + $0xc] ss:$16 sps:$4 sm:$0xff]  }
 0x1f1   :  { %390 = vperm.xlu1 %5048, %v6612_v3   ;;  %1884 = vmatprep.mubr.bf16.mxu1 %v7424_v0 }
 0x1f2   :  { %1852 = vmatprep.subr.bf16.mxu1 %v5250_v18  ;;  %v557_v18 = vrot.slane %v6657_v37, %v6681_v7 }
 0x1f3   :  { %1853 = vmatpush1.bf16.msra.mxu1 %v5248_v17 }
 0x1f4   :  { %1854 = vmatprep.subr.bf16.mxu1 %v5256_v20  ;;  %v567_v20 = vrot.slane %v6657_v37, %v6684_v46 }
 0x1f5   :  { %5050 = vset.pattern.permute.xlu1 %v6247_v57  ;;  %v5251_v57 = vld [vmem:[#allocation18 + $0x20] ss:$16 sps:$4 sm:$0xff]  }
 0x1f6   :  { %410 = vperm.xlu1 %5050, %v6612_v3   ;;  %1814 = vmatpush1.bf16.msra.mxu0 %v5251_v57 }
 0x1f7   :  { %1855 = vmatpush1.bf16.msra.mxu1 %v5254_v21  ;;  %1815 = vmatprep.subr.bf16.mxu0 %v5259_v23 }
 0x1f8   :  { %1856 = vmatprep.subr.bf16.mxu1 %v5262_v24  ;;  %v443_v24 = vld [vmem:[%s7406_s9 + $0x8] sm:$0xff]  ;;  %s6255_s9 = smov 64  }
 0x1fa   :  { %5051 = vset.pattern.permute.xlu1 %v6253_v29  ;;  %1816 = vmatpush1.bf16.msra.mxu0 %v5257_v25  ;;  %v5266_v29 = vld [vmem:[#allocation18 + $0x68] ss:$16 sps:$4 sm:$0xff]  }
 0x1fb   :  { %420 = vperm.xlu1 %5051, %v6612_v3   ;;  %v5260_v3 = vld [vmem:[#allocation18 + $0x48] ss:$16 sps:$4 sm:$0xff]   ;;  %1817 = vmatprep.subr.bf16.mxu0 %v5265_v26 }
 0x1fc   :  { %1857 = vmatpush1.bf16.msra.mxu1 %v5260_v3  ;;  %v577_v3 = vrot.slane %v443_v24, %v6568_v55 }
 0x1fd   :  { %1858 = vmatprep.subr.bf16.mxu1 %v5268_v27 }
 0x1fe   :  { %1818 = vmatpush1.bf16.msra.mxu0 %v5263_v28 }
 0x1ff   :  { %1819 = vmatprep.subr.bf16.mxu0 %v5271_v30  ;;  %v587_v30 = vrot.slane %v443_v24, %v6572_v58 }
 0x200   :  { %1859 = vmatpush1.bf16.msra.mxu1 %v5266_v29 }
 0x201   :  { %1860 = vmatprep.subr.bf16.mxu1 %v5274_v31 }
 0x202   :  { %1820 = vmatpush1.bf16.msra.mxu0 %v5269_v32  ;;  %v597_v32 = vrot.slane %v443_v24, %v6575_v59 }
 0x203   :  { %1821 = vmatprep.subr.bf16.mxu0 %v5277_v35 }
 0x204   :  { %1861 = vmatpush1.bf16.msra.mxu1 %v5272_v33 }
 0x205   :  { %1862 = vmatprep.subr.bf16.mxu1 %v5280_v36 }
 0x206   :  { %1822 = vmatpush1.bf16.msra.mxu0 %v5275_v38  ;;  %v607_v38 = vrot.slane %v443_v24, %v6664_v1 }
 0x207   :  { %1823 = vmatprep.subr.bf16.mxu0 %v5283_v40 }
 0x208   :  { %1863 = vmatpush1.bf16.msra.mxu1 %v5278_v39 }
 0x209   :  { %1864 = vmatprep.subr.bf16.mxu1 %v5286_v11 }
 0x20a   :  { %1824 = vmatpush1.bf16.msra.mxu0 %v5281_v43 }
 0x20b   :  { %1825 = vmatprep.subr.bf16.mxu0 %v5289_v45 }
 0x20c   :  { %1865 = vmatpush1.bf16.msra.mxu1 %v5284_v44  ;;  %v627_v44 = vrot.slane %v443_v24, %v6674_v47 }
 0x20d   :  { %1866 = vmatprep.subr.bf16.mxu1 %v5292_v50  ;;  %v6699_v50 = vld [vmem:[#allocation20 + $0x4] ss:$16 sps:$4 sm:$0xff]  }
 0x20e   :  { %1826 = vmatpush1.bf16.msra.mxu0 %v5287_v53  ;;  %7574 = vst [vmem:[#allocation42_spill] sm:$0xff] %v6699_v50  ;;  %v637_v53 = vrot.slane %v443_v24, %v6681_v7 }
 0x20f   :  { %2154 = vmatprep.subr.bf16.mxu0 %v6699_v50 }
 0x210   :  { %1867 = vmatpush1.bf16.msra.mxu1 %v5290_v60 }
 0x216   :  { %v492_v42 = vpop.permute.xlu1 %491  ;;  %v512_v54 = vpop.permute.xlu0 %511 }
 0x217   :  { %v498_v4 = vmul.f32 %v497_v41, %v492_v42  ;;  %v518_v2 = vmul.f32 %v517_v52, %v512_v54  ;;  %v617_v42 = vrot.slane %v443_v24, %v6669_v62 }
 0x219   :  { %v499_v61 = vadd.f32 %v4548_v51, %v498_v4  ;;  %v6701_v51 = vld [vmem:[#allocation20 + $0xc] ss:$16 sps:$4 sm:$0xff]  }
 0x21a   :  { %7575 = vst [vmem:[#allocation43_spill] sm:$0xff] %v6701_v51  ;;  %2195 = vmatprep.subr.bf16.mxu1 %v6701_v51 }
 0x21b   :  { %v502_v56 = vpop.permute.xlu1 %501  ;;  %v532_v12 = vpop.permute.xlu0 %531 }
 0x21c   :  { %v508_v22 = vmul.f32 %v507_v48, %v502_v56  ;;  %v538_v14 = vmul.f32 %v537_v9, %v532_v12 }
 0x21e   :  { %v509_v5 = vadd.f32 %v508_v22, %v499_v61  ;;  %v647_v22 = vrot.slane %v443_v24, %v6684_v46 }
 0x220   :  { %v519_v6 = vadd.f32 %v518_v2, %v509_v5  ;;  %v522_v8 = vpop.permute.xlu1 %521  ;;  %v562_v23 = vpop.permute.xlu0 %561 }
 0x221   :  { %v528_v10 = vmul.f32 %v527_v63, %v522_v8  ;;  %v568_v26 = vmul.f32 %v567_v20, %v562_v23  ;;  %v231_v8 = vld [vmem:[%s7576_s29] sm:$0xff] }
 0x222   :  { %v286_v9 = vrot.slane %v231_v8, %v6568_v55  ;;  %v326_v24 = vrot.slane %v231_v8, %v6669_v62 }
 0x223   :  { %v529_v34 = vadd.f32 %v528_v10, %v519_v6 }
 0x225   :  { %v542_v15 = vpop.permute.xlu1 %541  ;;  %v539_v16 = vadd.f32 %v538_v14, %v529_v34  ;;  %v592_v36 = vpop.permute.xlu0 %591  ;;  %v296_v34 = vrot.slane %v231_v8, %v6572_v58  ;;  %v4546_v14 = vld [vmem:[#allocation11] ss:$0 sm:$0xff] }
 0x226   :  { %v548_v17 = vmul.f32 %v547_v13, %v542_v15  ;;  %v598_v39 = vmul.f32 %v597_v32, %v592_v36  ;;  %v346_v32 = vrot.slane %v231_v8, %v6681_v7  ;;  %v356_v36 = vrot.slane %v231_v8, %v6684_v46 }
 0x228   :  { %v549_v57 = vadd.f32 %v548_v17, %v539_v16  ;;  %v306_v16 = vrot.slane %v231_v8, %v6575_v59 }
 0x22a   :  { %v552_v19 = vpop.permute.xlu1 %551  ;;  %v622_v48 = vpop.permute.xlu0 %621 }
 0x22b   :  { %v558_v21 = vmul.f32 %v557_v18, %v552_v19  ;;  %v628_v54 = vmul.f32 %v627_v44, %v622_v48 }
 0x22d   :  { %v559_v25 = vadd.f32 %v558_v21, %v549_v57  ;;  %v316_v57 = vrot.slane %v231_v8, %v6664_v1 }
 0x22f   :  { %v572_v27 = vpop.permute.xlu1 %571  ;;  %v569_v28 = vadd.f32 %v568_v26, %v559_v25  ;;  %v281_v10 = vpop.permute.xlu0 %280 }
 0x230   :  { %v578_v29 = vmul.f32 %v577_v3, %v572_v27  ;;  %v287_v13 = vmul.f32 %v286_v9, %v281_v10  ;;  %v336_v27 = vrot.slane %v231_v8, %v6674_v47 }
 0x232   :  { %v579_v33 = vadd.f32 %v578_v29, %v569_v28  ;;  %v288_v17 = vadd.f32 %v4546_v14, %v287_v13 }
 0x234   :  { %v582_v31 = vpop.permute.xlu1 %581  ;;  %v311_v21 = vpop.permute.xlu0 %310 }
 0x235   :  { %v588_v35 = vmul.f32 %v587_v30, %v582_v31  ;;  %v317_v3 = vmul.f32 %v316_v57, %v311_v21 }
 0x237   :  { %v589_v37 = vadd.f32 %v588_v35, %v579_v33 }
 0x239   :  { %v602_v40 = vpop.permute.xlu1 %601  ;;  %v599_v41 = vadd.f32 %v598_v39, %v589_v37  ;;  %v341_v33 = vpop.permute.xlu0 %340  ;;  %v232_v39 = vld [vmem:[%s7576_s29 + $0x8] sm:$0xff] }
 0x23a   :  { %v608_v11 = vmul.f32 %v607_v38, %v602_v40  ;;  %v347_v38 = vmul.f32 %v346_v32, %v341_v33  ;;  %v426_v14 = vrot.slane %v232_v39, %v6681_v7  ;;  %v6735_v7 = vld [vmem:[#allocation20 + $0x8] ss:$16 sps:$4 sm:$0xff]   ;;  %v6751_v32 = vld [vmem:[#allocation20 + $0x4c] ss:$16 sps:$4 sm:$0xff]   ;;  %v6757_v33 = vld [vmem:[#allocation20 + $0x40] ss:$16 sps:$4 sm:$0xff]  }
 0x23c   :  { %v609_v45 = vadd.f32 %v608_v11, %v599_v41  ;;  %v366_v11 = vrot.slane %v232_v39, %v6568_v55 }
 0x23e   :  { %v612_v43 = vpop.permute.xlu1 %611 }
 0x23f   :  { %v618_v4 = vmul.f32 %v617_v42, %v612_v43 }
 0x241   :  { %v619_v52 = vadd.f32 %v618_v4, %v609_v45  ;;  %v376_v45 = vrot.slane %v232_v39, %v6572_v58  ;;  %v371_v4 = vpop.permute.xlu0 %370 }
 0x243   :  { %v632_v56 = vpop.permute.xlu1 %631  ;;  %v629_v60 = vadd.f32 %v628_v54, %v619_v52  ;;  %v377_v54 = vmul.f32 %v376_v45, %v371_v4  ;;  %v6785_v45 = vld [vmem:[#allocation20 + $0x80] ss:$16 sps:$4 sm:$0xff]   ;;  %v6787_v4 = vld [vmem:[#allocation20 + $0x88] ss:$16 sps:$4 sm:$0xff]  }
 0x244   :  { %v638_v61 = vmul.f32 %v637_v53, %v632_v56  ;;  %v386_v53 = vrot.slane %v232_v39, %v6575_v59 }
 0x246   :  { %v639_v2 = vadd.f32 %v638_v61, %v629_v60  ;;  %v396_v61 = vrot.slane %v232_v39, %v6664_v1 }
 0x248   :  { %v642_v63 = vpop.permute.xlu1 %641 }
 0x249   :  { %v648_v5 = vmul.f32 %v647_v22, %v642_v63 }
 0x24b   :  { %v649_v6 = vadd.f32 %v648_v5, %v639_v2  ;;  %v406_v5 = vrot.slane %v232_v39, %v6669_v62 }
 0x24d   :  { %651 = vrot.lane.b32.xlu1 %v649_v6, %s6255_s9  ;;  %v291_v12 = vpop.permute.xlu1 %290  ;;  %v401_v6 = vpop.permute.xlu0 %400 }
 0x24e   :  { %v297_v15 = vmul.f32 %v296_v34, %v291_v12  ;;  %v407_v10 = vmul.f32 %v406_v5, %v401_v6  ;;  %v416_v12 = vrot.slane %v232_v39, %v6674_v47  ;;  %v6821_v5 = vld [vmem:[#allocation20 + $0xe0] ss:$16 sps:$4 sm:$0xff]   ;;  %v6823_v6 = vld [vmem:[#allocation20 + $0xe8] ss:$16 sps:$4 sm:$0xff]  }
 0x250   :  { %v298_v20 = vadd.f32 %v297_v15, %v288_v17 }
 0x252   :  { %v301_v18 = vpop.permute.xlu1 %300 }
 0x253   :  { %v307_v19 = vmul.f32 %v306_v16, %v301_v18  ;;  %v436_v18 = vrot.slane %v232_v39, %v6684_v46  ;;  %v6739_v46 = vld [vmem:[#allocation20 + $0x2c] ss:$16 sps:$4 sm:$0xff]   ;;  %v6771_v39 = vld [vmem:[#allocation20 + $0x68] ss:$16 sps:$4 sm:$0xff]  }
 0x255   :  { %v308_v25 = vadd.f32 %v307_v19, %v298_v20  ;;  %v431_v19 = vpop.permute.xlu0 %430 }
 0x256   :  { %v437_v57 = vmul.f32 %v436_v18, %v431_v19  ;;  %v6859_v18 = vld [vmem:[#allocation21 + $0x40] ss:$16 sps:$4 sm:$0xff]   ;;  %v6861_v19 = vld [vmem:[#allocation21 + $0x48] ss:$16 sps:$4 sm:$0xff]  }
 0x257   :  { %v321_v23 = vpop.permute.xlu1 %320  ;;  %v318_v28 = vadd.f32 %v317_v3, %v308_v25  ;;  %v6733_v3 = vld [vmem:[#allocation20] ss:$16 sps:$4 sm:$0xff]   ;;  %7579 = vst [vmem:[#allocation46_spill] sm:$0xff] %v6859_v18  ;;  %7580 = vst [vmem:[#allocation47_spill] sm:$0xff] %v6861_v19 }
 0x258   :  { %v327_v26 = vmul.f32 %v326_v24, %v321_v23 }
 0x25a   :  { %v328_v31 = vadd.f32 %v327_v26, %v318_v28  ;;  %v6737_v28 = vld [vmem:[#allocation20 + $0x24] ss:$16 sps:$4 sm:$0xff]  }
 0x25c   :  { %v331_v29 = vpop.permute.xlu1 %330 }
 0x25d   :  { %v337_v30 = vmul.f32 %v336_v27, %v331_v29  ;;  %v6743_v29 = vld [vmem:[#allocation20 + $0x20] ss:$16 sps:$4 sm:$0xff]  }
 0x25f   :  { %v338_v37 = vadd.f32 %v337_v30, %v328_v31  ;;  %v6745_v30 = vld [vmem:[#allocation20 + $0x28] ss:$16 sps:$4 sm:$0xff]   ;;  %v6749_v31 = vld [vmem:[#allocation20 + $0x44] ss:$16 sps:$4 sm:$0xff]  }
 0x261   :  { %v351_v35 = vpop.permute.xlu1 %350  ;;  %v348_v41 = vadd.f32 %v347_v38, %v338_v37  ;;  %v6765_v37 = vld [vmem:[#allocation20 + $0x6c] ss:$16 sps:$4 sm:$0xff]   ;;  %v6769_v38 = vld [vmem:[#allocation20 + $0x60] ss:$16 sps:$4 sm:$0xff]  }
 0x262   :  { %v357_v40 = vmul.f32 %v356_v36, %v351_v35  ;;  %v6759_v35 = vld [vmem:[#allocation20 + $0x48] ss:$16 sps:$4 sm:$0xff]   ;;  %v6763_v36 = vld [vmem:[#allocation20 + $0x64] ss:$16 sps:$4 sm:$0xff]  }
 0x264   :  { %v358_v43 = vadd.f32 %v357_v40, %v348_v41  ;;  %v6777_v41 = vld [vmem:[#allocation20 + $0x84] ss:$16 sps:$4 sm:$0xff]  }
 0x266   :  { %v361_v42 = vpop.permute.xlu1 %360 }
 0x267   :  { %v367_v44 = vmul.f32 %v366_v11, %v361_v42  ;;  %v6779_v11 = vld [vmem:[#allocation20 + $0x8c] ss:$16 sps:$4 sm:$0xff]  }
 0x269   :  { %v368_v52 = vadd.f32 %v367_v44, %v358_v43 }
 0x26b   :  { %v381_v48 = vpop.permute.xlu1 %380  ;;  %v378_v60 = vadd.f32 %v377_v54, %v368_v52  ;;  %v6793_v52 = vld [vmem:[#allocation20 + $0xac] ss:$16 sps:$4 sm:$0xff]   ;;  %v6799_v54 = vld [vmem:[#allocation20 + $0xa8] ss:$16 sps:$4 sm:$0xff]  }
 0x26c   :  { %v387_v56 = vmul.f32 %v386_v53, %v381_v48  ;;  %v6791_v48 = vld [vmem:[#allocation20 + $0xa4] ss:$16 sps:$4 sm:$0xff]   ;;  %v6797_v53 = vld [vmem:[#allocation20 + $0xa0] ss:$16 sps:$4 sm:$0xff]  }
 0x26e   :  { %v388_v63 = vadd.f32 %v387_v56, %v378_v60  ;;  %v6803_v56 = vld [vmem:[#allocation20 + $0xc4] ss:$16 sps:$4 sm:$0xff]   ;;  %v6805_v60 = vld [vmem:[#allocation20 + $0xcc] ss:$16 sps:$4 sm:$0xff]  }
 0x270   :  { %v391_v22 = vpop.permute.xlu1 %390 }
 0x271   :  { %v397_v2 = vmul.f32 %v396_v61, %v391_v22  ;;  %v6809_v61 = vld [vmem:[#allocation20 + $0xc0] ss:$16 sps:$4 sm:$0xff]   ;;  %v6811_v22 = vld [vmem:[#allocation20 + $0xc8] ss:$16 sps:$4 sm:$0xff]  }
 0x273   :  { %v398_v9 = vadd.f32 %v397_v2, %v388_v63  ;;  %v6815_v63 = vld [vmem:[#allocation20 + $0xe4] ss:$16 sps:$4 sm:$0xff]   ;;  %v6817_v2 = vld [vmem:[#allocation20 + $0xec] ss:$16 sps:$4 sm:$0xff]  }
 0x275   :  { %v411_v8 = vpop.permute.xlu1 %410  ;;  %v408_v34 = vadd.f32 %v407_v10, %v398_v9  ;;  %v6833_v9 = vld [vmem:[#allocation21 + $0xc] ss:$16 sps:$4 sm:$0xff]   ;;  %v6835_v10 = vld [vmem:[#allocation21] ss:$16 sps:$4 sm:$0xff]  }
 0x276   :  { %v417_v13 = vmul.f32 %v416_v12, %v411_v8  ;;  %v6831_v8 = vld [vmem:[#allocation21 + $0x4] ss:$16 sps:$4 sm:$0xff]   ;;  %v6837_v12 = vld [vmem:[#allocation21 + $0x8] ss:$16 sps:$4 sm:$0xff]  }
 0x278   :  { %v418_v16 = vadd.f32 %v417_v13, %v408_v34  ;;  %v6839_v34 = vld [vmem:[#allocation21 + $0x24] ss:$16 sps:$4 sm:$0xff]   ;;  %v6841_v13 = vld [vmem:[#allocation21 + $0x2c] ss:$16 sps:$4 sm:$0xff]  }
 0x27a   :  { %v421_v15 = vpop.permute.xlu1 %420 }
 0x27b   :  { %v427_v17 = vmul.f32 %v426_v14, %v421_v15  ;;  %v6847_v14 = vld [vmem:[#allocation21 + $0x20] ss:$16 sps:$4 sm:$0xff]   ;;  %v6849_v15 = vld [vmem:[#allocation21 + $0x28] ss:$16 sps:$4 sm:$0xff]  }
 0x27d   :  { %v428_v20 = vadd.f32 %v427_v17, %v418_v16  ;;  %v6853_v16 = vld [vmem:[#allocation21 + $0x44] ss:$16 sps:$4 sm:$0xff]   ;;  %v6855_v17 = vld [vmem:[#allocation21 + $0x4c] ss:$16 sps:$4 sm:$0xff]  }
 0x27e   :  { %7577 = vst [vmem:[#allocation44_spill] sm:$0xff] %v6853_v16  ;;  %7578 = vst [vmem:[#allocation45_spill] sm:$0xff] %v6855_v17 }
 0x27f   :  { %v438_v21 = vadd.f32 %v437_v57, %v428_v20  ;;  %v6865_v20 = vld [vmem:[#allocation21 + $0x64] ss:$16 sps:$4 sm:$0xff]   ;;  %v6867_v57 = vld [vmem:[#allocation21 + $0x6c] ss:$16 sps:$4 sm:$0xff]  }
 0x280   :  { %7581 = vst [vmem:[#allocation48_spill] sm:$0xff] %v6865_v20  ;;  %7582 = vst [vmem:[#allocation49_spill] sm:$0xff] %v6867_v57 }
 0x2b5   :  { %v6729_v62 = vpop.f32.mrb[0].mxu0 }
 0x2b6   :  { %v6731_v23 = vpop.f32.mrb[1].mxu0 }
 0x2b7   :  { %v1511_v47 = vpop.f32.mrb[2].mxu0 }
 0x2b8   :  { %v1512_v26 = vpop.f32.mrb[3].mxu0  ;;  %v6879_v47 = vld [vmem:[#allocation21 + $0x84] ss:$16 sps:$4 sm:$0xff]  }
 0x2b9   :  { %7585 = vst [vmem:[#allocation52_spill] sm:$0xff] %v6879_v47  ;;  %v6885_v26 = vld [vmem:[#allocation21 + $0x80] ss:$16 sps:$4 sm:$0xff]  }
 0x2ba   :  { %7587 = vst [vmem:[#allocation54_spill] sm:$0xff] %v6885_v26 }
 0x2bf   :  { %v652_v24 = vpop.permute.xlu1 %651 }
 0x2c0   :  { %v655_v25 = vsel %vm654_vm0, %v438_v21, %v652_v24  ;;  %v6871_v21 = vld [vmem:[#allocation21 + $0x60] ss:$16 sps:$4 sm:$0xff]   ;;  %v6873_v24 = vld [vmem:[#allocation21 + $0x68] ss:$16 sps:$4 sm:$0xff]  }
 0x2c1   :  { %v1596_v27 = vpack.c.bf16 %v655_v25, %v655_v25  ;;  %7583 = vst [vmem:[#allocation50_spill] sm:$0xff] %v6871_v21  ;;  %7584 = vst [vmem:[#allocation51_spill] sm:$0xff] %v6873_v24  ;;  %v6881_v25 = vld [vmem:[#allocation21 + $0x8c] ss:$16 sps:$4 sm:$0xff]  }
 0x2c2   :  { %7586 = vst [vmem:[#allocation53_spill] sm:$0xff] %v6881_v25 }
 0x2c3   :  { %1844 = vmatmul.mubr.bf16.vlgmr.msra.gmra.mrb[4].mxu0 %v1596_v27  ;;  %1885 = vmatmul.mubr.bf16.vlgmr.msra.gmra.mrb[4].mxu1 %v1596_v27  ;;  %v6773_v40 = vpop.f32.mrb[0].mxu1  ;;  %v6887_v27 = vld [vmem:[#allocation21 + $0x88] ss:$16 sps:$4 sm:$0xff]  }
 0x2c4   :  { %2155 = vmatpush1.bf16.msra.mxu0 %v6733_v3  ;;  %2196 = vmatpush1.bf16.msra.mxu1 %v6735_v7  ;;  %v6781_v42 = vpop.f32.mrb[1].mxu1  ;;  %7588 = vst [vmem:[#allocation55_spill] sm:$0xff] %v6887_v27 }
 0x2c5   :  { %2156 = vmatprep.subr.bf16.mxu0 %v6737_v28  ;;  %2197 = vmatprep.subr.bf16.mxu1 %v6739_v46  ;;  %v1593_v43 = vpop.f32.mrb[2].mxu1 }
 0x2c6   :  { %2186 = vmatprep.mubr.bf16.mxu0 %v7424_v0  ;;  %2227 = vmatprep.mubr.bf16.mxu1 %v7424_v0  ;;  %v1594_v44 = vpop.f32.mrb[3].mxu1  ;;  %v6891_v43 = vld [vmem:[#allocation21 + $0xa4] ss:$16 sps:$4 sm:$0xff]  }
 0x2c7   :  { %7589 = vst [vmem:[#allocation56_spill] sm:$0xff] %v6891_v43  ;;  %v6893_v44 = vld [vmem:[#allocation21 + $0xac] ss:$16 sps:$4 sm:$0xff]  }
 0x2c8   :  { %2157 = vmatpush1.bf16.msra.mxu0 %v6743_v29  ;;  %2198 = vmatpush1.bf16.msra.mxu1 %v6745_v30  ;;  %7590 = vst [vmem:[#allocation57_spill] sm:$0xff] %v6893_v44 }
 0x2c9   :  { %2158 = vmatprep.subr.bf16.mxu0 %v6749_v31  ;;  %2199 = vmatprep.subr.bf16.mxu1 %v6751_v32 }
 0x2cc   :  { %2159 = vmatpush1.bf16.msra.mxu0 %v6757_v33  ;;  %2200 = vmatpush1.bf16.msra.mxu1 %v6759_v35 }
 0x2cd   :  { %2160 = vmatprep.subr.bf16.mxu0 %v6763_v36  ;;  %2201 = vmatprep.subr.bf16.mxu1 %v6765_v37 }
 0x2d0   :  { %2161 = vmatpush1.bf16.msra.mxu0 %v6769_v38  ;;  %2202 = vmatpush1.bf16.msra.mxu1 %v6771_v39 }
 0x2d1   :  { %2162 = vmatprep.subr.bf16.mxu0 %v6777_v41  ;;  %2203 = vmatprep.subr.bf16.mxu1 %v6779_v11 }
 0x2d4   :  { %2163 = vmatpush1.bf16.msra.mxu0 %v6785_v45  ;;  %2204 = vmatpush1.bf16.msra.mxu1 %v6787_v4 }
 0x2d5   :  { %2164 = vmatprep.subr.bf16.mxu0 %v6791_v48  ;;  %2205 = vmatprep.subr.bf16.mxu1 %v6793_v52 }
 0x2d8   :  { %2165 = vmatpush1.bf16.msra.mxu0 %v6797_v53  ;;  %2206 = vmatpush1.bf16.msra.mxu1 %v6799_v54 }
 0x2d9   :  { %2166 = vmatprep.subr.bf16.mxu0 %v6803_v56  ;;  %2207 = vmatprep.subr.bf16.mxu1 %v6805_v60 }
 0x2dc   :  { %2167 = vmatpush1.bf16.msra.mxu0 %v6809_v61  ;;  %2208 = vmatpush1.bf16.msra.mxu1 %v6811_v22 }
 0x2dd   :  { %2168 = vmatprep.subr.bf16.mxu0 %v6815_v63  ;;  %2209 = vmatprep.subr.bf16.mxu1 %v6817_v2 }
 0x2e0   :  { %2169 = vmatpush1.bf16.msra.mxu0 %v6821_v5  ;;  %2210 = vmatpush1.bf16.msra.mxu1 %v6823_v6 }
 0x2e1   :  { %2607 = vmatprep.subr.bf16.mxu0 %v6831_v8  ;;  %2648 = vmatprep.subr.bf16.mxu1 %v6833_v9 }
 0x2e3   :  { %2187 = vmatmul.mubr.bf16.vlgmr.msra.gmra.mrb[8].mxu0 %v7424_v0  ;;  %2228 = vmatmul.mubr.bf16.vlgmr.msra.gmra.mrb[8].mxu1 %v7424_v0  ;;  %v6895_v0 = vld [vmem:[#allocation21 + $0xa0] ss:$16 sps:$4 sm:$0xff]  }
 0x2e4   :  { %2608 = vmatpush1.bf16.msra.mxu0 %v6835_v10  ;;  %2649 = vmatpush1.bf16.msra.mxu1 %v6837_v12  ;;  %7591 = vst [vmem:[#allocation58_spill] sm:$0xff] %v6895_v0 }
 0x2e5   :  { %2609 = vmatprep.subr.bf16.mxu0 %v6839_v34  ;;  %2650 = vmatprep.subr.bf16.mxu1 %v6841_v13 }
 0x2e8   :  { %2610 = vmatpush1.bf16.msra.mxu0 %v6847_v14  ;;  %2651 = vmatpush1.bf16.msra.mxu1 %v6849_v15 }
 0x2e9   :  { %2611 = vmatprep.subr.bf16.mxu0 %v6853_v16  ;;  %2652 = vmatprep.subr.bf16.mxu1 %v6855_v17 }
 0x2ec   :  { %2612 = vmatpush1.bf16.msra.mxu0 %v6859_v18  ;;  %2653 = vmatpush1.bf16.msra.mxu1 %v6861_v19 }
 0x2ed   :  { %2613 = vmatprep.subr.bf16.mxu0 %v6865_v20  ;;  %2654 = vmatprep.subr.bf16.mxu1 %v6867_v57  ;;  %v6256_v57 = vmov 0.0|0.0  }
 0x2ee   :  { %2639 = vmatprep.mubr.bf16.mxu0 %v6256_v57  ;;  %2680 = vmatprep.mubr.bf16.mxu1 %v6256_v57  ;;  %v1629_v57 = vld [vmem:[%s7411_s14] sm:$0xf] }
 0x2f0   :  { %2614 = vmatpush1.bf16.msra.mxu0 %v6871_v21  ;;  %2655 = vmatpush1.bf16.msra.mxu1 %v6873_v24  ;;  %v6995_v24 = vld [vmem:[#allocation21 + $0x1c4] ss:$16 sps:$4 sm:$0xff]   ;;  %v6997_v21 = vld [vmem:[#allocation21 + $0x1cc] ss:$16 sps:$4 sm:$0xff]  }
 0x2f1   :  { %2615 = vmatprep.subr.bf16.mxu0 %v6879_v47  ;;  %2656 = vmatprep.subr.bf16.mxu1 %v6881_v25  ;;  %v6903_v25 = vld [vmem:[#allocation21 + $0xc4] ss:$16 sps:$4 sm:$0xff]   ;;  %v6909_v47 = vld [vmem:[#allocation21 + $0xc8] ss:$16 sps:$4 sm:$0xff]   ;;  %7625 = vst [vmem:[#allocation92_spill] sm:$0xff] %v6995_v24  ;;  %7626 = vst [vmem:[#allocation93_spill] sm:$0xff] %v6997_v21 }
 0x2f2   :  { %7593 = vst [vmem:[#allocation60_spill] sm:$0xff] %v6903_v25  ;;  %7596 = vst [vmem:[#allocation63_spill] sm:$0xff] %v6909_v47 }
 0x2f4   :  { %2616 = vmatpush1.bf16.msra.mxu0 %v6885_v26  ;;  %2657 = vmatpush1.bf16.msra.mxu1 %v6887_v27  ;;  %v6905_v26 = vld [vmem:[#allocation21 + $0xcc] ss:$16 sps:$4 sm:$0xff]   ;;  %v6907_v27 = vld [vmem:[#allocation21 + $0xc0] ss:$16 sps:$4 sm:$0xff]  }
 0x2f5   :  { %2617 = vmatprep.subr.bf16.mxu0 %v6891_v43  ;;  %2658 = vmatprep.subr.bf16.mxu1 %v6893_v44  ;;  %7594 = vst [vmem:[#allocation61_spill] sm:$0xff] %v6905_v26  ;;  %7595 = vst [vmem:[#allocation62_spill] sm:$0xff] %v6907_v27  ;;  %v6915_v44 = vld [vmem:[#allocation21 + $0xe4] ss:$16 sps:$4 sm:$0xff]   ;;  %v6921_v43 = vld [vmem:[#allocation21 + $0xe8] ss:$16 sps:$4 sm:$0xff]  }
 0x2f6   :  { %7597 = vst [vmem:[#allocation64_spill] sm:$0xff] %v6915_v44  ;;  %7600 = vst [vmem:[#allocation67_spill] sm:$0xff] %v6921_v43 }
 0x2f8   :  { %2618 = vmatpush1.bf16.msra.mxu0 %v6895_v0  ;;  %2659 = vmatpush1.bf16.msra.mxu1 %v6897_v49  ;;  %v6917_v0 = vld [vmem:[#allocation21 + $0xec] ss:$16 sps:$4 sm:$0xff]   ;;  %v6919_v49 = vld [vmem:[#allocation21 + $0xe0] ss:$16 sps:$4 sm:$0xff]  }
 0x2f9   :  { %2619 = vmatprep.subr.bf16.mxu0 %v6903_v25  ;;  %2660 = vmatprep.subr.bf16.mxu1 %v6905_v26  ;;  %7598 = vst [vmem:[#allocation65_spill] sm:$0xff] %v6917_v0  ;;  %7599 = vst [vmem:[#allocation66_spill] sm:$0xff] %v6919_v49  ;;  %v6927_v26 = vld [vmem:[#allocation21 + $0x104] ss:$16 sps:$4 sm:$0xff]   ;;  %v6933_v25 = vld [vmem:[#allocation21 + $0x108] ss:$16 sps:$4 sm:$0xff]  }
 0x2fa   :  { %7601 = vst [vmem:[#allocation68_spill] sm:$0xff] %v6927_v26  ;;  %7604 = vst [vmem:[#allocation71_spill] sm:$0xff] %v6933_v25 }
 0x2fc   :  { %2620 = vmatpush1.bf16.msra.mxu0 %v6907_v27  ;;  %2661 = vmatpush1.bf16.msra.mxu1 %v6909_v47  ;;  %v6929_v27 = vld [vmem:[#allocation21 + $0x10c] ss:$16 sps:$4 sm:$0xff]   ;;  %v6931_v47 = vld [vmem:[#allocation21 + $0x100] ss:$16 sps:$4 sm:$0xff]  }
 0x2fd   :  { %2621 = vmatprep.subr.bf16.mxu0 %v6915_v44  ;;  %2662 = vmatprep.subr.bf16.mxu1 %v6917_v0  ;;  %7602 = vst [vmem:[#allocation69_spill] sm:$0xff] %v6929_v27  ;;  %7603 = vst [vmem:[#allocation70_spill] sm:$0xff] %v6931_v47  ;;  %v6939_v0 = vld [vmem:[#allocation21 + $0x124] ss:$16 sps:$4 sm:$0xff]   ;;  %v6945_v44 = vld [vmem:[#allocation21 + $0x128] ss:$16 sps:$4 sm:$0xff]  }
 0x2fe   :  { %7605 = vst [vmem:[#allocation72_spill] sm:$0xff] %v6939_v0  ;;  %7608 = vst [vmem:[#allocation75_spill] sm:$0xff] %v6945_v44 }
 0x300   :  { %2622 = vmatpush1.bf16.msra.mxu0 %v6919_v49  ;;  %2663 = vmatpush1.bf16.msra.mxu1 %v6921_v43  ;;  %v6941_v49 = vld [vmem:[#allocation21 + $0x12c] ss:$16 sps:$4 sm:$0xff]   ;;  %v6943_v43 = vld [vmem:[#allocation21 + $0x120] ss:$16 sps:$4 sm:$0xff]  }
 0x301   :  { %2623 = vmatprep.subr.bf16.mxu0 %v6927_v26  ;;  %2664 = vmatprep.subr.bf16.mxu1 %v6929_v27  ;;  %7606 = vst [vmem:[#allocation73_spill] sm:$0xff] %v6941_v49  ;;  %7607 = vst [vmem:[#allocation74_spill] sm:$0xff] %v6943_v43  ;;  %v6951_v27 = vld [vmem:[#allocation21 + $0x144] ss:$16 sps:$4 sm:$0xff]   ;;  %v6957_v26 = vld [vmem:[#allocation21 + $0x148] ss:$16 sps:$4 sm:$0xff]  }
 0x302   :  { %7609 = vst [vmem:[#allocation76_spill] sm:$0xff] %v6951_v27  ;;  %7612 = vst [vmem:[#allocation79_spill] sm:$0xff] %v6957_v26 }
 0x304   :  { %2624 = vmatpush1.bf16.msra.mxu0 %v6931_v47  ;;  %2665 = vmatpush1.bf16.msra.mxu1 %v6933_v25  ;;  %v6953_v47 = vld [vmem:[#allocation21 + $0x14c] ss:$16 sps:$4 sm:$0xff]   ;;  %v6955_v25 = vld [vmem:[#allocation21 + $0x140] ss:$16 sps:$4 sm:$0xff]  }
 0x305   :  { %2625 = vmatprep.subr.bf16.mxu0 %v6939_v0  ;;  %2666 = vmatprep.subr.bf16.mxu1 %v6941_v49  ;;  %7610 = vst [vmem:[#allocation77_spill] sm:$0xff] %v6953_v47  ;;  %7611 = vst [vmem:[#allocation78_spill] sm:$0xff] %v6955_v25  ;;  %v6963_v49 = vld [vmem:[#allocation21 + $0x164] ss:$16 sps:$4 sm:$0xff]   ;;  %v6969_v0 = vld [vmem:[#allocation21 + $0x168] ss:$16 sps:$4 sm:$0xff]  }
 0x306   :  { %7613 = vst [vmem:[#allocation80_spill] sm:$0xff] %v6963_v49  ;;  %7616 = vst [vmem:[#allocation83_spill] sm:$0xff] %v6969_v0 }
 0x308   :  { %2626 = vmatpush1.bf16.msra.mxu0 %v6943_v43  ;;  %2667 = vmatpush1.bf16.msra.mxu1 %v6945_v44  ;;  %v6965_v43 = vld [vmem:[#allocation21 + $0x16c] ss:$16 sps:$4 sm:$0xff]   ;;  %v6967_v44 = vld [vmem:[#allocation21 + $0x160] ss:$16 sps:$4 sm:$0xff]  }
 0x309   :  { %2627 = vmatprep.subr.bf16.mxu0 %v6951_v27  ;;  %2668 = vmatprep.subr.bf16.mxu1 %v6953_v47  ;;  %7614 = vst [vmem:[#allocation81_spill] sm:$0xff] %v6965_v43  ;;  %7615 = vst [vmem:[#allocation82_spill] sm:$0xff] %v6967_v44  ;;  %v6975_v47 = vld [vmem:[#allocation21 + $0x184] ss:$16 sps:$4 sm:$0xff]   ;;  %v6981_v27 = vld [vmem:[#allocation21 + $0x188] ss:$16 sps:$4 sm:$0xff]  }
 0x30a   :  { %7617 = vst [vmem:[#allocation84_spill] sm:$0xff] %v6975_v47  ;;  %7620 = vst [vmem:[#allocation87_spill] sm:$0xff] %v6981_v27 }
 0x30c   :  { %2628 = vmatpush1.bf16.msra.mxu0 %v6955_v25  ;;  %2669 = vmatpush1.bf16.msra.mxu1 %v6957_v26  ;;  %v6977_v25 = vld [vmem:[#allocation21 + $0x18c] ss:$16 sps:$4 sm:$0xff]   ;;  %v6979_v26 = vld [vmem:[#allocation21 + $0x180] ss:$16 sps:$4 sm:$0xff]  }
 0x30d   :  { %2629 = vmatprep.subr.bf16.mxu0 %v6963_v49  ;;  %2670 = vmatprep.subr.bf16.mxu1 %v6965_v43  ;;  %7618 = vst [vmem:[#allocation85_spill] sm:$0xff] %v6977_v25  ;;  %7619 = vst [vmem:[#allocation86_spill] sm:$0xff] %v6979_v26  ;;  %v6987_v43 = vld [vmem:[#allocation21 + $0x1a4] ss:$16 sps:$4 sm:$0xff]   ;;  %v6993_v49 = vld [vmem:[#allocation21 + $0x1a8] ss:$16 sps:$4 sm:$0xff]  }
 0x30e   :  { %7621 = vst [vmem:[#allocation88_spill] sm:$0xff] %v6987_v43  ;;  %7624 = vst [vmem:[#allocation91_spill] sm:$0xff] %v6993_v49 }
 0x310   :  { %2630 = vmatpush1.bf16.msra.mxu0 %v6967_v44  ;;  %2671 = vmatpush1.bf16.msra.mxu1 %v6969_v0  ;;  %v6989_v44 = vld [vmem:[#allocation21 + $0x1ac] ss:$16 sps:$4 sm:$0xff]   ;;  %v6991_v0 = vld [vmem:[#allocation21 + $0x1a0] ss:$16 sps:$4 sm:$0xff]  }
 0x311   :  { %2631 = vmatprep.subr.bf16.mxu0 %v6975_v47  ;;  %2672 = vmatprep.subr.bf16.mxu1 %v6977_v25  ;;  %7622 = vst [vmem:[#allocation89_spill] sm:$0xff] %v6989_v44  ;;  %7623 = vst [vmem:[#allocation90_spill] sm:$0xff] %v6991_v0  ;;  %v7009_v25 = vld [vmem:[#allocation21 + $0x1e4] ss:$16 sps:$4 sm:$0xff]   ;;  %v7011_v47 = vld [vmem:[#allocation21 + $0x1ec] ss:$16 sps:$4 sm:$0xff]  }
 0x312   :  { %7629 = vst [vmem:[#allocation96_spill] sm:$0xff] %v7009_v25  ;;  %7630 = vst [vmem:[#allocation97_spill] sm:$0xff] %v7011_v47 }
 0x314   :  { %2632 = vmatpush1.bf16.msra.mxu0 %v6979_v26  ;;  %2673 = vmatpush1.bf16.msra.mxu1 %v6981_v27  ;;  %v7003_v27 = vld [vmem:[#allocation21 + $0x1c0] ss:$16 sps:$4 sm:$0xff]   ;;  %v7005_v26 = vld [vmem:[#allocation21 + $0x1c8] ss:$16 sps:$4 sm:$0xff]  }
 0x315   :  { %2633 = vmatprep.subr.bf16.mxu0 %v6987_v43  ;;  %2674 = vmatprep.subr.bf16.mxu1 %v6989_v44  ;;  %7627 = vst [vmem:[#allocation94_spill] sm:$0xff] %v7003_v27  ;;  %7628 = vst [vmem:[#allocation95_spill] sm:$0xff] %v7005_v26 }
 0x318   :  { %2634 = vmatpush1.bf16.msra.mxu0 %v6991_v0  ;;  %2675 = vmatpush1.bf16.msra.mxu1 %v6993_v49  ;;  %v7015_v49 = vld [vmem:[#allocation21 + $0x1e0] ss:$16 sps:$4 sm:$0xff]   ;;  %v7017_v0 = vld [vmem:[#allocation21 + $0x1e8] ss:$16 sps:$4 sm:$0xff]  }
 0x319   :  { %2635 = vmatprep.subr.bf16.mxu0 %v6995_v24  ;;  %2676 = vmatprep.subr.bf16.mxu1 %v6997_v21  ;;  %7631 = vst [vmem:[#allocation98_spill] sm:$0xff] %v7015_v49  ;;  %7632 = vst [vmem:[#allocation99_spill] sm:$0xff] %v7017_v0 }
 0x31c   :  { %2636 = vmatpush1.bf16.msra.mxu0 %v7003_v27  ;;  %2677 = vmatpush1.bf16.msra.mxu1 %v7005_v26  ;;  %v1634_v26 = vrot.slane %v1629_v57, %v6568_v55  ;;  %v1642_v27 = vrot.slane %v1629_v57, %v6575_v59 }
 0x31d   :  { %2637 = vmatprep.subr.bf16.mxu0 %v7009_v25  ;;  %2678 = vmatprep.subr.bf16.mxu1 %v7011_v47  ;;  %v1638_v25 = vrot.slane %v1629_v57, %v6572_v58  ;;  %v1646_v47 = vrot.slane %v1629_v57, %v6664_v1 }
 0x320   :  { %2638 = vmatpush1.bf16.msra.mxu0 %v7015_v49  ;;  %2679 = vmatpush1.bf16.msra.mxu1 %v7017_v0 }
 0x321   :  { %2730 = vmatprep.subr.bf16.mxu0 %v6699_v50  ;;  %2771 = vmatprep.subr.bf16.mxu1 %v6701_v51 }
 0x396   :  { %v1845_v21 = vpop.f32.mrb[4].mxu0  ;;  %v1886_v49 = vpop.f32.mrb[4].mxu1 }
 0x397   :  { %v1846_v24 = vadd.f32 %v1845_v21, %v1634_v26  ;;  %v1887_v0 = vadd.f32 %v1886_v49, %v1642_v27  ;;  %v1847_v44 = vpop.f32.mrb[5].mxu0  ;;  %v1888_v50 = vpop.f32.mrb[5].mxu1 }
 0x398   :  { %v1848_v43 = vadd.f32 %v1847_v44, %v1638_v25  ;;  %v1889_v51 = vadd.f32 %v1888_v50, %v1646_v47  ;;  %v1849_v20 = vpop.f32.mrb[6].mxu0  ;;  %v1890_v19 = vpop.f32.mrb[6].mxu1 }
 0x399   :  { %v1850_v18 = vpop.f32.mrb[7].mxu0  ;;  %v1891_v17 = vpop.f32.mrb[7].mxu1  ;;  %v1990_v55 = vadd.f32 %v1846_v24, %v6729_v62  ;;  %v1992_v59 = vadd.f32 %v1887_v0, %v6773_v40  ;;  %v2718_v16 = vrot.slane %v1846_v24, 6  ;;  %v2720_v58 = vrot.slane %v1887_v0, 6 }
 0x39a   :  { %v1991_v57 = vadd.f32 %v1848_v43, %v6731_v23  ;;  %v1993_v1 = vadd.f32 %v1889_v51, %v6781_v42  ;;  %v2719_v21 = vrot.slane %v1848_v43, 6  ;;  %v2721_v49 = vrot.slane %v1889_v51, 6 }
 0x39b   :  { %v7037_v26 = vadd.f32 %v2718_v16, %v6729_v62  ;;  %v7040_v50 = vadd.f32 %v2720_v58, %v6773_v40  ;;  %v2973_v18 = vrot.slane %v1846_v24, 4  ;;  %v2975_v17 = vrot.slane %v1887_v0, 4 }
 0x39c   :  { %v7043_v19 = vadd.f32 %v2719_v21, %v6731_v23  ;;  %v7046_v20 = vadd.f32 %v2721_v49, %v6781_v42  ;;  %v2974_v47 = vrot.slane %v1848_v43, 4  ;;  %v2976_v25 = vrot.slane %v1889_v51, 4 }
 0x39d   :  { %7633 = vst [vmem:[#allocation100_spill] sm:$0xff] %v7037_v26  ;;  %7634 = vst [vmem:[#allocation101_spill] sm:$0xff] %v7040_v50  ;;  %v7049_v27 = vadd.f32 %v2973_v18, %v6729_v62  ;;  %v7052_v44 = vadd.f32 %v2975_v17, %v6773_v40  ;;  %v3228_v16 = vrot.slane %v1846_v24, 2  ;;  %v3230_v26 = vrot.slane %v1887_v0, 2 }
 0x39e   :  { %7635 = vst [vmem:[#allocation102_spill] sm:$0xff] %v7043_v19  ;;  %7636 = vst [vmem:[#allocation103_spill] sm:$0xff] %v7046_v20  ;;  %v7055_v58 = vadd.f32 %v2974_v47, %v6731_v23  ;;  %v7058_v50 = vadd.f32 %v2976_v25, %v6781_v42  ;;  %v3229_v21 = vrot.slane %v1848_v43, 2  ;;  %v3231_v19 = vrot.slane %v1889_v51, 2 }
 0x39f   :  { %7637 = vst [vmem:[#allocation104_spill] sm:$0xff] %v7049_v27  ;;  %7638 = vst [vmem:[#allocation105_spill] sm:$0xff] %v7052_v44  ;;  %v7061_v49 = vadd.f32 %v3228_v16, %v6729_v62  ;;  %v7064_v20 = vadd.f32 %v3230_v26, %v6773_v40  ;;  %v7669_v27 = vld [vmem:[#allocation67_spill] sm:$0xff] }
 0x3a0   :  { %7639 = vst [vmem:[#allocation106_spill] sm:$0xff] %v7055_v58  ;;  %7640 = vst [vmem:[#allocation107_spill] sm:$0xff] %v7058_v50  ;;  %v7067_v18 = vadd.f32 %v3229_v21, %v6731_v23  ;;  %v7070_v24 = vadd.f32 %v3231_v19, %v6781_v42 }
 0x3a1   :  { %7641 = vst [vmem:[#allocation108_spill] sm:$0xff] %v7061_v49  ;;  %7642 = vst [vmem:[#allocation109_spill] sm:$0xff] %v7064_v20  ;;  %v7668_v20 = vld [vmem:[#allocation66_spill] sm:$0xff] }
 0x3a2   :  { %7643 = vst [vmem:[#allocation110_spill] sm:$0xff] %v7067_v18  ;;  %7644 = vst [vmem:[#allocation111_spill] sm:$0xff] %v7070_v24  ;;  %v7666_v24 = vld [vmem:[#allocation64_spill] sm:$0xff]  ;;  %v7667_v18 = vld [vmem:[#allocation65_spill] sm:$0xff] }
 0x3b6   :  { %v2188_v0 = vpop.f32.mrb[8].mxu0  ;;  %v2229_v17 = vpop.f32.mrb[8].mxu1 }
 0x3b7   :  { %v2236_v47 = vadd.f32 %v2188_v0, %v1990_v55  ;;  %v2238_v58 = vadd.f32 %v2229_v17, %v1992_v59  ;;  %v2190_v25 = vpop.f32.mrb[9].mxu0  ;;  %v2231_v50 = vpop.f32.mrb[9].mxu1 }
 0x3b8   :  { %v2237_v43 = vadd.f32 %v2190_v25, %v1991_v57  ;;  %v2239_v51 = vadd.f32 %v2231_v50, %v1993_v1  ;;  %v2192_v44 = vpop.f32.mrb[10].mxu0  ;;  %v2233_v62 = vpop.f32.mrb[10].mxu1 }
 0x3b9   :  { %v4741_v16 = vmul.f32 -1.442695, %v2236_v47  ;;  %v2193_v49 = vpop.f32.mrb[11].mxu0  ;;  %v2234_v40 = vpop.f32.mrb[11].mxu1  ;;  %v7646_v62 = vld [vmem:[#allocation44_spill] sm:$0xff] }
 0x3ba   :  { %v4742_v26 = vmul.f32 -1.442695, %v2237_v43  ;;  %v4743_v23 = vmul.f32 -1.442695, %v2239_v51  ;;  %v7648_v40 = vld [vmem:[#allocation46_spill] sm:$0xff] }
 0x3bb   :  { %5630 = vpow2.f32 %v4741_v16  ;;  %v7647_v16 = vld [vmem:[#allocation45_spill] sm:$0xff] }
 0x3bc   :  { %5632 = vpow2.f32 %v4742_v26  ;;  %v7649_v26 = vld [vmem:[#allocation47_spill] sm:$0xff] }
 0x3bd   :  { %5634 = vpow2.f32 %v4743_v23  ;;  %v7650_v23 = vld [vmem:[#allocation48_spill] sm:$0xff] }
 0x3be   :  { %5636 = vtanh.f32 %v2238_v58  ;;  %v7645_v58 = vmov 0  }
 0x3c5   :  { %v5631_v21 = vpop.eup %5630 }
 0x3c6   :  { %v5633_v42 = vpop.eup %5632  ;;  %v2243_v19 = vadd.f32 1.0, %v5631_v21  ;;  %v7651_v21 = vld [vmem:[#allocation49_spill] sm:$0xff] }
 0x3c7   :  { %v2249_v55 = vadd.f32 1.0, %v5633_v42  ;;  %v5635_v59 = vpop.eup %5634  ;;  %v7652_v42 = vld [vmem:[#allocation50_spill] sm:$0xff] }
 0x3c8   :  { %5638 = vrcp.f32 %v2243_v19  ;;  %v5637_v57 = vpop.eup %5636  ;;  %v2256_v0 = vadd.f32 1.0, %v5635_v59  ;;  %v7653_v19 = vld [vmem:[#allocation51_spill] sm:$0xff]  ;;  %v7655_v59 = vld [vmem:[#allocation53_spill] sm:$0xff] }
 0x3c9   :  { %5640 = vrcp.f32 %v2249_v55  ;;  %v7654_v55 = vld [vmem:[#allocation52_spill] sm:$0xff] }
 0x3ca   :  { %5642 = vrcp.f32 %v2256_v0  ;;  %v7660_v0 = vld [vmem:[#allocation58_spill] sm:$0xff] }
 0x3d2   :  { %v5639_v1 = vpop.eup %5638 }
 0x3d3   :  { %v5641_v50 = vpop.eup %5640  ;;  %v2260_v44 = vmul.f32 %v5639_v1, %v5637_v57  ;;  %v7656_v57 = vld [vmem:[#allocation54_spill] sm:$0xff]  ;;  %v7657_v1 = vld [vmem:[#allocation55_spill] sm:$0xff] }
 0x3d4   :  { %v2259_v49 = vmul.f32 0.0, %v5641_v50  ;;  %v5643_v47 = vpop.eup %5642  ;;  %v7658_v50 = vld [vmem:[#allocation56_spill] sm:$0xff] }
 0x3d6   :  { %v7072_v17 = vadd.f32 %v2260_v44, %v2259_v49  ;;  %v7659_v44 = vld [vmem:[#allocation57_spill] sm:$0xff]  ;;  %v7661_v49 = vld [vmem:[#allocation59_spill] sm:$0xff] }
 0x3d8   :  { %5644 = vtanh.f32 %v7072_v17 }
 0x3e2   :  { %v5645_v25 = vpop.eup %5644 }
 0x3e3   :  { %v2263_v43 = vmul.f32 %v5645_v25, %v5643_v47  ;;  %v7662_v47 = vld [vmem:[#allocation60_spill] sm:$0xff]  ;;  %v7663_v25 = vld [vmem:[#allocation61_spill] sm:$0xff] }
 0x3e5   :  { %v2264_v51 = vpack.c.bf16 %v2263_v43, %v2263_v43  ;;  %v7664_v43 = vld [vmem:[#allocation62_spill] sm:$0xff] }
 0x3e7   :  { %2640 = vmatmul.mubr.bf16.vlgmr.msra.gmra.mrb[12].mxu0 %v2264_v51  ;;  %2681 = vmatmul.mubr.bf16.vlgmr.msra.gmra.mrb[12].mxu1 %v2264_v51 }
 0x3e8   :  { %2731 = vmatpush1.bf16.msra.mxu0 %v6733_v3  ;;  %2772 = vmatpush1.bf16.msra.mxu1 %v6735_v7 }
 0x3e9   :  { %2732 = vmatprep.subr.bf16.mxu0 %v6737_v28  ;;  %2773 = vmatprep.subr.bf16.mxu1 %v6739_v46 }
 0x3ea   :  { %2762 = vmatprep.mubr.bf16.mxu0 %v7645_v58  ;;  %2803 = vmatprep.mubr.bf16.mxu1 %v7645_v58 }
 0x3ec   :  { %2733 = vmatpush1.bf16.msra.mxu0 %v6743_v29  ;;  %2774 = vmatpush1.bf16.msra.mxu1 %v6745_v30 }
 0x3ed   :  { %2734 = vmatprep.subr.bf16.mxu0 %v6749_v31  ;;  %2775 = vmatprep.subr.bf16.mxu1 %v6751_v32 }
 0x3f0   :  { %2735 = vmatpush1.bf16.msra.mxu0 %v6757_v33  ;;  %2776 = vmatpush1.bf16.msra.mxu1 %v6759_v35 }
 0x3f1   :  { %2736 = vmatprep.subr.bf16.mxu0 %v6763_v36  ;;  %2777 = vmatprep.subr.bf16.mxu1 %v6765_v37 }
 0x3f4   :  { %2737 = vmatpush1.bf16.msra.mxu0 %v6769_v38  ;;  %2778 = vmatpush1.bf16.msra.mxu1 %v6771_v39 }
 0x3f5   :  { %2738 = vmatprep.subr.bf16.mxu0 %v6777_v41  ;;  %2779 = vmatprep.subr.bf16.mxu1 %v6779_v11 }
 0x3f8   :  { %2739 = vmatpush1.bf16.msra.mxu0 %v6785_v45  ;;  %2780 = vmatpush1.bf16.msra.mxu1 %v6787_v4 }
 0x3f9   :  { %2740 = vmatprep.subr.bf16.mxu0 %v6791_v48  ;;  %2781 = vmatprep.subr.bf16.mxu1 %v6793_v52 }
 0x3fc   :  { %2741 = vmatpush1.bf16.msra.mxu0 %v6797_v53  ;;  %2782 = vmatpush1.bf16.msra.mxu1 %v6799_v54 }
 0x3fd   :  { %2742 = vmatprep.subr.bf16.mxu0 %v6803_v56  ;;  %2783 = vmatprep.subr.bf16.mxu1 %v6805_v60 }
 0x400   :  { %2743 = vmatpush1.bf16.msra.mxu0 %v6809_v61  ;;  %2784 = vmatpush1.bf16.msra.mxu1 %v6811_v22 }
 0x401   :  { %2744 = vmatprep.subr.bf16.mxu0 %v6815_v63  ;;  %2785 = vmatprep.subr.bf16.mxu1 %v6817_v2 }
 0x404   :  { %2745 = vmatpush1.bf16.msra.mxu0 %v6821_v5  ;;  %2786 = vmatpush1.bf16.msra.mxu1 %v6823_v6 }
 0x405   :  { %2866 = vmatprep.subr.bf16.mxu0 %v6831_v8  ;;  %2907 = vmatprep.subr.bf16.mxu1 %v6833_v9 }
 0x407   :  { %2763 = vmatmul.mubr.bf16.vlgmr.msra.gmra.mrb[16].mxu0 %v2264_v51  ;;  %2804 = vmatmul.mubr.bf16.vlgmr.msra.gmra.mrb[16].mxu1 %v2264_v51  ;;  %v7665_v51 = vld [vmem:[#allocation63_spill] sm:$0xff] }
 0x408   :  { %2867 = vmatpush1.bf16.msra.mxu0 %v6835_v10  ;;  %2908 = vmatpush1.bf16.msra.mxu1 %v6837_v12 }
 0x409   :  { %2868 = vmatprep.subr.bf16.mxu0 %v6839_v34  ;;  %2909 = vmatprep.subr.bf16.mxu1 %v6841_v13 }
 0x40c   :  { %2869 = vmatpush1.bf16.msra.mxu0 %v6847_v14  ;;  %2910 = vmatpush1.bf16.msra.mxu1 %v6849_v15 }
 0x40d   :  { %2870 = vmatprep.subr.bf16.mxu0 %v7646_v62  ;;  %2911 = vmatprep.subr.bf16.mxu1 %v7647_v16 }
 0x410   :  { %2871 = vmatpush1.bf16.msra.mxu0 %v7648_v40  ;;  %2912 = vmatpush1.bf16.msra.mxu1 %v7649_v26  ;;  %v7716_v26 = vld [vmem:[#allocation103_spill] sm:$0xff] }
 0x411   :  { %2872 = vmatprep.subr.bf16.mxu0 %v7650_v23  ;;  %2913 = vmatprep.subr.bf16.mxu1 %v7651_v21  ;;  %v7710_v21 = vld [vmem:[#allocation40_spill] sm:$0xff] }
 0x414   :  { %2873 = vmatpush1.bf16.msra.mxu0 %v7652_v42  ;;  %2914 = vmatpush1.bf16.msra.mxu1 %v7653_v19  ;;  %v7708_v42 = vld [vmem:[#allocation41_spill] sm:$0xff] }
 0x415   :  { %2874 = vmatprep.subr.bf16.mxu0 %v7654_v55  ;;  %2915 = vmatprep.subr.bf16.mxu1 %v7655_v59 }
 0x418   :  { %2875 = vmatpush1.bf16.msra.mxu0 %v7656_v57  ;;  %2916 = vmatpush1.bf16.msra.mxu1 %v7657_v1 }
 0x419   :  { %2876 = vmatprep.subr.bf16.mxu0 %v7658_v50  ;;  %2917 = vmatprep.subr.bf16.mxu1 %v7659_v44  ;;  %v7670_v44 = vld [vmem:[#allocation68_spill] sm:$0xff] }
 0x41c   :  { %2877 = vmatpush1.bf16.msra.mxu0 %v7660_v0  ;;  %2918 = vmatpush1.bf16.msra.mxu1 %v7661_v49  ;;  %v7671_v0 = vld [vmem:[#allocation69_spill] sm:$0xff]  ;;  %v7672_v49 = vld [vmem:[#allocation70_spill] sm:$0xff] }
 0x41d   :  { %2878 = vmatprep.subr.bf16.mxu0 %v7662_v47  ;;  %2919 = vmatprep.subr.bf16.mxu1 %v7663_v25  ;;  %v7673_v47 = vld [vmem:[#allocation71_spill] sm:$0xff]  ;;  %v7674_v25 = vld [vmem:[#allocation72_spill] sm:$0xff] }
 0x420   :  { %2879 = vmatpush1.bf16.msra.mxu0 %v7664_v43  ;;  %2920 = vmatpush1.bf16.msra.mxu1 %v7665_v51  ;;  %v7675_v43 = vld [vmem:[#allocation73_spill] sm:$0xff]  ;;  %v7676_v51 = vld [vmem:[#allocation74_spill] sm:$0xff] }
 0x421   :  { %2880 = vmatprep.subr.bf16.mxu0 %v7666_v24  ;;  %2921 = vmatprep.subr.bf16.mxu1 %v7667_v18  ;;  %v7677_v24 = vld [vmem:[#allocation75_spill] sm:$0xff]  ;;  %v7678_v18 = vld [vmem:[#allocation76_spill] sm:$0xff] }
 0x424   :  { %2881 = vmatpush1.bf16.msra.mxu0 %v7668_v20  ;;  %2922 = vmatpush1.bf16.msra.mxu1 %v7669_v27  ;;  %v7679_v20 = vld [vmem:[#allocation77_spill] sm:$0xff]  ;;  %v7680_v27 = vld [vmem:[#allocation78_spill] sm:$0xff] }
 0x425   :  { %2882 = vmatprep.subr.bf16.mxu0 %v7670_v44  ;;  %2923 = vmatprep.subr.bf16.mxu1 %v7671_v0  ;;  %v7681_v44 = vld [vmem:[#allocation79_spill] sm:$0xff]  ;;  %v7682_v0 = vld [vmem:[#allocation80_spill] sm:$0xff] }
 0x428   :  { %2883 = vmatpush1.bf16.msra.mxu0 %v7672_v49  ;;  %2924 = vmatpush1.bf16.msra.mxu1 %v7673_v47  ;;  %v7683_v49 = vld [vmem:[#allocation81_spill] sm:$0xff]  ;;  %v7684_v47 = vld [vmem:[#allocation82_spill] sm:$0xff] }
 0x429   :  { %2884 = vmatprep.subr.bf16.mxu0 %v7674_v25  ;;  %2925 = vmatprep.subr.bf16.mxu1 %v7675_v43  ;;  %v7685_v25 = vld [vmem:[#allocation83_spill] sm:$0xff]  ;;  %v7686_v43 = vld [vmem:[#allocation84_spill] sm:$0xff] }
 0x42c   :  { %2885 = vmatpush1.bf16.msra.mxu0 %v7676_v51  ;;  %2926 = vmatpush1.bf16.msra.mxu1 %v7677_v24  ;;  %v7687_v51 = vld [vmem:[#allocation85_spill] sm:$0xff]  ;;  %v7688_v24 = vld [vmem:[#allocation86_spill] sm:$0xff] }
 0x42d   :  { %2886 = vmatprep.subr.bf16.mxu0 %v7678_v18  ;;  %2927 = vmatprep.subr.bf16.mxu1 %v7679_v20  ;;  %v7689_v18 = vld [vmem:[#allocation87_spill] sm:$0xff]  ;;  %v7690_v20 = vld [vmem:[#allocation88_spill] sm:$0xff] }
 0x430   :  { %2887 = vmatpush1.bf16.msra.mxu0 %v7680_v27  ;;  %2928 = vmatpush1.bf16.msra.mxu1 %v7681_v44  ;;  %v7691_v27 = vld [vmem:[#allocation89_spill] sm:$0xff]  ;;  %v7692_v44 = vld [vmem:[#allocation90_spill] sm:$0xff] }
 0x431   :  { %2888 = vmatprep.subr.bf16.mxu0 %v7682_v0  ;;  %2929 = vmatprep.subr.bf16.mxu1 %v7683_v49  ;;  %v7693_v0 = vld [vmem:[#allocation91_spill] sm:$0xff]  ;;  %v7694_v49 = vld [vmem:[#allocation92_spill] sm:$0xff] }
 0x434   :  { %2889 = vmatpush1.bf16.msra.mxu0 %v7684_v47  ;;  %2930 = vmatpush1.bf16.msra.mxu1 %v7685_v25  ;;  %v7695_v47 = vld [vmem:[#allocation93_spill] sm:$0xff]  ;;  %v7696_v25 = vld [vmem:[#allocation94_spill] sm:$0xff] }
 0x435   :  { %2890 = vmatprep.subr.bf16.mxu0 %v7686_v43  ;;  %2931 = vmatprep.subr.bf16.mxu1 %v7687_v51  ;;  %v7697_v43 = vld [vmem:[#allocation95_spill] sm:$0xff]  ;;  %v7698_v51 = vld [vmem:[#allocation96_spill] sm:$0xff] }
 0x438   :  { %2891 = vmatpush1.bf16.msra.mxu0 %v7688_v24  ;;  %2932 = vmatpush1.bf16.msra.mxu1 %v7689_v18  ;;  %v7699_v24 = vld [vmem:[#allocation97_spill] sm:$0xff]  ;;  %v7700_v18 = vld [vmem:[#allocation98_spill] sm:$0xff] }
 0x439   :  { %2892 = vmatprep.subr.bf16.mxu0 %v7690_v20  ;;  %2933 = vmatprep.subr.bf16.mxu1 %v7691_v27  ;;  %v7701_v20 = vld [vmem:[#allocation99_spill] sm:$0xff]  ;;  %v7702_v27 = vld [vmem:[#allocation42_spill] sm:$0xff] }
 0x43c   :  { %2893 = vmatpush1.bf16.msra.mxu0 %v7692_v44  ;;  %2934 = vmatpush1.bf16.msra.mxu1 %v7693_v0  ;;  %v7703_v44 = vld [vmem:[#allocation43_spill] sm:$0xff] }
 0x43d   :  { %2894 = vmatprep.subr.bf16.mxu0 %v7694_v49  ;;  %2935 = vmatprep.subr.bf16.mxu1 %v7695_v47  ;;  %v1893_v47 = vld [vmem:[%s7413_s16] sm:$0xf]  ;;  %v7704_v49 = vld [vmem:[#allocation38_spill] sm:$0xff]  ;;  %s6258_s16 = smov [#allocation25]  }
 0x43e   :  { %v7189_v23 = vrot.slane %v1893_v47, %v7710_v21  ;;  %s4508_s24 = sshll.u32 %s6258_s16, 4  ;;  %s4509_s24 = int_to_ptr.vmem [resolvable:$true] %s4508_s24 }
 0x43f   :  { %s6140_s15 = scalar_lea.vmem %s4509_s24, 64  ;;  %p6145_p7 = scmp.lt.s32.totalorder %s4509_s24, %s4509_s24 }
 0x440   :  { %2895 = vmatpush1.bf16.msra.mxu0 %v7696_v25  ;;  %2936 = vmatpush1.bf16.msra.mxu1 %v7697_v43  ;;  %v7177_v25 = vrot.slane %v1893_v47, %v7704_v49  ;;  %v7706_v43 = vld [vmem:[#allocation39_spill] sm:$0xff]  ;;  %v7185_v49 = vrot.slane %v1893_v47, %v7708_v42  ;;  %7711 = vst [vmem:[#allocation43_spill] sm:$0xff] %v7189_v23  ;;  %p6141_p6 = scmp.ne.s32.totalorder %s4509_s24, %s6140_s15  ;;  %p6146_p8 = scmp.lt.s32.totalorder %s6140_s15, %s6140_s15 }
 0x441   :  { %2896 = vmatprep.subr.bf16.mxu0 %v7698_v51  ;;  %2937 = vmatprep.subr.bf16.mxu1 %v7699_v24  ;;  %v7180_v0 = vrot.slane %v1893_v47, %v7706_v43 }
 0x442   :  { %7705 = vst [vmem:[#allocation44_spill] sm:$0xff] %v7177_v25  ;;  %7709 = vst [vmem:[#allocation42_spill] sm:$0xff] %v7185_v49  ;;  %p6147_p9 = por %p6146_p8, %p6145_p7 }
 0x443   :  { %7707 = vst [vmem:[#allocation45_spill] sm:$0xff] %v7180_v0 }
 0x444   :  { %2897 = vmatpush1.bf16.msra.mxu0 %v7700_v18  ;;  %2938 = vmatpush1.bf16.msra.mxu1 %v7701_v20  ;;  %p6148_p10 = pnand %p6147_p9, %p6141_p6 }
 0x445   :  { %2985 = vmatprep.subr.bf16.mxu0 %v7702_v27  ;;  %3026 = vmatprep.subr.bf16.mxu1 %v7703_v44 }
 0x4ba   :  { %v2641_v51 = vpop.f32.mrb[12].mxu0  ;;  %v2682_v24 = vpop.f32.mrb[12].mxu1 }
 0x4bb   :  { %v2642_v18 = vadd.f32 %v2641_v51, %v7177_v25  ;;  %v2643_v50 = vpop.f32.mrb[13].mxu0  ;;  %v2684_v20 = vpop.f32.mrb[13].mxu1  ;;  %v2683_v25 = vadd.f32 %v2682_v24, %v7189_v23 }
 0x4bc   :  { %v2644_v27 = vadd.f32 %v2643_v50, %v7180_v0  ;;  %v2645_v1 = vpop.f32.mrb[14].mxu0  ;;  %v2686_v44 = vpop.f32.mrb[14].mxu1  ;;  %v2685_v43 = vadd.f32 %v2684_v20, %v7185_v49  ;;  %v7713_v49 = vld [vmem:[#allocation100_spill] sm:$0xff] }
 0x4bd   :  { %v4808_v57 = vmul.f32 -1.442695, %v2642_v18  ;;  %v2646_v59 = vpop.f32.mrb[15].mxu0  ;;  %v2687_v55 = vpop.f32.mrb[15].mxu1 }
 0x4be   :  { %v4809_v19 = vmul.f32 -1.442695, %v2644_v27  ;;  %v4810_v51 = vmul.f32 -1.442695, %v2685_v43 }
 0x4bf   :  { %5646 = vpow2.f32 %v4808_v57 }
 0x4c0   :  { %5648 = vpow2.f32 %v4809_v19 }
 0x4c1   :  { %5650 = vpow2.f32 %v4810_v51 }
 0x4c2   :  { %5652 = vtanh.f32 %v2683_v25 }
 0x4c9   :  { %v5647_v50 = vpop.eup %5646 }
 0x4ca   :  { %v5649_v1 = vpop.eup %5648  ;;  %v2692_v44 = vadd.f32 1.0, %v5647_v50 }
 0x4cb   :  { %v2698_v18 = vadd.f32 1.0, %v5649_v1  ;;  %v5651_v55 = vpop.eup %5650 }
 0x4cc   :  { %5654 = vrcp.f32 %v2692_v44  ;;  %v5653_v59 = vpop.eup %5652  ;;  %v2705_v20 = vadd.f32 1.0, %v5651_v55 }
 0x4cd   :  { %5656 = vrcp.f32 %v2698_v18 }
 0x4ce   :  { %5658 = vrcp.f32 %v2705_v20 }
 0x4d6   :  { %v5655_v57 = vpop.eup %5654 }
 0x4d7   :  { %v5657_v19 = vpop.eup %5656  ;;  %v2709_v27 = vmul.f32 %v5655_v57, %v5653_v59  ;;  %v7714_v59 = vld [vmem:[#allocation101_spill] sm:$0xff] }
 0x4d8   :  { %v2708_v42 = vmul.f32 0.0, %v5657_v19  ;;  %v7715_v19 = vld [vmem:[#allocation102_spill] sm:$0xff]  ;;  %v5659_v40 = vpop.eup %5658 }
 0x4da   :  { %v7192_v47 = vadd.f32 %v2709_v27, %v2708_v42  ;;  %v2764_v43 = vpop.f32.mrb[16].mxu0  ;;  %v2805_v21 = vpop.f32.mrb[16].mxu1 }
 0x4db   :  { %v2816_v24 = vrot.slane %v2764_v43, 6  ;;  %v2818_v23 = vrot.slane %v2805_v21, 6  ;;  %v2766_v50 = vpop.f32.mrb[17].mxu0  ;;  %v2807_v51 = vpop.f32.mrb[17].mxu1 }
 0x4dc   :  { %7712 = vst [vmem:[#allocation112_spill] sm:$0xff] %v7192_v47  ;;  %5660 = vtanh.f32 %v7192_v47  ;;  %v2817_v25 = vrot.slane %v2766_v50, 6  ;;  %v2819_v1 = vrot.slane %v2807_v51, 6  ;;  %v2768_v44 = vpop.f32.mrb[18].mxu0  ;;  %v2809_v18 = vpop.f32.mrb[18].mxu1 }
 0x4dd   :  { %v2824_v0 = vadd.f32 %v2816_v24, %v7713_v49  ;;  %v2826_v55 = vadd.f32 %v2818_v23, %v7714_v59  ;;  %v2769_v57 = vpop.f32.mrb[19].mxu0  ;;  %v2810_v42 = vpop.f32.mrb[19].mxu1 }
 0x4de   :  { %v2825_v27 = vadd.f32 %v2817_v25, %v7715_v19  ;;  %v2827_v20 = vadd.f32 %v2819_v1, %v7716_v26 }
 0x4df   :  { %v4811_v43 = vmul.f32 -1.442695, %v2824_v0 }
 0x4e0   :  { %v4812_v21 = vmul.f32 -1.442695, %v2825_v27  ;;  %v4813_v51 = vmul.f32 -1.442695, %v2827_v20 }
 0x4e1   :  { %5662 = vpow2.f32 %v4811_v43 }
 0x4e2   :  { %5664 = vpow2.f32 %v4812_v21 }
 0x4e3   :  { %5666 = vpow2.f32 %v4813_v51  ;;  %v7758_v51 = vld [vmem:[#allocation87_spill] sm:$0xff] }
 0x4e4   :  { %5668 = vtanh.f32 %v2826_v55 }
 0x4e6   :  { %v5661_v47 = vpop.eup %5660 }
 0x4e7   :  { %v2712_v50 = vmul.f32 %v5661_v47, %v5659_v40  ;;  %v2848_v40 = vrot.slane %v7072_v17, 6  ;;  %v7755_v17 = vld [vmem:[#allocation84_spill] sm:$0xff] }
 0x4e9   :  { %2713 = vst [vmem:[#allocation2] sm:$0x3] %v2712_v50  ;;  %v2856_v44 = vrot.slane %v2712_v50, 6 }
 0x4eb   :  { %v5663_v18 = vpop.eup %5662  ;;  %v2859_v49 = vpack.c.bf16 %v2856_v44, %v2856_v44  ;;  %v7759_v44 = vld [vmem:[#allocation88_spill] sm:$0xff] }
 0x4ec   :  { %v5665_v24 = vpop.eup %5664  ;;  %v2831_v23 = vadd.f32 1.0, %v5663_v18  ;;  %v7760_v18 = vld [vmem:[#allocation89_spill] sm:$0xff] }
 0x4ed   :  { %v2837_v59 = vadd.f32 1.0, %v5665_v24  ;;  %v2863_v25 = vrot.slane %v2859_v49, 1  ;;  %v5667_v26 = vpop.eup %5666  ;;  %v7761_v49 = vld [vmem:[#allocation90_spill] sm:$0xff]  ;;  %v7762_v24 = vld [vmem:[#allocation91_spill] sm:$0xff] }
 0x4ee   :  { %5670 = vrcp.f32 %v2831_v23  ;;  %v5669_v0 = vpop.eup %5668  ;;  %v2844_v42 = vadd.f32 1.0, %v5667_v26  ;;  %v7763_v23 = vld [vmem:[#allocation92_spill] sm:$0xff]  ;;  %v7766_v26 = vld [vmem:[#allocation95_spill] sm:$0xff] }
 0x4ef   :  { %5672 = vrcp.f32 %v2837_v59  ;;  %2898 = vmatprep.mubr.bf16.mxu0 %v2863_v25  ;;  %2939 = vmatprep.mubr.bf16.mxu1 %v2863_v25  ;;  %v7764_v59 = vld [vmem:[#allocation93_spill] sm:$0xff]  ;;  %v7765_v25 = vld [vmem:[#allocation94_spill] sm:$0xff] }
 0x4f0   :  { %5674 = vrcp.f32 %v2844_v42  ;;  %v5759_v42 = vld [vmem:[#allocation20 + $0xc] ss:$16 sps:$4 sm:$0xff]  }
 0x4f8   :  { %v5671_v1 = vpop.eup %5670 }
 0x4f9   :  { %v5673_v47 = vpop.eup %5672  ;;  %v2851_v57 = vmul.f32 %v5671_v1, %v5669_v0  ;;  %v7767_v0 = vld [vmem:[#allocation96_spill] sm:$0xff]  ;;  %v7768_v1 = vld [vmem:[#allocation97_spill] sm:$0xff] }
 0x4fa   :  { %v2850_v19 = vmul.f32 %v5673_v47, %v2848_v40  ;;  %v5675_v55 = vpop.eup %5674  ;;  %v7769_v40 = vld [vmem:[#allocation98_spill] sm:$0xff]  ;;  %v7770_v47 = vld [vmem:[#allocation99_spill] sm:$0xff] }
 0x4fc   :  { %v7200_v27 = vadd.f32 %v2851_v57, %v2850_v19  ;;  %v5758_v57 = vld [vmem:[#allocation20 + $0x4] ss:$16 sps:$4 sm:$0xff]  }
 0x4fe   :  { %5676 = vtanh.f32 %v7200_v27 }
 0x508   :  { %v5677_v20 = vpop.eup %5676 }
 0x509   :  { %v2854_v43 = vmul.f32 %v5677_v20, %v5675_v55  ;;  %v7771_v20 = vld [vmem:[#allocation44_spill] sm:$0xff] }
 0x50b   :  { %v2858_v21 = vpack.c.bf16 %v2854_v43, %v2854_v43 }
 0x50d   :  { %v2862_v50 = vrot.slane %v2858_v21, 1 }
 0x50f   :  { %2899 = vmatmul.mubr.bf16.vlgmr.msra.gmra.mrb[20].mxu0 %v2862_v50  ;;  %2940 = vmatmul.mubr.bf16.vlgmr.msra.gmra.mrb[20].mxu1 %v2862_v50 }
 0x510   :  { %2986 = vmatpush1.bf16.msra.mxu0 %v6733_v3  ;;  %3027 = vmatpush1.bf16.msra.mxu1 %v6735_v7  ;;  %v7717_v3 = vld [vmem:[#allocation46_spill] sm:$0xff]  ;;  %v7718_v7 = vld [vmem:[#allocation47_spill] sm:$0xff] }
 0x511   :  { %2987 = vmatprep.subr.bf16.mxu0 %v6737_v28  ;;  %3028 = vmatprep.subr.bf16.mxu1 %v6739_v46  ;;  %v7719_v28 = vld [vmem:[#allocation48_spill] sm:$0xff]  ;;  %v7720_v46 = vld [vmem:[#allocation49_spill] sm:$0xff] }
 0x512   :  { %3017 = vmatprep.mubr.bf16.mxu0 %v7645_v58  ;;  %3058 = vmatprep.mubr.bf16.mxu1 %v7645_v58 }
 0x514   :  { %2988 = vmatpush1.bf16.msra.mxu0 %v6743_v29  ;;  %3029 = vmatpush1.bf16.msra.mxu1 %v6745_v30  ;;  %v7721_v29 = vld [vmem:[#allocation50_spill] sm:$0xff]  ;;  %v7722_v30 = vld [vmem:[#allocation51_spill] sm:$0xff] }
 0x515   :  { %2989 = vmatprep.subr.bf16.mxu0 %v6749_v31  ;;  %3030 = vmatprep.subr.bf16.mxu1 %v6751_v32  ;;  %v7723_v31 = vld [vmem:[#allocation52_spill] sm:$0xff]  ;;  %v7724_v32 = vld [vmem:[#allocation53_spill] sm:$0xff] }
 0x518   :  { %2990 = vmatpush1.bf16.msra.mxu0 %v6757_v33  ;;  %3031 = vmatpush1.bf16.msra.mxu1 %v6759_v35  ;;  %v7725_v33 = vld [vmem:[#allocation54_spill] sm:$0xff]  ;;  %v7726_v35 = vld [vmem:[#allocation55_spill] sm:$0xff] }
 0x519   :  { %2991 = vmatprep.subr.bf16.mxu0 %v6763_v36  ;;  %3032 = vmatprep.subr.bf16.mxu1 %v6765_v37  ;;  %v7727_v36 = vld [vmem:[#allocation56_spill] sm:$0xff]  ;;  %v7728_v37 = vld [vmem:[#allocation57_spill] sm:$0xff] }
 0x51c   :  { %2992 = vmatpush1.bf16.msra.mxu0 %v6769_v38  ;;  %3033 = vmatpush1.bf16.msra.mxu1 %v6771_v39  ;;  %v7729_v38 = vld [vmem:[#allocation58_spill] sm:$0xff]  ;;  %v7730_v39 = vld [vmem:[#allocation59_spill] sm:$0xff] }
 0x51d   :  { %2993 = vmatprep.subr.bf16.mxu0 %v6777_v41  ;;  %3034 = vmatprep.subr.bf16.mxu1 %v6779_v11  ;;  %v7731_v41 = vld [vmem:[#allocation60_spill] sm:$0xff]  ;;  %v7732_v11 = vld [vmem:[#allocation61_spill] sm:$0xff] }
 0x520   :  { %2994 = vmatpush1.bf16.msra.mxu0 %v6785_v45  ;;  %3035 = vmatpush1.bf16.msra.mxu1 %v6787_v4  ;;  %v7733_v45 = vld [vmem:[#allocation62_spill] sm:$0xff]  ;;  %v7734_v4 = vld [vmem:[#allocation63_spill] sm:$0xff] }
 0x521   :  { %2995 = vmatprep.subr.bf16.mxu0 %v6791_v48  ;;  %3036 = vmatprep.subr.bf16.mxu1 %v6793_v52  ;;  %v7735_v48 = vld [vmem:[#allocation64_spill] sm:$0xff]  ;;  %v7736_v52 = vld [vmem:[#allocation65_spill] sm:$0xff] }
 0x524   :  { %2996 = vmatpush1.bf16.msra.mxu0 %v6797_v53  ;;  %3037 = vmatpush1.bf16.msra.mxu1 %v6799_v54  ;;  %v7737_v53 = vld [vmem:[#allocation66_spill] sm:$0xff]  ;;  %v7738_v54 = vld [vmem:[#allocation67_spill] sm:$0xff] }
 0x525   :  { %2997 = vmatprep.subr.bf16.mxu0 %v6803_v56  ;;  %3038 = vmatprep.subr.bf16.mxu1 %v6805_v60  ;;  %v7739_v56 = vld [vmem:[#allocation68_spill] sm:$0xff]  ;;  %v7740_v60 = vld [vmem:[#allocation69_spill] sm:$0xff] }
 0x528   :  { %2998 = vmatpush1.bf16.msra.mxu0 %v6809_v61  ;;  %3039 = vmatpush1.bf16.msra.mxu1 %v6811_v22  ;;  %v7741_v61 = vld [vmem:[#allocation70_spill] sm:$0xff]  ;;  %v7742_v22 = vld [vmem:[#allocation71_spill] sm:$0xff] }
 0x529   :  { %2999 = vmatprep.subr.bf16.mxu0 %v6815_v63  ;;  %3040 = vmatprep.subr.bf16.mxu1 %v6817_v2  ;;  %v7743_v63 = vld [vmem:[#allocation72_spill] sm:$0xff]  ;;  %v7744_v2 = vld [vmem:[#allocation73_spill] sm:$0xff] }
 0x52c   :  { %3000 = vmatpush1.bf16.msra.mxu0 %v6821_v5  ;;  %3041 = vmatpush1.bf16.msra.mxu1 %v6823_v6  ;;  %v7745_v5 = vld [vmem:[#allocation74_spill] sm:$0xff]  ;;  %v7746_v6 = vld [vmem:[#allocation75_spill] sm:$0xff] }
 0x52d   :  { %3121 = vmatprep.subr.bf16.mxu0 %v6831_v8  ;;  %3162 = vmatprep.subr.bf16.mxu1 %v6833_v9  ;;  %v7747_v8 = vld [vmem:[#allocation76_spill] sm:$0xff]  ;;  %v7748_v9 = vld [vmem:[#allocation77_spill] sm:$0xff] }
 0x52f   :  { %3018 = vmatmul.mubr.bf16.vlgmr.msra.gmra.mrb[24].mxu0 %v2862_v50  ;;  %3059 = vmatmul.mubr.bf16.vlgmr.msra.gmra.mrb[24].mxu1 %v2862_v50 }
 0x530   :  { %3122 = vmatpush1.bf16.msra.mxu0 %v6835_v10  ;;  %3163 = vmatpush1.bf16.msra.mxu1 %v6837_v12  ;;  %v7749_v10 = vld [vmem:[#allocation78_spill] sm:$0xff]  ;;  %v7750_v12 = vld [vmem:[#allocation79_spill] sm:$0xff] }
 0x531   :  { %3123 = vmatprep.subr.bf16.mxu0 %v6839_v34  ;;  %3164 = vmatprep.subr.bf16.mxu1 %v6841_v13  ;;  %v7751_v34 = vld [vmem:[#allocation80_spill] sm:$0xff]  ;;  %v7752_v13 = vld [vmem:[#allocation81_spill] sm:$0xff] }
 0x534   :  { %3124 = vmatpush1.bf16.msra.mxu0 %v6847_v14  ;;  %3165 = vmatpush1.bf16.msra.mxu1 %v6849_v15  ;;  %v7753_v14 = vld [vmem:[#allocation82_spill] sm:$0xff]  ;;  %v7754_v15 = vld [vmem:[#allocation83_spill] sm:$0xff] }
 0x535   :  { %3125 = vmatprep.subr.bf16.mxu0 %v7646_v62  ;;  %3166 = vmatprep.subr.bf16.mxu1 %v7647_v16  ;;  %v7756_v62 = vld [vmem:[#allocation85_spill] sm:$0xff]  ;;  %v7757_v16 = vld [vmem:[#allocation86_spill] sm:$0xff] }
 0x538   :  { %3126 = vmatpush1.bf16.msra.mxu0 %v7717_v3  ;;  %3167 = vmatpush1.bf16.msra.mxu1 %v7718_v7  ;;  %v7772_v3 = vld [vmem:[#allocation45_spill] sm:$0xff] }
 0x539   :  { %3127 = vmatprep.subr.bf16.mxu0 %v7719_v28  ;;  %3168 = vmatprep.subr.bf16.mxu1 %v7720_v46 }
 0x53c   :  { %3128 = vmatpush1.bf16.msra.mxu0 %v7721_v29  ;;  %3169 = vmatpush1.bf16.msra.mxu1 %v7722_v30 }
 0x53d   :  { %3129 = vmatprep.subr.bf16.mxu0 %v7723_v31  ;;  %3170 = vmatprep.subr.bf16.mxu1 %v7724_v32 }
 0x540   :  { %3130 = vmatpush1.bf16.msra.mxu0 %v7725_v33  ;;  %3171 = vmatpush1.bf16.msra.mxu1 %v7726_v35  ;;  %v7773_v33 = vld [vmem:[#allocation42_spill] sm:$0xff] }
 0x541   :  { %3131 = vmatprep.subr.bf16.mxu0 %v7727_v36  ;;  %3172 = vmatprep.subr.bf16.mxu1 %v7728_v37  ;;  %v7774_v37 = vld [vmem:[#allocation43_spill] sm:$0xff] }
 0x544   :  { %3132 = vmatpush1.bf16.msra.mxu0 %v7729_v38  ;;  %3173 = vmatpush1.bf16.msra.mxu1 %v7730_v39 }
 0x545   :  { %3133 = vmatprep.subr.bf16.mxu0 %v7731_v41  ;;  %3174 = vmatprep.subr.bf16.mxu1 %v7732_v11 }
 0x548   :  { %3134 = vmatpush1.bf16.msra.mxu0 %v7733_v45  ;;  %3175 = vmatpush1.bf16.msra.mxu1 %v7734_v4 }
 0x549   :  { %3135 = vmatprep.subr.bf16.mxu0 %v7735_v48  ;;  %3176 = vmatprep.subr.bf16.mxu1 %v7736_v52 }
 0x54c   :  { %3136 = vmatpush1.bf16.msra.mxu0 %v7737_v53  ;;  %3177 = vmatpush1.bf16.msra.mxu1 %v7738_v54 }
 0x54d   :  { %3137 = vmatprep.subr.bf16.mxu0 %v7739_v56  ;;  %3178 = vmatprep.subr.bf16.mxu1 %v7740_v60  ;;  %v7775_v60 = vld [vmem:[#allocation112_spill] sm:$0xff] }
 0x550   :  { %3138 = vmatpush1.bf16.msra.mxu0 %v7741_v61  ;;  %3179 = vmatpush1.bf16.msra.mxu1 %v7742_v22 }
 0x551   :  { %3139 = vmatprep.subr.bf16.mxu0 %v7743_v63  ;;  %3180 = vmatprep.subr.bf16.mxu1 %v7744_v2 }
 0x554   :  { %3140 = vmatpush1.bf16.msra.mxu0 %v7745_v5  ;;  %3181 = vmatpush1.bf16.msra.mxu1 %v7746_v6 }
 0x555   :  { %3141 = vmatprep.subr.bf16.mxu0 %v7747_v8  ;;  %3182 = vmatprep.subr.bf16.mxu1 %v7748_v9 }
 0x558   :  { %3142 = vmatpush1.bf16.msra.mxu0 %v7749_v10  ;;  %3183 = vmatpush1.bf16.msra.mxu1 %v7750_v12 }
 0x559   :  { %3143 = vmatprep.subr.bf16.mxu0 %v7751_v34  ;;  %3184 = vmatprep.subr.bf16.mxu1 %v7752_v13 }
 0x55c   :  { %3144 = vmatpush1.bf16.msra.mxu0 %v7753_v14  ;;  %3185 = vmatpush1.bf16.msra.mxu1 %v7754_v15  ;;  %v7776_v14 = vld [vmem:[#allocation104_spill] sm:$0xff] }
 0x55d   :  { %3145 = vmatprep.subr.bf16.mxu0 %v7755_v17  ;;  %3186 = vmatprep.subr.bf16.mxu1 %v7756_v62  ;;  %v7777_v17 = vld [vmem:[#allocation105_spill] sm:$0xff] }
 0x560   :  { %3146 = vmatpush1.bf16.msra.mxu0 %v7757_v16  ;;  %3187 = vmatpush1.bf16.msra.mxu1 %v7758_v51 }
 0x561   :  { %3147 = vmatprep.subr.bf16.mxu0 %v7759_v44  ;;  %3188 = vmatprep.subr.bf16.mxu1 %v7760_v18  ;;  %v7778_v44 = vld [vmem:[#allocation106_spill] sm:$0xff] }
 0x564   :  { %3148 = vmatpush1.bf16.msra.mxu0 %v7761_v49  ;;  %3189 = vmatpush1.bf16.msra.mxu1 %v7762_v24  ;;  %v7779_v49 = vld [vmem:[#allocation107_spill] sm:$0xff] }
 0x565   :  { %3149 = vmatprep.subr.bf16.mxu0 %v7763_v23  ;;  %3190 = vmatprep.subr.bf16.mxu1 %v7764_v59 }
 0x568   :  { %3150 = vmatpush1.bf16.msra.mxu0 %v7765_v25  ;;  %3191 = vmatpush1.bf16.msra.mxu1 %v7766_v26 }
 0x569   :  { %3151 = vmatprep.subr.bf16.mxu0 %v7767_v0  ;;  %3192 = vmatprep.subr.bf16.mxu1 %v7768_v1 }
 0x56c   :  { %3152 = vmatpush1.bf16.msra.mxu0 %v7769_v40  ;;  %3193 = vmatpush1.bf16.msra.mxu1 %v7770_v47 }
 0x56d   :  { %3240 = vmatprep.subr.bf16.mxu0 %v5758_v57  ;;  %3281 = vmatprep.subr.bf16.mxu1 %v5759_v42 }
 0x5e2   :  { %v2900_v19 = vpop.f32.mrb[20].mxu0  ;;  %v2941_v55 = vpop.f32.mrb[20].mxu1 }
 0x5e3   :  { %v2901_v43 = vadd.f32 %v2900_v19, %v7771_v20  ;;  %v2902_v21 = vpop.f32.mrb[21].mxu0  ;;  %v2943_v50 = vpop.f32.mrb[21].mxu1  ;;  %v2942_v38 = vadd.f32 %v2941_v55, %v7774_v37 }
 0x5e4   :  { %v2903_v7 = vadd.f32 %v2902_v21, %v7772_v3  ;;  %v2904_v28 = vpop.f32.mrb[22].mxu0  ;;  %v2945_v46 = vpop.f32.mrb[22].mxu1  ;;  %v2944_v35 = vadd.f32 %v2943_v50, %v7773_v33 }
 0x5e5   :  { %v4814_v29 = vmul.f32 -1.442695, %v2901_v43  ;;  %v2905_v30 = vpop.f32.mrb[23].mxu0  ;;  %v2946_v31 = vpop.f32.mrb[23].mxu1  ;;  %v3103_v28 = vrot.slane %v7200_v27, 6 }
 0x5e6   :  { %v4815_v32 = vmul.f32 -1.442695, %v2903_v7  ;;  %v4816_v36 = vmul.f32 -1.442695, %v2944_v35  ;;  %v5760_v27 = vld [vmem:[#allocation20] ss:$16 sps:$4 sm:$0xff]  }
 0x5e7   :  { %5678 = vpow2.f32 %v4814_v29 }
 0x5e8   :  { %5680 = vpow2.f32 %v4815_v32 }
 0x5e9   :  { %5682 = vpow2.f32 %v4816_v36 }
 0x5ea   :  { %5684 = vtanh.f32 %v2942_v38 }
 0x5f1   :  { %v5679_v39 = vpop.eup %5678 }
 0x5f2   :  { %v5681_v41 = vpop.eup %5680  ;;  %v2951_v11 = vadd.f32 1.0, %v5679_v39 }
 0x5f3   :  { %v2957_v45 = vadd.f32 1.0, %v5681_v41  ;;  %v5683_v4 = vpop.eup %5682 }
 0x5f4   :  { %5686 = vrcp.f32 %v2951_v11  ;;  %v5685_v48 = vpop.eup %5684  ;;  %v2964_v56 = vadd.f32 1.0, %v5683_v4  ;;  %v5761_v11 = vld [vmem:[#allocation20 + $0x8] ss:$16 sps:$4 sm:$0xff]   ;;  %v5763_v4 = vld [vmem:[#allocation20 + $0x2c] ss:$16 sps:$4 sm:$0xff]  }
 0x5f5   :  { %5688 = vrcp.f32 %v2957_v45  ;;  %v5762_v45 = vld [vmem:[#allocation20 + $0x24] ss:$16 sps:$4 sm:$0xff]  }
 0x5f6   :  { %5690 = vrcp.f32 %v2964_v56  ;;  %v5768_v56 = vld [vmem:[#allocation20 + $0x40] ss:$16 sps:$4 sm:$0xff]  }
 0x5fe   :  { %v5687_v52 = vpop.eup %5686 }
 0x5ff   :  { %v5689_v53 = vpop.eup %5688  ;;  %v2968_v54 = vmul.f32 %v5687_v52, %v5685_v48  ;;  %v5764_v48 = vld [vmem:[#allocation20 + $0x20] ss:$16 sps:$4 sm:$0xff]   ;;  %v5765_v52 = vld [vmem:[#allocation20 + $0x28] ss:$16 sps:$4 sm:$0xff]  }
 0x600   :  { %v2967_v61 = vmul.f32 %v5689_v53, %v7775_v60  ;;  %v5691_v25 = vpop.eup %5690  ;;  %v5766_v53 = vld [vmem:[#allocation20 + $0x44] ss:$16 sps:$4 sm:$0xff]   ;;  %v5769_v60 = vld [vmem:[#allocation20 + $0x48] ss:$16 sps:$4 sm:$0xff]  }
 0x602   :  { %v7304_v22 = vadd.f32 %v2968_v54, %v2967_v61  ;;  %v3019_v63 = vpop.f32.mrb[24].mxu0  ;;  %v3060_v2 = vpop.f32.mrb[24].mxu1  ;;  %v5767_v54 = vld [vmem:[#allocation20 + $0x4c] ss:$16 sps:$4 sm:$0xff]   ;;  %v5770_v61 = vld [vmem:[#allocation20 + $0x64] ss:$16 sps:$4 sm:$0xff]  }
 0x603   :  { %v3071_v5 = vrot.slane %v3019_v63, 4  ;;  %v3073_v6 = vrot.slane %v3060_v2, 4  ;;  %v3021_v8 = vpop.f32.mrb[25].mxu0  ;;  %v3062_v9 = vpop.f32.mrb[25].mxu1  ;;  %v5771_v63 = vld [vmem:[#allocation20 + $0x6c] ss:$16 sps:$4 sm:$0xff]  }
 0x604   :  { %v3072_v10 = vrot.slane %v3021_v8, 4  ;;  %v3074_v12 = vrot.slane %v3062_v9, 4  ;;  %v3023_v34 = vpop.f32.mrb[26].mxu0  ;;  %v3064_v13 = vpop.f32.mrb[26].mxu1  ;;  %5692 = vtanh.f32 %v7304_v22  ;;  %v5772_v2 = vld [vmem:[#allocation20 + $0x60] ss:$16 sps:$4 sm:$0xff]  }
 0x605   :  { %v3079_v15 = vadd.f32 %v3071_v5, %v7776_v14  ;;  %v3081_v62 = vadd.f32 %v3073_v6, %v7777_v17  ;;  %v3024_v16 = vpop.f32.mrb[27].mxu0  ;;  %v3065_v51 = vpop.f32.mrb[27].mxu1  ;;  %v5773_v5 = vld [vmem:[#allocation20 + $0x68] ss:$16 sps:$4 sm:$0xff]   ;;  %v5775_v6 = vld [vmem:[#allocation20 + $0x8c] ss:$16 sps:$4 sm:$0xff]  }
 0x606   :  { %v3080_v18 = vadd.f32 %v3072_v10, %v7778_v44  ;;  %v3082_v24 = vadd.f32 %v3074_v12, %v7779_v49  ;;  %v5776_v8 = vld [vmem:[#allocation20 + $0x80] ss:$16 sps:$4 sm:$0xff]   ;;  %v5777_v9 = vld [vmem:[#allocation20 + $0x88] ss:$16 sps:$4 sm:$0xff]   ;;  %v5778_v10 = vld [vmem:[#allocation20 + $0xa4] ss:$16 sps:$4 sm:$0xff]  }
 0x607   :  { %v4817_v23 = vmul.f32 -1.442695, %v3079_v15  ;;  %v5779_v12 = vld [vmem:[#allocation20 + $0xac] ss:$16 sps:$4 sm:$0xff]   ;;  %v5780_v34 = vld [vmem:[#allocation20 + $0xa0] ss:$16 sps:$4 sm:$0xff]  }
 0x608   :  { %v4818_v59 = vmul.f32 -1.442695, %v3080_v18  ;;  %v4819_v1 = vmul.f32 -1.442695, %v3082_v24  ;;  %v5781_v13 = vld [vmem:[#allocation20 + $0xa8] ss:$16 sps:$4 sm:$0xff]  }
 0x609   :  { %5694 = vpow2.f32 %v4817_v23  ;;  %v5782_v14 = vld [vmem:[#allocation20 + $0xc4] ss:$16 sps:$4 sm:$0xff]   ;;  %v5783_v15 = vld [vmem:[#allocation20 + $0xcc] ss:$16 sps:$4 sm:$0xff]   ;;  %v5784_v17 = vld [vmem:[#allocation20 + $0xc0] ss:$16 sps:$4 sm:$0xff]  }
 0x60a   :  { %5696 = vpow2.f32 %v4818_v59  ;;  %v5786_v16 = vld [vmem:[#allocation20 + $0xe4] ss:$16 sps:$4 sm:$0xff]   ;;  %v5787_v51 = vld [vmem:[#allocation20 + $0xec] ss:$16 sps:$4 sm:$0xff]   ;;  %v5788_v44 = vld [vmem:[#allocation20 + $0xe0] ss:$16 sps:$4 sm:$0xff]  }
 0x60b   :  { %5698 = vpow2.f32 %v4819_v1  ;;  %v5789_v18 = vld [vmem:[#allocation20 + $0xe8] ss:$16 sps:$4 sm:$0xff]   ;;  %v5790_v49 = vld [vmem:[#allocation21 + $0x4] ss:$16 sps:$4 sm:$0xff]   ;;  %v5791_v24 = vld [vmem:[#allocation21 + $0xc] ss:$16 sps:$4 sm:$0xff]  }
 0x60c   :  { %5700 = vtanh.f32 %v3081_v62  ;;  %v5785_v62 = vld [vmem:[#allocation20 + $0xc8] ss:$16 sps:$4 sm:$0xff]   ;;  %v5792_v23 = vld [vmem:[#allocation21] ss:$16 sps:$4 sm:$0xff]  }
 0x60d   :  { %v5793_v59 = vld [vmem:[#allocation21 + $0x8] ss:$16 sps:$4 sm:$0xff]  }
 0x60e   :  { %v5693_v26 = vpop.eup %5692  ;;  %v5797_v1 = vld [vmem:[#allocation21 + $0x28] ss:$16 sps:$4 sm:$0xff]  }
 0x60f   :  { %v2971_v0 = vmul.f32 %v5693_v26, %v5691_v25  ;;  %v5794_v25 = vld [vmem:[#allocation21 + $0x24] ss:$16 sps:$4 sm:$0xff]   ;;  %v5795_v26 = vld [vmem:[#allocation21 + $0x2c] ss:$16 sps:$4 sm:$0xff]  }
 0x611   :  { %2972 = vst [vmem:[#allocation2 + $0x2] sm:$0x3] %v2971_v0  ;;  %v3111_v40 = vrot.slane %v2971_v0, 4  ;;  %v5796_v0 = vld [vmem:[#allocation21 + $0x20] ss:$16 sps:$4 sm:$0xff]  }
 0x613   :  { %v5695_v47 = vpop.eup %5694  ;;  %v3114_v57 = vpack.c.bf16 %v3111_v40, %v3111_v40  ;;  %v5798_v40 = vld [vmem:[#allocation21 + $0x44] ss:$16 sps:$4 sm:$0xff]  }
 0x614   :  { %v5697_v42 = vpop.eup %5696  ;;  %v3086_v19 = vadd.f32 1.0, %v5695_v47  ;;  %v5799_v47 = vld [vmem:[#allocation21 + $0x4c] ss:$16 sps:$4 sm:$0xff]  }
 0x615   :  { %v3092_v55 = vadd.f32 1.0, %v5697_v42  ;;  %v3118_v43 = vrot.slane %v3114_v57, 2  ;;  %v5699_v21 = vpop.eup %5698  ;;  %v5800_v57 = vld [vmem:[#allocation21 + $0x40] ss:$16 sps:$4 sm:$0xff]   ;;  %v5801_v42 = vld [vmem:[#allocation21 + $0x48] ss:$16 sps:$4 sm:$0xff]  }
 0x616   :  { %5702 = vrcp.f32 %v3086_v19  ;;  %v5701_v50 = vpop.eup %5700  ;;  %v3099_v30 = vadd.f32 1.0, %v5699_v21  ;;  %v5802_v19 = vld [vmem:[#allocation21 + $0x64] ss:$16 sps:$4 sm:$0xff]   ;;  %v5805_v21 = vld [vmem:[#allocation21 + $0x68] ss:$16 sps:$4 sm:$0xff]  }
 0x617   :  { %5704 = vrcp.f32 %v3092_v55  ;;  %3153 = vmatprep.mubr.bf16.mxu0 %v3118_v43  ;;  %3194 = vmatprep.mubr.bf16.mxu1 %v3118_v43  ;;  %v5803_v55 = vld [vmem:[#allocation21 + $0x6c] ss:$16 sps:$4 sm:$0xff]   ;;  %v5804_v43 = vld [vmem:[#allocation21 + $0x60] ss:$16 sps:$4 sm:$0xff]  }
 0x618   :  { %5706 = vrcp.f32 %v3099_v30  ;;  %v5811_v30 = vld [vmem:[#allocation21 + $0xac] ss:$16 sps:$4 sm:$0xff]  }
 0x620   :  { %v5703_v7 = vpop.eup %5702 }
 0x621   :  { %v5705_v46 = vpop.eup %5704  ;;  %v3106_v29 = vmul.f32 %v5703_v7, %v5701_v50  ;;  %v5806_v50 = vld [vmem:[#allocation21 + $0x84] ss:$16 sps:$4 sm:$0xff]   ;;  %v5807_v7 = vld [vmem:[#allocation21 + $0x8c] ss:$16 sps:$4 sm:$0xff]  }
 0x622   :  { %v3105_v31 = vmul.f32 %v5705_v46, %v3103_v28  ;;  %v5707_v35 = vpop.eup %5706  ;;  %v5808_v28 = vld [vmem:[#allocation21 + $0x80] ss:$16 sps:$4 sm:$0xff]   ;;  %v5809_v46 = vld [vmem:[#allocation21 + $0x88] ss:$16 sps:$4 sm:$0xff]  }
 0x624   :  { %v7312_v32 = vadd.f32 %v3106_v29, %v3105_v31  ;;  %v5810_v29 = vld [vmem:[#allocation21 + $0xa4] ss:$16 sps:$4 sm:$0xff]   ;;  %v5812_v31 = vld [vmem:[#allocation21 + $0xa0] ss:$16 sps:$4 sm:$0xff]  }
 0x626   :  { %5708 = vtanh.f32 %v7312_v32 }
 0x630   :  { %v5709_v36 = vpop.eup %5708 }
 0x631   :  { %v3109_v38 = vmul.f32 %v5709_v36, %v5707_v35  ;;  %v5813_v35 = vld [vmem:[#allocation21 + $0xa8] ss:$16 sps:$4 sm:$0xff]   ;;  %v5814_v36 = vld [vmem:[#allocation21 + $0xc4] ss:$16 sps:$4 sm:$0xff]  }
 0x633   :  { %v3113_v39 = vpack.c.bf16 %v3109_v38, %v3109_v38  ;;  %v5815_v38 = vld [vmem:[#allocation21 + $0xcc] ss:$16 sps:$4 sm:$0xff]  }
 0x635   :  { %v7315_v41 = vrot.slane %v3113_v39, 2  ;;  %v5816_v39 = vld [vmem:[#allocation21 + $0xc0] ss:$16 sps:$4 sm:$0xff]  }
 0x637   :  { %3154 = vmatmul.mubr.bf16.vlgmr.msra.gmra.mrb[28].mxu0 %v7315_v41  ;;  %3195 = vmatmul.mubr.bf16.vlgmr.msra.gmra.mrb[28].mxu1 %v7315_v41 }
 0x638   :  { %3241 = vmatpush1.bf16.msra.mxu0 %v5760_v27  ;;  %3282 = vmatpush1.bf16.msra.mxu1 %v5761_v11  ;;  %v5818_v27 = vld [vmem:[#allocation21 + $0xe4] ss:$16 sps:$4 sm:$0xff]   ;;  %v5819_v11 = vld [vmem:[#allocation21 + $0xec] ss:$16 sps:$4 sm:$0xff]  }
 0x639   :  { %3242 = vmatprep.subr.bf16.mxu0 %v5762_v45  ;;  %3283 = vmatprep.subr.bf16.mxu1 %v5763_v4  ;;  %v5820_v45 = vld [vmem:[#allocation21 + $0xe0] ss:$16 sps:$4 sm:$0xff]   ;;  %v5821_v4 = vld [vmem:[#allocation21 + $0xe8] ss:$16 sps:$4 sm:$0xff]  }
 0x63a   :  { %3272 = vmatprep.mubr.bf16.mxu0 %v7645_v58  ;;  %3313 = vmatprep.mubr.bf16.mxu1 %v7645_v58  ;;  %v5774_v58 = vld [vmem:[#allocation20 + $0x84] ss:$16 sps:$4 sm:$0xff]  }
 0x63c   :  { %3243 = vmatpush1.bf16.msra.mxu0 %v5764_v48  ;;  %3284 = vmatpush1.bf16.msra.mxu1 %v5765_v52  ;;  %v5822_v48 = vld [vmem:[#allocation21 + $0x104] ss:$16 sps:$4 sm:$0xff]   ;;  %v5823_v52 = vld [vmem:[#allocation21 + $0x10c] ss:$16 sps:$4 sm:$0xff]  }
 0x63d   :  { %3244 = vmatprep.subr.bf16.mxu0 %v5766_v53  ;;  %3285 = vmatprep.subr.bf16.mxu1 %v5767_v54  ;;  %v5824_v53 = vld [vmem:[#allocation21 + $0x100] ss:$16 sps:$4 sm:$0xff]   ;;  %v5825_v54 = vld [vmem:[#allocation21 + $0x108] ss:$16 sps:$4 sm:$0xff]  }
 0x640   :  { %3245 = vmatpush1.bf16.msra.mxu0 %v5768_v56  ;;  %3286 = vmatpush1.bf16.msra.mxu1 %v5769_v60  ;;  %v5826_v56 = vld [vmem:[#allocation21 + $0x124] ss:$16 sps:$4 sm:$0xff]   ;;  %v5827_v60 = vld [vmem:[#allocation21 + $0x12c] ss:$16 sps:$4 sm:$0xff]  }
 0x641   :  { %3246 = vmatprep.subr.bf16.mxu0 %v5770_v61  ;;  %3287 = vmatprep.subr.bf16.mxu1 %v5771_v63  ;;  %v5828_v61 = vld [vmem:[#allocation21 + $0x120] ss:$16 sps:$4 sm:$0xff]   ;;  %v5829_v63 = vld [vmem:[#allocation21 + $0x128] ss:$16 sps:$4 sm:$0xff]  }
 0x644   :  { %3247 = vmatpush1.bf16.msra.mxu0 %v5772_v2  ;;  %3288 = vmatpush1.bf16.msra.mxu1 %v5773_v5  ;;  %v5830_v2 = vld [vmem:[#allocation21 + $0x144] ss:$16 sps:$4 sm:$0xff]   ;;  %v5831_v5 = vld [vmem:[#allocation21 + $0x14c] ss:$16 sps:$4 sm:$0xff]  }
 0x645   :  { %3248 = vmatprep.subr.bf16.mxu0 %v5774_v58  ;;  %3289 = vmatprep.subr.bf16.mxu1 %v5775_v6  ;;  %v5832_v58 = vld [vmem:[#allocation21 + $0x140] ss:$16 sps:$4 sm:$0xff]   ;;  %v5833_v6 = vld [vmem:[#allocation21 + $0x148] ss:$16 sps:$4 sm:$0xff]  }
 0x648   :  { %3249 = vmatpush1.bf16.msra.mxu0 %v5776_v8  ;;  %3290 = vmatpush1.bf16.msra.mxu1 %v5777_v9  ;;  %v5834_v8 = vld [vmem:[#allocation21 + $0x164] ss:$16 sps:$4 sm:$0xff]   ;;  %v5835_v9 = vld [vmem:[#allocation21 + $0x16c] ss:$16 sps:$4 sm:$0xff]  }
 0x649   :  { %3250 = vmatprep.subr.bf16.mxu0 %v5778_v10  ;;  %3291 = vmatprep.subr.bf16.mxu1 %v5779_v12  ;;  %v5836_v10 = vld [vmem:[#allocation21 + $0x160] ss:$16 sps:$4 sm:$0xff]   ;;  %v5837_v12 = vld [vmem:[#allocation21 + $0x168] ss:$16 sps:$4 sm:$0xff]  }
 0x64c   :  { %3251 = vmatpush1.bf16.msra.mxu0 %v5780_v34  ;;  %3292 = vmatpush1.bf16.msra.mxu1 %v5781_v13  ;;  %v5838_v34 = vld [vmem:[#allocation21 + $0x184] ss:$16 sps:$4 sm:$0xff]   ;;  %v5839_v13 = vld [vmem:[#allocation21 + $0x18c] ss:$16 sps:$4 sm:$0xff]  }
 0x64d   :  { %3252 = vmatprep.subr.bf16.mxu0 %v5782_v14  ;;  %3293 = vmatprep.subr.bf16.mxu1 %v5783_v15  ;;  %v5840_v14 = vld [vmem:[#allocation21 + $0x180] ss:$16 sps:$4 sm:$0xff]   ;;  %v5841_v15 = vld [vmem:[#allocation21 + $0x188] ss:$16 sps:$4 sm:$0xff]  }
 0x650   :  { %3253 = vmatpush1.bf16.msra.mxu0 %v5784_v17  ;;  %3294 = vmatpush1.bf16.msra.mxu1 %v5785_v62  ;;  %v5842_v17 = vld [vmem:[#allocation21 + $0x1a4] ss:$16 sps:$4 sm:$0xff]   ;;  %v5843_v62 = vld [vmem:[#allocation21 + $0x1ac] ss:$16 sps:$4 sm:$0xff]  }
 0x651   :  { %3254 = vmatprep.subr.bf16.mxu0 %v5786_v16  ;;  %3295 = vmatprep.subr.bf16.mxu1 %v5787_v51  ;;  %v5844_v16 = vld [vmem:[#allocation21 + $0x1a0] ss:$16 sps:$4 sm:$0xff]   ;;  %v5845_v51 = vld [vmem:[#allocation21 + $0x1a8] ss:$16 sps:$4 sm:$0xff]  }
 0x654   :  { %3255 = vmatpush1.bf16.msra.mxu0 %v5788_v44  ;;  %3296 = vmatpush1.bf16.msra.mxu1 %v5789_v18  ;;  %v5846_v44 = vld [vmem:[#allocation21 + $0x1c4] ss:$16 sps:$4 sm:$0xff]   ;;  %v5847_v18 = vld [vmem:[#allocation21 + $0x1cc] ss:$16 sps:$4 sm:$0xff]  }
 0x655   :  { %3376 = vmatprep.subr.bf16.mxu0 %v5790_v49  ;;  %3417 = vmatprep.subr.bf16.mxu1 %v5791_v24  ;;  %v5848_v49 = vld [vmem:[#allocation21 + $0x1c0] ss:$16 sps:$4 sm:$0xff]   ;;  %v5849_v24 = vld [vmem:[#allocation21 + $0x1c8] ss:$16 sps:$4 sm:$0xff]  }
 0x657   :  { %3273 = vmatmul.mubr.bf16.vlgmr.msra.gmra.mrb[32].mxu0 %v7315_v41  ;;  %3314 = vmatmul.mubr.bf16.vlgmr.msra.gmra.mrb[32].mxu1 %v7315_v41  ;;  %v5817_v41 = vld [vmem:[#allocation21 + $0xc8] ss:$16 sps:$4 sm:$0xff]  }
 0x658   :  { %3377 = vmatpush1.bf16.msra.mxu0 %v5792_v23  ;;  %3418 = vmatpush1.bf16.msra.mxu1 %v5793_v59  ;;  %v5850_v23 = vld [vmem:[#allocation21 + $0x1e4] ss:$16 sps:$4 sm:$0xff]   ;;  %v5851_v59 = vld [vmem:[#allocation21 + $0x1ec] ss:$16 sps:$4 sm:$0xff]  }
 0x659   :  { %3378 = vmatprep.subr.bf16.mxu0 %v5794_v25  ;;  %3419 = vmatprep.subr.bf16.mxu1 %v5795_v26  ;;  %v5852_v25 = vld [vmem:[#allocation21 + $0x1e0] ss:$16 sps:$4 sm:$0xff]   ;;  %v5853_v26 = vld [vmem:[#allocation21 + $0x1e8] ss:$16 sps:$4 sm:$0xff]  }
 0x65c   :  { %3379 = vmatpush1.bf16.msra.mxu0 %v5796_v0  ;;  %3420 = vmatpush1.bf16.msra.mxu1 %v5797_v1  ;;  %v5439_v0 = vld [vmem:[#allocation23 + $0x4] ss:$16 sps:$4 sm:$0xff]   ;;  %v5442_v1 = vld [vmem:[#allocation23 + $0xc] ss:$16 sps:$4 sm:$0xff]  }
 0x65d   :  { %3380 = vmatprep.subr.bf16.mxu0 %v5798_v40  ;;  %3421 = vmatprep.subr.bf16.mxu1 %v5799_v47 }
 0x660   :  { %3381 = vmatpush1.bf16.msra.mxu0 %v5800_v57  ;;  %3422 = vmatpush1.bf16.msra.mxu1 %v5801_v42 }
 0x661   :  { %3382 = vmatprep.subr.bf16.mxu0 %v5802_v19  ;;  %3423 = vmatprep.subr.bf16.mxu1 %v5803_v55 }
 0x664   :  { %3383 = vmatpush1.bf16.msra.mxu0 %v5804_v43  ;;  %3424 = vmatpush1.bf16.msra.mxu1 %v5805_v21 }
 0x665   :  { %3384 = vmatprep.subr.bf16.mxu0 %v5806_v50  ;;  %3425 = vmatprep.subr.bf16.mxu1 %v5807_v7 }
 0x668   :  { %3385 = vmatpush1.bf16.msra.mxu0 %v5808_v28  ;;  %3426 = vmatpush1.bf16.msra.mxu1 %v5809_v46 }
 0x669   :  { %3386 = vmatprep.subr.bf16.mxu0 %v5810_v29  ;;  %3427 = vmatprep.subr.bf16.mxu1 %v5811_v30 }
 0x66c   :  { %3387 = vmatpush1.bf16.msra.mxu0 %v5812_v31  ;;  %3428 = vmatpush1.bf16.msra.mxu1 %v5813_v35 }
 0x66d   :  { %3388 = vmatprep.subr.bf16.mxu0 %v5814_v36  ;;  %3429 = vmatprep.subr.bf16.mxu1 %v5815_v38 }
 0x670   :  { %3389 = vmatpush1.bf16.msra.mxu0 %v5816_v39  ;;  %3430 = vmatpush1.bf16.msra.mxu1 %v5817_v41 }
 0x671   :  { %3390 = vmatprep.subr.bf16.mxu0 %v5818_v27  ;;  %3431 = vmatprep.subr.bf16.mxu1 %v5819_v11 }
 0x674   :  { %3391 = vmatpush1.bf16.msra.mxu0 %v5820_v45  ;;  %3432 = vmatpush1.bf16.msra.mxu1 %v5821_v4 }
 0x675   :  { %3392 = vmatprep.subr.bf16.mxu0 %v5822_v48  ;;  %3433 = vmatprep.subr.bf16.mxu1 %v5823_v52 }
 0x678   :  { %3393 = vmatpush1.bf16.msra.mxu0 %v5824_v53  ;;  %3434 = vmatpush1.bf16.msra.mxu1 %v5825_v54 }
 0x679   :  { %3394 = vmatprep.subr.bf16.mxu0 %v5826_v56  ;;  %3435 = vmatprep.subr.bf16.mxu1 %v5827_v60 }
 0x67c   :  { %3395 = vmatpush1.bf16.msra.mxu0 %v5828_v61  ;;  %3436 = vmatpush1.bf16.msra.mxu1 %v5829_v63 }
 0x67d   :  { %3396 = vmatprep.subr.bf16.mxu0 %v5830_v2  ;;  %3437 = vmatprep.subr.bf16.mxu1 %v5831_v5 }
 0x680   :  { %3397 = vmatpush1.bf16.msra.mxu0 %v5832_v58  ;;  %3438 = vmatpush1.bf16.msra.mxu1 %v5833_v6 }
 0x681   :  { %3398 = vmatprep.subr.bf16.mxu0 %v5834_v8  ;;  %3439 = vmatprep.subr.bf16.mxu1 %v5835_v9  ;;  %v7780_v9 = vld [vmem:[#allocation108_spill] sm:$0xff] }
 0x684   :  { %3399 = vmatpush1.bf16.msra.mxu0 %v5836_v10  ;;  %3440 = vmatpush1.bf16.msra.mxu1 %v5837_v12  ;;  %v7781_v12 = vld [vmem:[#allocation109_spill] sm:$0xff] }
 0x685   :  { %3400 = vmatprep.subr.bf16.mxu0 %v5838_v34  ;;  %3441 = vmatprep.subr.bf16.mxu1 %v5839_v13 }
 0x688   :  { %3401 = vmatpush1.bf16.msra.mxu0 %v5840_v14  ;;  %3442 = vmatpush1.bf16.msra.mxu1 %v5841_v15  ;;  %v7782_v14 = vld [vmem:[#allocation110_spill] sm:$0xff] }
 0x689   :  { %3402 = vmatprep.subr.bf16.mxu0 %v5842_v17  ;;  %3443 = vmatprep.subr.bf16.mxu1 %v5843_v62  ;;  %v7783_v17 = vld [vmem:[#allocation111_spill] sm:$0xff] }
 0x68c   :  { %3403 = vmatpush1.bf16.msra.mxu0 %v5844_v16  ;;  %3444 = vmatpush1.bf16.msra.mxu1 %v5845_v51 }
 0x68d   :  { %3404 = vmatprep.subr.bf16.mxu0 %v5846_v44  ;;  %3445 = vmatprep.subr.bf16.mxu1 %v5847_v18 }
 0x690   :  { %3405 = vmatpush1.bf16.msra.mxu0 %v5848_v49  ;;  %3446 = vmatpush1.bf16.msra.mxu1 %v5849_v24 }
 0x691   :  { %3406 = vmatprep.subr.bf16.mxu0 %v5850_v23  ;;  %3447 = vmatprep.subr.bf16.mxu1 %v5851_v59 }
 0x694   :  { %3407 = vmatpush1.bf16.msra.mxu0 %v5852_v25  ;;  %3448 = vmatpush1.bf16.msra.mxu1 %v5853_v26 }
 0x695   :  { %4300 = vmatprep.subr.bf16.mxu0 %v5439_v0  ;;  %4382 = vmatprep.subr.bf16.mxu1 %v5442_v1 }
 0x70a   :  { %v3155_v40 = vpop.f32.mrb[28].mxu0  ;;  %v3196_v47 = vpop.f32.mrb[28].mxu1 }
 0x70b   :  { %v3156_v57 = vadd.f32 %v3155_v40, %v7771_v20  ;;  %v3157_v42 = vpop.f32.mrb[29].mxu0  ;;  %v3198_v19 = vpop.f32.mrb[29].mxu1  ;;  %v3197_v31 = vadd.f32 %v3196_v47, %v7774_v37 }
 0x70c   :  { %v3158_v55 = vadd.f32 %v3157_v42, %v7772_v3  ;;  %v3159_v43 = vpop.f32.mrb[30].mxu0  ;;  %v3200_v21 = vpop.f32.mrb[30].mxu1  ;;  %v3199_v29 = vadd.f32 %v3198_v19, %v7773_v33  ;;  %v3358_v19 = vrot.slane %v7312_v32, 6  ;;  %v5445_v32 = vld [vmem:[#allocation23 + $0x24] ss:$16 sps:$4 sm:$0xff]  }
 0x70d   :  { %v4820_v50 = vmul.f32 -1.442695, %v3156_v57  ;;  %v3160_v7 = vpop.f32.mrb[31].mxu0  ;;  %v3201_v28 = vpop.f32.mrb[31].mxu1 }
 0x70e   :  { %v4821_v46 = vmul.f32 -1.442695, %v3158_v55  ;;  %v4822_v30 = vmul.f32 -1.442695, %v3199_v29 }
 0x70f   :  { %5710 = vpow2.f32 %v4820_v50 }
 0x710   :  { %5712 = vpow2.f32 %v4821_v46 }
 0x711   :  { %5714 = vpow2.f32 %v4822_v30 }
 0x712   :  { %5716 = vtanh.f32 %v3197_v31  ;;  %v5437_v31 = vld [vmem:[#allocation23] ss:$16 sps:$4 sm:$0xff]  }
 0x719   :  { %v5711_v35 = vpop.eup %5710 }
 0x71a   :  { %v5713_v36 = vpop.eup %5712  ;;  %v3206_v38 = vadd.f32 1.0, %v5711_v35  ;;  %v5440_v35 = vld [vmem:[#allocation23 + $0x8] ss:$16 sps:$4 sm:$0xff]  }
 0x71b   :  { %v3212_v39 = vadd.f32 1.0, %v5713_v36  ;;  %v5715_v41 = vpop.eup %5714 }
 0x71c   :  { %5718 = vrcp.f32 %v3206_v38  ;;  %v5717_v27 = vpop.eup %5716  ;;  %v3219_v48 = vadd.f32 1.0, %v5715_v41  ;;  %v5448_v38 = vld [vmem:[#allocation23 + $0x2c] ss:$16 sps:$4 sm:$0xff]   ;;  %v5446_v41 = vld [vmem:[#allocation23 + $0x28] ss:$16 sps:$4 sm:$0xff]  }
 0x71d   :  { %5720 = vrcp.f32 %v3212_v39  ;;  %v5443_v39 = vld [vmem:[#allocation23 + $0x20] ss:$16 sps:$4 sm:$0xff]  }
 0x71e   :  { %5722 = vrcp.f32 %v3219_v48  ;;  %v5457_v48 = vld [vmem:[#allocation23 + $0x64] ss:$16 sps:$4 sm:$0xff]  }
 0x726   :  { %v5719_v11 = vpop.eup %5718 }
 0x727   :  { %v5721_v45 = vpop.eup %5720  ;;  %v3223_v4 = vmul.f32 %v5719_v11, %v5717_v27  ;;  %v5451_v27 = vld [vmem:[#allocation23 + $0x44] ss:$16 sps:$4 sm:$0xff]   ;;  %v5454_v11 = vld [vmem:[#allocation23 + $0x4c] ss:$16 sps:$4 sm:$0xff]  }
 0x728   :  { %v3222_v52 = vmul.f32 %v5721_v45, %v7304_v22  ;;  %v5723_v44 = vpop.eup %5722  ;;  %v5449_v45 = vld [vmem:[#allocation23 + $0x40] ss:$16 sps:$4 sm:$0xff]  }
 0x72a   :  { %v7328_v53 = vadd.f32 %v3223_v4, %v3222_v52  ;;  %v3274_v54 = vpop.f32.mrb[32].mxu0  ;;  %v3315_v56 = vpop.f32.mrb[32].mxu1  ;;  %v5452_v4 = vld [vmem:[#allocation23 + $0x48] ss:$16 sps:$4 sm:$0xff]   ;;  %v5460_v52 = vld [vmem:[#allocation23 + $0x6c] ss:$16 sps:$4 sm:$0xff]  }
 0x72b   :  { %v3326_v60 = vrot.slane %v3274_v54, 2  ;;  %v3328_v61 = vrot.slane %v3315_v56, 2  ;;  %v3276_v63 = vpop.f32.mrb[33].mxu0  ;;  %v3317_v2 = vpop.f32.mrb[33].mxu1  ;;  %v5455_v54 = vld [vmem:[#allocation23 + $0x60] ss:$16 sps:$4 sm:$0xff]  }
 0x72c   :  { %v3327_v5 = vrot.slane %v3276_v63, 2  ;;  %v3329_v58 = vrot.slane %v3317_v2, 2  ;;  %v3278_v6 = vpop.f32.mrb[34].mxu0  ;;  %v3319_v8 = vpop.f32.mrb[34].mxu1  ;;  %5724 = vtanh.f32 %v7328_v53  ;;  %v5458_v56 = vld [vmem:[#allocation23 + $0x68] ss:$16 sps:$4 sm:$0xff]  }
 0x72d   :  { %v3334_v10 = vadd.f32 %v3326_v60, %v7780_v9  ;;  %v3336_v34 = vadd.f32 %v3328_v61, %v7781_v12  ;;  %v3279_v22 = vpop.f32.mrb[35].mxu0  ;;  %v3320_v13 = vpop.f32.mrb[35].mxu1  ;;  %v5463_v60 = vld [vmem:[#allocation23 + $0x84] ss:$16 sps:$4 sm:$0xff]   ;;  %v5466_v61 = vld [vmem:[#allocation23 + $0x8c] ss:$16 sps:$4 sm:$0xff]  }
 0x72e   :  { %v3335_v15 = vadd.f32 %v3327_v5, %v7782_v14  ;;  %v3337_v62 = vadd.f32 %v3329_v58, %v7783_v17  ;;  %v5461_v63 = vld [vmem:[#allocation23 + $0x80] ss:$16 sps:$4 sm:$0xff]   ;;  %v5464_v2 = vld [vmem:[#allocation23 + $0x88] ss:$16 sps:$4 sm:$0xff]   ;;  %v5469_v5 = vld [vmem:[#allocation23 + $0xa4] ss:$16 sps:$4 sm:$0xff]  }
 0x72f   :  { %v4823_v16 = vmul.f32 -1.442695, %v3334_v10  ;;  %v5472_v58 = vld [vmem:[#allocation23 + $0xac] ss:$16 sps:$4 sm:$0xff]   ;;  %v5467_v6 = vld [vmem:[#allocation23 + $0xa0] ss:$16 sps:$4 sm:$0xff]  }
 0x730   :  { %v4824_v51 = vmul.f32 -1.442695, %v3335_v15  ;;  %v4825_v24 = vmul.f32 -1.442695, %v3337_v62  ;;  %v5470_v8 = vld [vmem:[#allocation23 + $0xa8] ss:$16 sps:$4 sm:$0xff]  }
 0x731   :  { %5726 = vpow2.f32 %v4823_v16  ;;  %v5475_v9 = vld [vmem:[#allocation23 + $0xc4] ss:$16 sps:$4 sm:$0xff]   ;;  %v5478_v10 = vld [vmem:[#allocation23 + $0xcc] ss:$16 sps:$4 sm:$0xff]   ;;  %v5473_v12 = vld [vmem:[#allocation23 + $0xc0] ss:$16 sps:$4 sm:$0xff]  }
 0x732   :  { %5728 = vpow2.f32 %v4824_v51  ;;  %v5481_v22 = vld [vmem:[#allocation23 + $0xe4] ss:$16 sps:$4 sm:$0xff]   ;;  %v5484_v13 = vld [vmem:[#allocation23 + $0xec] ss:$16 sps:$4 sm:$0xff]   ;;  %v5479_v14 = vld [vmem:[#allocation23 + $0xe0] ss:$16 sps:$4 sm:$0xff]  }
 0x733   :  { %5730 = vpow2.f32 %v4825_v24  ;;  %v5482_v15 = vld [vmem:[#allocation23 + $0xe8] ss:$16 sps:$4 sm:$0xff]   ;;  %v5487_v17 = vld [vmem:[#allocation23 + $0x104] ss:$16 sps:$4 sm:$0xff]   ;;  %v5490_v62 = vld [vmem:[#allocation23 + $0x10c] ss:$16 sps:$4 sm:$0xff]  }
 0x734   :  { %5732 = vtanh.f32 %v3336_v34  ;;  %v5476_v34 = vld [vmem:[#allocation23 + $0xc8] ss:$16 sps:$4 sm:$0xff]   ;;  %v5485_v16 = vld [vmem:[#allocation23 + $0x100] ss:$16 sps:$4 sm:$0xff]  }
 0x735   :  { %v5488_v51 = vld [vmem:[#allocation23 + $0x108] ss:$16 sps:$4 sm:$0xff]  }
 0x736   :  { %v5725_v18 = vpop.eup %5724  ;;  %v5494_v24 = vld [vmem:[#allocation23 + $0x128] ss:$16 sps:$4 sm:$0xff]  }
 0x737   :  { %v3226_v49 = vmul.f32 %v5725_v18, %v5723_v44  ;;  %v5493_v44 = vld [vmem:[#allocation23 + $0x124] ss:$16 sps:$4 sm:$0xff]   ;;  %v5496_v18 = vld [vmem:[#allocation23 + $0x12c] ss:$16 sps:$4 sm:$0xff]  }
 0x739   :  { %3227 = vst [vmem:[#allocation2 + $0x4] sm:$0x3] %v3226_v49  ;;  %v3366_v23 = vrot.slane %v3226_v49, 2  ;;  %v5491_v49 = vld [vmem:[#allocation23 + $0x120] ss:$16 sps:$4 sm:$0xff]  }
 0x73b   :  { %v5727_v59 = vpop.eup %5726  ;;  %v3369_v25 = vpack.c.bf16 %v3366_v23, %v3366_v23  ;;  %v5499_v23 = vld [vmem:[#allocation23 + $0x144] ss:$16 sps:$4 sm:$0xff]  }
 0x73c   :  { %v5729_v26 = vpop.eup %5728  ;;  %v3341_v0 = vadd.f32 1.0, %v5727_v59  ;;  %v5502_v59 = vld [vmem:[#allocation23 + $0x14c] ss:$16 sps:$4 sm:$0xff]  }
 0x73d   :  { %v3347_v1 = vadd.f32 1.0, %v5729_v26  ;;  %v3373_v40 = vrot.slane %v3369_v25, 3  ;;  %v5731_v47 = vpop.eup %5730  ;;  %v5497_v25 = vld [vmem:[#allocation23 + $0x140] ss:$16 sps:$4 sm:$0xff]   ;;  %v5500_v26 = vld [vmem:[#allocation23 + $0x148] ss:$16 sps:$4 sm:$0xff]  }
 0x73e   :  { %5734 = vrcp.f32 %v3341_v0  ;;  %v5733_v57 = vpop.eup %5732  ;;  %v3354_v21 = vadd.f32 1.0, %v5731_v47  ;;  %v5505_v0 = vld [vmem:[#allocation23 + $0x164] ss:$16 sps:$4 sm:$0xff]   ;;  %v5506_v47 = vld [vmem:[#allocation23 + $0x168] ss:$16 sps:$4 sm:$0xff]  }
 0x73f   :  { %5736 = vrcp.f32 %v3347_v1  ;;  %3408 = vmatprep.mubr.bf16.mxu0 %v3373_v40  ;;  %3449 = vmatprep.mubr.bf16.mxu1 %v3373_v40  ;;  %v5508_v1 = vld [vmem:[#allocation23 + $0x16c] ss:$16 sps:$4 sm:$0xff]   ;;  %v5503_v40 = vld [vmem:[#allocation23 + $0x160] ss:$16 sps:$4 sm:$0xff]  }
 0x740   :  { %5738 = vrcp.f32 %v3354_v21  ;;  %v5517_v21 = vld [vmem:[#allocation23 + $0x1a4] ss:$16 sps:$4 sm:$0xff]  }
 0x748   :  { %v5735_v42 = vpop.eup %5734 }
 0x749   :  { %v5737_v55 = vpop.eup %5736  ;;  %v3361_v43 = vmul.f32 %v5735_v42, %v5733_v57  ;;  %v5511_v57 = vld [vmem:[#allocation23 + $0x184] ss:$16 sps:$4 sm:$0xff]   ;;  %v5514_v42 = vld [vmem:[#allocation23 + $0x18c] ss:$16 sps:$4 sm:$0xff]  }
 0x74a   :  { %v3360_v50 = vmul.f32 %v5737_v55, %v3358_v19  ;;  %v5739_v28 = vpop.eup %5738  ;;  %v5509_v19 = vld [vmem:[#allocation23 + $0x180] ss:$16 sps:$4 sm:$0xff]   ;;  %v5512_v55 = vld [vmem:[#allocation23 + $0x188] ss:$16 sps:$4 sm:$0xff]  }
 0x74c   :  { %v3362_v7 = vadd.f32 %v3361_v43, %v3360_v50  ;;  %v5515_v43 = vld [vmem:[#allocation23 + $0x1a0] ss:$16 sps:$4 sm:$0xff]   ;;  %v5518_v50 = vld [vmem:[#allocation23 + $0x1a8] ss:$16 sps:$4 sm:$0xff]  }
 0x74e   :  { %4490 = vst [vmem:[#allocation27 - $0x6] sm:$0xc0] %v3362_v7  ;;  %5740 = vtanh.f32 %v3362_v7  ;;  %v5520_v7 = vld [vmem:[#allocation23 + $0x1ac] ss:$16 sps:$4 sm:$0xff]  }
 0x758   :  { %v5741_v46 = vpop.eup %5740 }
 0x759   :  { %v3364_v29 = vmul.f32 %v5741_v46, %v5739_v28  ;;  %v5523_v28 = vld [vmem:[#allocation23 + $0x1c4] ss:$16 sps:$4 sm:$0xff]   ;;  %v5526_v46 = vld [vmem:[#allocation23 + $0x1cc] ss:$16 sps:$4 sm:$0xff]  }
 0x75b   :  { %v3368_v30 = vpack.c.bf16 %v3364_v29, %v3364_v29  ;;  %4487 = vst [vmem:[#allocation25 - $0x6] sm:$0xc0] %v3364_v29  ;;  %v5521_v29 = vld [vmem:[#allocation23 + $0x1c0] ss:$16 sps:$4 sm:$0xff]  }
 0x75d   :  { %v3372_v36 = vrot.slane %v3368_v30, 3  ;;  %v5524_v30 = vld [vmem:[#allocation23 + $0x1c8] ss:$16 sps:$4 sm:$0xff]  }
 0x75f   :  { %3409 = vmatmul.mubr.bf16.vlgmr.msra.gmra.mrb[36].mxu0 %v3372_v36  ;;  %3450 = vmatmul.mubr.bf16.vlgmr.msra.gmra.mrb[36].mxu1 %v3372_v36  ;;  %v5527_v36 = vld [vmem:[#allocation23 + $0x1e0] ss:$16 sps:$4 sm:$0xff]  }
 0x760   :  { %4301 = vmatpush1.bf16.msra.mxu0 %v5437_v31  ;;  %4383 = vmatpush1.bf16.msra.mxu1 %v5440_v35  ;;  %v5529_v31 = vld [vmem:[#allocation23 + $0x1e4] ss:$16 sps:$4 sm:$0xff]   ;;  %v5532_v35 = vld [vmem:[#allocation23 + $0x1ec] ss:$16 sps:$4 sm:$0xff]  }
 0x761   :  { %4302 = vmatprep.subr.bf16.mxu0 %v5445_v32  ;;  %4384 = vmatprep.subr.bf16.mxu1 %v5448_v38  ;;  %v5530_v32 = vld [vmem:[#allocation23 + $0x1e8] ss:$16 sps:$4 sm:$0xff]   ;;  %v5535_v38 = vld [vmem:[#allocation23 + $0x204] ss:$16 sps:$4 sm:$0xff]  }
 0x764   :  { %4303 = vmatpush1.bf16.msra.mxu0 %v5443_v39  ;;  %4385 = vmatpush1.bf16.msra.mxu1 %v5446_v41  ;;  %v5538_v39 = vld [vmem:[#allocation23 + $0x20c] ss:$16 sps:$4 sm:$0xff]  }
 0x765   :  { %4304 = vmatprep.subr.bf16.mxu0 %v5451_v27  ;;  %4386 = vmatprep.subr.bf16.mxu1 %v5454_v11 }
 0x768   :  { %4305 = vmatpush1.bf16.msra.mxu0 %v5449_v45  ;;  %4387 = vmatpush1.bf16.msra.mxu1 %v5452_v4 }
 0x769   :  { %4306 = vmatprep.subr.bf16.mxu0 %v5457_v48  ;;  %4388 = vmatprep.subr.bf16.mxu1 %v5460_v52 }
 0x76c   :  { %4307 = vmatpush1.bf16.msra.mxu0 %v5455_v54  ;;  %4389 = vmatpush1.bf16.msra.mxu1 %v5458_v56 }
 0x76d   :  { %4308 = vmatprep.subr.bf16.mxu0 %v5463_v60  ;;  %4390 = vmatprep.subr.bf16.mxu1 %v5466_v61 }
 0x770   :  { %4309 = vmatpush1.bf16.msra.mxu0 %v5461_v63  ;;  %4391 = vmatpush1.bf16.msra.mxu1 %v5464_v2 }
 0x771   :  { %4310 = vmatprep.subr.bf16.mxu0 %v5469_v5  ;;  %4392 = vmatprep.subr.bf16.mxu1 %v5472_v58 }
 0x774   :  { %4311 = vmatpush1.bf16.msra.mxu0 %v5467_v6  ;;  %4393 = vmatpush1.bf16.msra.mxu1 %v5470_v8 }
 0x775   :  { %4312 = vmatprep.subr.bf16.mxu0 %v5475_v9  ;;  %4394 = vmatprep.subr.bf16.mxu1 %v5478_v10 }
 0x778   :  { %4313 = vmatpush1.bf16.msra.mxu0 %v5473_v12  ;;  %4395 = vmatpush1.bf16.msra.mxu1 %v5476_v34 }
 0x779   :  { %4314 = vmatprep.subr.bf16.mxu0 %v5481_v22  ;;  %4396 = vmatprep.subr.bf16.mxu1 %v5484_v13 }
 0x77c   :  { %4315 = vmatpush1.bf16.msra.mxu0 %v5479_v14  ;;  %4397 = vmatpush1.bf16.msra.mxu1 %v5482_v15  ;;  %v6257_v15 = vmov 1983009808  }
 0x77d   :  { %4316 = vmatprep.subr.bf16.mxu0 %v5487_v17  ;;  %4398 = vmatprep.subr.bf16.mxu1 %v5490_v62  ;;  %v3487_v17 = vunpack.c.l.s4 %v6257_v15  ;;  %v5606_v15 = vld [vmem:[#allocation23 + $0x380] ss:$16 sps:$4 sm:$0xff]  }
 0x780   :  { %4317 = vmatpush1.bf16.msra.mxu0 %v5485_v16  ;;  %4399 = vmatpush1.bf16.msra.mxu1 %v5488_v51  ;;  %v3488_v51 = vunpack.c.0.s8 %v3487_v17  ;;  %v5609_v17 = vld [vmem:[#allocation23 + $0x388] ss:$16 sps:$4 sm:$0xff]  }
 0x781   :  { %4318 = vmatprep.subr.bf16.mxu0 %v5493_v44  ;;  %4400 = vmatprep.subr.bf16.mxu1 %v5496_v18  ;;  %v7784_v44 = vld [vmem:[#allocation37_spill] sm:$0xff] }
 0x782   :  { %v7342_v18 = vsub.s32 %v3488_v51, %v7784_v44  ;;  %v5612_v51 = vld [vmem:[#allocation23 + $0x3a0] ss:$16 sps:$4 sm:$0xff]   ;;  %v5615_v44 = vld [vmem:[#allocation23 + $0x3a8] ss:$16 sps:$4 sm:$0xff]  }
 0x784   :  { %4319 = vmatpush1.bf16.msra.mxu0 %v5491_v49  ;;  %4401 = vmatpush1.bf16.msra.mxu1 %v5494_v24 }
 0x785   :  { %4320 = vmatprep.subr.bf16.mxu0 %v5499_v23  ;;  %4402 = vmatprep.subr.bf16.mxu1 %v5502_v59 }
 0x788   :  { %4321 = vmatpush1.bf16.msra.mxu0 %v5497_v25  ;;  %4403 = vmatpush1.bf16.msra.mxu1 %v5500_v26  ;;  %v5533_v26 = vld [vmem:[#allocation23 + $0x200] ss:$16 sps:$4 sm:$0xff]  }
 0x789   :  { %4322 = vmatprep.subr.bf16.mxu0 %v5505_v0  ;;  %4404 = vmatprep.subr.bf16.mxu1 %v5508_v1  ;;  %v5536_v0 = vld [vmem:[#allocation23 + $0x208] ss:$16 sps:$4 sm:$0xff]  }
 0x78c   :  { %4323 = vmatpush1.bf16.msra.mxu0 %v5503_v40  ;;  %4405 = vmatpush1.bf16.msra.mxu1 %v5506_v47 }
 0x78d   :  { %4324 = vmatprep.subr.bf16.mxu0 %v5511_v57  ;;  %4406 = vmatprep.subr.bf16.mxu1 %v5514_v42  ;;  %v5542_v57 = vld [vmem:[#allocation23 + $0x224] ss:$16 sps:$4 sm:$0xff]   ;;  %v5545_v42 = vld [vmem:[#allocation23 + $0x22c] ss:$16 sps:$4 sm:$0xff]  }
 0x790   :  { %4325 = vmatpush1.bf16.msra.mxu0 %v5509_v19  ;;  %4407 = vmatpush1.bf16.msra.mxu1 %v5512_v55  ;;  %v5540_v19 = vld [vmem:[#allocation23 + $0x220] ss:$16 sps:$4 sm:$0xff]   ;;  %v5543_v55 = vld [vmem:[#allocation23 + $0x228] ss:$16 sps:$4 sm:$0xff]  }
 0x791   :  { %4326 = vmatprep.subr.bf16.mxu0 %v5517_v21  ;;  %4408 = vmatprep.subr.bf16.mxu1 %v5520_v7  ;;  %v5551_v21 = vld [vmem:[#allocation23 + $0x24c] ss:$16 sps:$4 sm:$0xff]   ;;  %v5549_v7 = vld [vmem:[#allocation23 + $0x248] ss:$16 sps:$4 sm:$0xff]  }
 0x794   :  { %4327 = vmatpush1.bf16.msra.mxu0 %v5515_v43  ;;  %4409 = vmatpush1.bf16.msra.mxu1 %v5518_v50  ;;  %v5548_v43 = vld [vmem:[#allocation23 + $0x244] ss:$16 sps:$4 sm:$0xff]   ;;  %v5546_v50 = vld [vmem:[#allocation23 + $0x240] ss:$16 sps:$4 sm:$0xff]  }
 0x795   :  { %4328 = vmatprep.subr.bf16.mxu0 %v5523_v28  ;;  %4410 = vmatprep.subr.bf16.mxu1 %v5526_v46  ;;  %v5554_v28 = vld [vmem:[#allocation23 + $0x264] ss:$16 sps:$4 sm:$0xff]   ;;  %v5557_v46 = vld [vmem:[#allocation23 + $0x26c] ss:$16 sps:$4 sm:$0xff]  }
 0x798   :  { %4329 = vmatpush1.bf16.msra.mxu0 %v5521_v29  ;;  %4411 = vmatpush1.bf16.msra.mxu1 %v5524_v30  ;;  %v5552_v29 = vld [vmem:[#allocation23 + $0x260] ss:$16 sps:$4 sm:$0xff]   ;;  %v5555_v30 = vld [vmem:[#allocation23 + $0x268] ss:$16 sps:$4 sm:$0xff]  }
 0x799   :  { %4330 = vmatprep.subr.bf16.mxu0 %v5529_v31  ;;  %4412 = vmatprep.subr.bf16.mxu1 %v5532_v35  ;;  %v5560_v31 = vld [vmem:[#allocation23 + $0x284] ss:$16 sps:$4 sm:$0xff]   ;;  %v5563_v35 = vld [vmem:[#allocation23 + $0x28c] ss:$16 sps:$4 sm:$0xff]  }
 0x79c   :  { %4331 = vmatpush1.bf16.msra.mxu0 %v5527_v36  ;;  %4413 = vmatpush1.bf16.msra.mxu1 %v5530_v32  ;;  %v5558_v36 = vld [vmem:[#allocation23 + $0x280] ss:$16 sps:$4 sm:$0xff]   ;;  %v5561_v32 = vld [vmem:[#allocation23 + $0x288] ss:$16 sps:$4 sm:$0xff]  }
 0x79d   :  { %4341 = vmatprep.subr.bf16.mxu0 %v5535_v38  ;;  %4423 = vmatprep.subr.bf16.mxu1 %v5538_v39  ;;  %v5566_v38 = vld [vmem:[#allocation23 + $0x2a4] ss:$16 sps:$4 sm:$0xff]   ;;  %v5569_v39 = vld [vmem:[#allocation23 + $0x2ac] ss:$16 sps:$4 sm:$0xff]  }
 0x832   :  { %v3410_v41 = vpop.f32.mrb[36].mxu0  ;;  %v3451_v27 = vpop.f32.mrb[36].mxu1 }
 0x833   :  { %v3411_v11 = vadd.f32 %v3410_v41, %v7771_v20  ;;  %v3412_v45 = vpop.f32.mrb[37].mxu0  ;;  %v3453_v4 = vpop.f32.mrb[37].mxu1  ;;  %v3452_v58 = vadd.f32 %v3451_v27, %v7774_v37  ;;  %v5564_v41 = vld [vmem:[#allocation23 + $0x2a0] ss:$16 sps:$4 sm:$0xff]   ;;  %v5567_v27 = vld [vmem:[#allocation23 + $0x2a8] ss:$16 sps:$4 sm:$0xff]  }
 0x834   :  { %v3413_v48 = vadd.f32 %v3412_v45, %v7772_v3  ;;  %v3414_v52 = vpop.f32.mrb[38].mxu0  ;;  %v3455_v54 = vpop.f32.mrb[38].mxu1  ;;  %v3454_v2 = vadd.f32 %v3453_v4, %v7773_v33  ;;  %v5575_v45 = vld [vmem:[#allocation23 + $0x2cc] ss:$16 sps:$4 sm:$0xff]   ;;  %v5570_v4 = vld [vmem:[#allocation23 + $0x2c0] ss:$16 sps:$4 sm:$0xff]  }
 0x835   :  { %v4826_v56 = vmul.f32 -1.442695, %v3411_v11  ;;  %v3415_v60 = vpop.f32.mrb[39].mxu0  ;;  %v3456_v61 = vpop.f32.mrb[39].mxu1  ;;  %v5572_v11 = vld [vmem:[#allocation23 + $0x2c4] ss:$16 sps:$4 sm:$0xff]  }
 0x836   :  { %v4827_v63 = vmul.f32 -1.442695, %v3413_v48  ;;  %v4828_v5 = vmul.f32 -1.442695, %v3454_v2  ;;  %v5573_v48 = vld [vmem:[#allocation23 + $0x2c8] ss:$16 sps:$4 sm:$0xff]  }
 0x837   :  { %5742 = vpow2.f32 %v4826_v56  ;;  %v5578_v52 = vld [vmem:[#allocation23 + $0x2e4] ss:$16 sps:$4 sm:$0xff]   ;;  %v5581_v54 = vld [vmem:[#allocation23 + $0x2ec] ss:$16 sps:$4 sm:$0xff]   ;;  %v5576_v56 = vld [vmem:[#allocation23 + $0x2e0] ss:$16 sps:$4 sm:$0xff]  }
 0x838   :  { %5744 = vpow2.f32 %v4827_v63  ;;  %v5579_v60 = vld [vmem:[#allocation23 + $0x2e8] ss:$16 sps:$4 sm:$0xff]   ;;  %v5584_v61 = vld [vmem:[#allocation23 + $0x304] ss:$16 sps:$4 sm:$0xff]   ;;  %v5587_v63 = vld [vmem:[#allocation23 + $0x30c] ss:$16 sps:$4 sm:$0xff]  }
 0x839   :  { %5746 = vpow2.f32 %v4828_v5  ;;  %v5582_v2 = vld [vmem:[#allocation23 + $0x300] ss:$16 sps:$4 sm:$0xff]   ;;  %v5585_v5 = vld [vmem:[#allocation23 + $0x308] ss:$16 sps:$4 sm:$0xff]  }
 0x83a   :  { %5748 = vtanh.f32 %v3452_v58  ;;  %v5590_v58 = vld [vmem:[#allocation23 + $0x324] ss:$16 sps:$4 sm:$0xff]  }
 0x841   :  { %v5743_v6 = vpop.eup %5742 }
 0x842   :  { %v5745_v8 = vpop.eup %5744  ;;  %v3461_v20 = vadd.f32 1.0, %v5743_v6  ;;  %v5593_v6 = vld [vmem:[#allocation23 + $0x32c] ss:$16 sps:$4 sm:$0xff]  }
 0x843   :  { %v3467_v9 = vadd.f32 1.0, %v5745_v8  ;;  %v5747_v3 = vpop.eup %5746  ;;  %v5588_v8 = vld [vmem:[#allocation23 + $0x320] ss:$16 sps:$4 sm:$0xff]  }
 0x844   :  { %5750 = vrcp.f32 %v3461_v20  ;;  %v5749_v10 = vpop.eup %5748  ;;  %v3474_v13 = vadd.f32 1.0, %v5747_v3  ;;  %v5591_v20 = vld [vmem:[#allocation23 + $0x328] ss:$16 sps:$4 sm:$0xff]   ;;  %v5599_v3 = vld [vmem:[#allocation23 + $0x34c] ss:$16 sps:$4 sm:$0xff]  }
 0x845   :  { %5752 = vrcp.f32 %v3467_v9  ;;  %v5596_v9 = vld [vmem:[#allocation23 + $0x344] ss:$16 sps:$4 sm:$0xff]  }
 0x846   :  { %5754 = vrcp.f32 %v3474_v13  ;;  %v5600_v13 = vld [vmem:[#allocation23 + $0x360] ss:$16 sps:$4 sm:$0xff]  }
 0x84e   :  { %v5751_v12 = vpop.eup %5750 }
 0x84f   :  { %v5753_v34 = vpop.eup %5752  ;;  %v3478_v22 = vmul.f32 %v5751_v12, %v5749_v10  ;;  %v5594_v10 = vld [vmem:[#allocation23 + $0x340] ss:$16 sps:$4 sm:$0xff]   ;;  %v5597_v12 = vld [vmem:[#allocation23 + $0x348] ss:$16 sps:$4 sm:$0xff]  }
 0x850   :  { %v3477_v14 = vmul.f32 %v5753_v34, %v7328_v53  ;;  %v5755_v37 = vpop.eup %5754  ;;  %v5602_v34 = vld [vmem:[#allocation23 + $0x364] ss:$16 sps:$4 sm:$0xff]  }
 0x852   :  { %v3479_v33 = vadd.f32 %v3478_v22, %v3477_v14  ;;  %v5605_v22 = vld [vmem:[#allocation23 + $0x36c] ss:$16 sps:$4 sm:$0xff]   ;;  %v5603_v14 = vld [vmem:[#allocation23 + $0x368] ss:$16 sps:$4 sm:$0xff]  }
 0x854   :  { %5756 = vtanh.f32 %v3479_v33  ;;  %4492 = vst [vmem:[#allocation27 + $0x2] sm:$0x3] %v3479_v33  ;;  %v5608_v33 = vld [vmem:[#allocation23 + $0x384] ss:$16 sps:$4 sm:$0xff]  }
 0x85e   :  { %v5757_v62 = vpop.eup %5756 }
 0x85f   :  { %v3481_v16 = vmul.f32 %v5757_v62, %v5755_v37  ;;  %v5611_v37 = vld [vmem:[#allocation23 + $0x38c] ss:$16 sps:$4 sm:$0xff]   ;;  %v5614_v62 = vld [vmem:[#allocation23 + $0x3a4] ss:$16 sps:$4 sm:$0xff]  }
 0x861   :  { %3482 = vst [vmem:[#allocation2 + $0x6] sm:$0x3] %v3481_v16  ;;  %4489 = vst [vmem:[#allocation25 + $0x2] sm:$0x3] %v3481_v16  ;;  %v5617_v16 = vld [vmem:[#allocation23 + $0x3ac] ss:$16 sps:$4 sm:$0xff]  }
 0x868   :  { %v3483_v49 = vld [vmem:[#allocation2] sm:$0xff] }
 0x869   :  { %v3492_v24 = vrot.slane %v3483_v49, %v7342_v18  ;;  %v3485_v23 = vcombine.high %v3483_v49, %v3483_v49  ;;  %v5620_v49 = vld [vmem:[#allocation23 + $0x3c4] ss:$16 sps:$4 sm:$0xff]  }
 0x86b   :  { %v3500_v53 = vcombine.high %v3492_v24, %v3492_v24  ;;  %v7346_v59 = vrot.slane %v3485_v23, %v7342_v18  ;;  %v3506_v40 = vpack.c.bf16 %v3492_v24, %v3492_v24  ;;  %v5623_v24 = vld [vmem:[#allocation23 + $0x3cc] ss:$16 sps:$4 sm:$0xff]   ;;  %v5618_v23 = vld [vmem:[#allocation23 + $0x3c0] ss:$16 sps:$4 sm:$0xff]  }
 0x86d   :  { %v3507_v25 = vpack.c.bf16 %v3500_v53, %v3500_v53  ;;  %v3501_v1 = vcombine.high %v7346_v59, %v7346_v59  ;;  %v5621_v53 = vld [vmem:[#allocation23 + $0x3c8] ss:$16 sps:$4 sm:$0xff]  }
 0x86f   :  { %4332 = vmatprep.mubr.bf16.mxu0 %v3507_v25  ;;  %4414 = vmatprep.mubr.bf16.mxu1 %v3507_v25  ;;  %v3509_v47 = vpack.c.bf16 %v3501_v1, %v3501_v1  ;;  %v5626_v25 = vld [vmem:[#allocation23 + $0x3e4] ss:$16 sps:$4 sm:$0xff]   ;;  %v5627_v1 = vld [vmem:[#allocation23 + $0x3e8] ss:$16 sps:$4 sm:$0xff]  }
 0x870   :  { %4333 = vmatmul.mubr.bf16.vlgmr.msra.gmra.mrb[40].mxu0 %v3506_v40  ;;  %4415 = vmatmul.mubr.bf16.vlgmr.msra.gmra.mrb[40].mxu1 %v3506_v40  ;;  %v3508_v40 = vpack.c.bf16 %v7346_v59, %v7346_v59 }
 0x871   :  { %4342 = vmatpush1.bf16.msra.mxu0 %v5533_v26  ;;  %4424 = vmatpush1.bf16.msra.mxu1 %v5536_v0  ;;  %v5629_v26 = vld [vmem:[#allocation23 + $0x3ec] ss:$16 sps:$4 sm:$0xff]   ;;  %v5624_v0 = vld [vmem:[#allocation23 + $0x3e0] ss:$16 sps:$4 sm:$0xff]  }
 0x872   :  { %4373 = vmatprep.mubr.bf16.mxu0 %v3509_v47  ;;  %4455 = vmatprep.mubr.bf16.mxu1 %v3509_v47 }
 0x873   :  { %4343 = vmatprep.subr.bf16.mxu0 %v5542_v57  ;;  %4425 = vmatprep.subr.bf16.mxu1 %v5545_v42 }
 0x875   :  { %4344 = vmatpush1.bf16.msra.mxu0 %v5540_v19  ;;  %4426 = vmatpush1.bf16.msra.mxu1 %v5543_v55 }
 0x876   :  { %4345 = vmatprep.subr.bf16.mxu0 %v5548_v43  ;;  %4427 = vmatprep.subr.bf16.mxu1 %v5551_v21 }
 0x879   :  { %4346 = vmatpush1.bf16.msra.mxu0 %v5546_v50  ;;  %4428 = vmatpush1.bf16.msra.mxu1 %v5549_v7 }
 0x87a   :  { %4347 = vmatprep.subr.bf16.mxu0 %v5554_v28  ;;  %4429 = vmatprep.subr.bf16.mxu1 %v5557_v46 }
 0x87d   :  { %4348 = vmatpush1.bf16.msra.mxu0 %v5552_v29  ;;  %4430 = vmatpush1.bf16.msra.mxu1 %v5555_v30 }
 0x87e   :  { %4349 = vmatprep.subr.bf16.mxu0 %v5560_v31  ;;  %4431 = vmatprep.subr.bf16.mxu1 %v5563_v35 }
 0x881   :  { %4350 = vmatpush1.bf16.msra.mxu0 %v5558_v36  ;;  %4432 = vmatpush1.bf16.msra.mxu1 %v5561_v32 }
 0x882   :  { %4351 = vmatprep.subr.bf16.mxu0 %v5566_v38  ;;  %4433 = vmatprep.subr.bf16.mxu1 %v5569_v39 }
 0x885   :  { %4352 = vmatpush1.bf16.msra.mxu0 %v5564_v41  ;;  %4434 = vmatpush1.bf16.msra.mxu1 %v5567_v27 }
 0x886   :  { %4353 = vmatprep.subr.bf16.mxu0 %v5572_v11  ;;  %4435 = vmatprep.subr.bf16.mxu1 %v5575_v45 }
 0x889   :  { %4354 = vmatpush1.bf16.msra.mxu0 %v5570_v4  ;;  %4436 = vmatpush1.bf16.msra.mxu1 %v5573_v48 }
 0x88a   :  { %4355 = vmatprep.subr.bf16.mxu0 %v5578_v52  ;;  %4437 = vmatprep.subr.bf16.mxu1 %v5581_v54 }
 0x88d   :  { %4356 = vmatpush1.bf16.msra.mxu0 %v5576_v56  ;;  %4438 = vmatpush1.bf16.msra.mxu1 %v5579_v60 }
 0x88e   :  { %4357 = vmatprep.subr.bf16.mxu0 %v5584_v61  ;;  %4439 = vmatprep.subr.bf16.mxu1 %v5587_v63 }
 0x891   :  { %4358 = vmatpush1.bf16.msra.mxu0 %v5582_v2  ;;  %4440 = vmatpush1.bf16.msra.mxu1 %v5585_v5 }
 0x892   :  { %4359 = vmatprep.subr.bf16.mxu0 %v5590_v58  ;;  %4441 = vmatprep.subr.bf16.mxu1 %v5593_v6 }
 0x895   :  { %4360 = vmatpush1.bf16.msra.mxu0 %v5588_v8  ;;  %4442 = vmatpush1.bf16.msra.mxu1 %v5591_v20 }
 0x896   :  { %4361 = vmatprep.subr.bf16.mxu0 %v5596_v9  ;;  %4443 = vmatprep.subr.bf16.mxu1 %v5599_v3 }
 0x899   :  { %4362 = vmatpush1.bf16.msra.mxu0 %v5594_v10  ;;  %4444 = vmatpush1.bf16.msra.mxu1 %v5597_v12 }
 0x89a   :  { %4363 = vmatprep.subr.bf16.mxu0 %v5602_v34  ;;  %4445 = vmatprep.subr.bf16.mxu1 %v5605_v22 }
 0x89d   :  { %4364 = vmatpush1.bf16.msra.mxu0 %v5600_v13  ;;  %4446 = vmatpush1.bf16.msra.mxu1 %v5603_v14 }
 0x89e   :  { %4365 = vmatprep.subr.bf16.mxu0 %v5608_v33  ;;  %4447 = vmatprep.subr.bf16.mxu1 %v5611_v37 }
 0x8a1   :  { %4366 = vmatpush1.bf16.msra.mxu0 %v5606_v15  ;;  %4448 = vmatpush1.bf16.msra.mxu1 %v5609_v17 }
 0x8a2   :  { %4367 = vmatprep.subr.bf16.mxu0 %v5614_v62  ;;  %4449 = vmatprep.subr.bf16.mxu1 %v5617_v16 }
 0x8a5   :  { %4368 = vmatpush1.bf16.msra.mxu0 %v5612_v51  ;;  %4450 = vmatpush1.bf16.msra.mxu1 %v5615_v44 }
 0x8a6   :  { %4369 = vmatprep.subr.bf16.mxu0 %v5620_v49  ;;  %4451 = vmatprep.subr.bf16.mxu1 %v5623_v24 }
 0x8a9   :  { %4370 = vmatpush1.bf16.msra.mxu0 %v5618_v23  ;;  %4452 = vmatpush1.bf16.msra.mxu1 %v5621_v53 }
 0x8aa   :  { %4371 = vmatprep.subr.bf16.mxu0 %v5626_v25  ;;  %4453 = vmatprep.subr.bf16.mxu1 %v5629_v26 }
 0x8ad   :  { %4372 = vmatpush1.bf16.msra.mxu0 %v5624_v0  ;;  %4454 = vmatpush1.bf16.msra.mxu1 %v5627_v1 }
 0x8b0   :  { %4374 = vmatmul.mubr.bf16.vlgmr.msra.gmra.mrb[40].mxu0 %v3508_v40  ;;  %4456 = vmatmul.mubr.bf16.vlgmr.msra.gmra.mrb[40].mxu1 %v3508_v40 }
 0x8b1   :  { %6151 = shalt.err (!%p6148_p10)
}
 0x8b2   :  { %s6152_s25 = scalar_lea.hbm %s7417_s20, 64 }
 0x8b3   :  { %p6153_p11 = scmp.ne.s32.totalorder %s7417_s20, %s6152_s25  ;;  %p6156_p12 = scmp.lt.u32.totalorder %s6152_s25, %s7417_s20 }
 0x8b5   :  { %p6158_p13 = pnand %p6156_p12, %p6153_p11 }
 0x8b7   :  { %6161 = shalt.err (!%p6158_p13)
}
 0x8b8   :  { %s6259_s17 = smov 32   ;;  %s6260_s2 = smov 2  }
 0x8b9   :  { %4514 = dma.vmem_to_hbm [thread:$0]  %s4509_s24, 64, %s7417_s20, [#allocation26], %s6259_s17, %s6259_s17, %s6260_s2  }
 0x8ba   :  { %s6261_s7 = smov [#allocation27]  }
 0x8bb   :  { %s4520_s6 = sshll.u32 %s6261_s7, 4  ;;  %s4521_s6 = int_to_ptr.vmem [resolvable:$true] %s4520_s6 }
 0x8bc   :  { %s6162_s26 = scalar_lea.vmem %s4521_s6, 64  ;;  %p6167_p1 = scmp.lt.s32.totalorder %s4521_s6, %s4521_s6 }
 0x8bd   :  { %p6163_p0 = scmp.ne.s32.totalorder %s4521_s6, %s6162_s26  ;;  %p6168_p2 = scmp.lt.s32.totalorder %s6162_s26, %s6162_s26 }
 0x8bf   :  { %p6169_p3 = por %p6168_p2, %p6167_p1 }
 0x8c1   :  { %p6170_p4 = pnand %p6169_p3, %p6163_p0 }
 0x8c3   :  { %6173 = shalt.err (!%p6170_p4)
}
 0x8c4   :  { %s6174_s5 = scalar_lea.hbm %s7418_s21, 64 }
 0x8c5   :  { %p6175_p5 = scmp.ne.s32.totalorder %s7418_s21, %s6174_s5  ;;  %p6178_p6 = scmp.lt.u32.totalorder %s6174_s5, %s7418_s21 }
 0x8c7   :  { %p6180_p7 = pnand %p6178_p6, %p6175_p5 }
 0x8c9   :  { %6183 = shalt.err (!%p6180_p7)
}
 0x8ca   :  { %4526 = dma.vmem_to_hbm [thread:$0]  %s4521_s6, 64, %s7418_s21, [#allocation26], %s6259_s17, %s6259_s17, %s6260_s2   ;;  %v7785_v47 = vld [vmem:[#allocation38_spill] sm:$0xff]  ;;  %v7786_v42 = vld [vmem:[#allocation40_spill] sm:$0xff]  ;;  %v7787_v55 = vld [vmem:[#allocation39_spill] sm:$0xff] }
 0x8cb   :  { %v3638_v59 = vld [vmem:[%s7415_s18] sm:$0xf]  ;;  %v7788_v21 = vld [vmem:[#allocation41_spill] sm:$0xff]  ;;  %s6262_s18 = smov [#allocation24]  }
 0x8cc   :  { %v3643_v57 = vrot.slane %v3638_v59, %v7785_v47  ;;  %v3651_v19 = vrot.slane %v3638_v59, %v7786_v42  ;;  %v3647_v43 = vrot.slane %v3638_v59, %v7787_v55  ;;  %v3655_v50 = vrot.slane %v3638_v59, %v7788_v21  ;;  %s4499_s21 = sshll.u32 %s6262_s18, 4  ;;  %s4500_s21 = int_to_ptr.vmem [resolvable:$true] %s4499_s21 }
 0x8cd   :  { %s6184_s16 = scalar_lea.vmem %s4500_s21, 128  ;;  %p6189_p9 = scmp.lt.s32.totalorder %s4500_s21, %s4500_s21 }
 0x8ce   :  { %p6185_p8 = scmp.ne.s32.totalorder %s4500_s21, %s6184_s16  ;;  %p6190_p10 = scmp.lt.s32.totalorder %s6184_s16, %s6184_s16 }
 0x8d0   :  { %p6191_p11 = por %p6190_p10, %p6189_p9 }
 0x8d2   :  { %p6192_p12 = pnand %p6191_p11, %p6185_p8 }
 0x983   :  { %v4375_v7 = vpop.f32.mrb[40].mxu0  ;;  %v4457_v28 = vpop.f32.mrb[40].mxu1 }
 0x984   :  { %v4957_v46 = vadd.f32 %v4375_v7, %v3643_v57  ;;  %v4959_v29 = vadd.f32 %v4457_v28, %v3651_v19  ;;  %v4377_v30 = vpop.f32.mrb[41].mxu0  ;;  %v4459_v31 = vpop.f32.mrb[41].mxu1 }
 0x985   :  { %v4958_v35 = vadd.f32 %v4377_v30, %v3647_v43  ;;  %v4960_v36 = vadd.f32 %v4459_v31, %v3655_v50  ;;  %v4379_v32 = vpop.f32.mrb[42].mxu0  ;;  %v4461_v38 = vpop.f32.mrb[42].mxu1 }
 0x986   :  { %v4380_v39 = vpop.f32.mrb[43].mxu0  ;;  %v4462_v41 = vpop.f32.mrb[43].mxu1 }
 0x987   :  { %v4468_v27 = vcombine.low %v4957_v46, %v4958_v35  ;;  %v4469_v11 = vcombine.low %v4959_v29, %v4960_v36 }
 0x989   :  { %v4476_v45 = vrot.slane %v4468_v27, %v7342_v18  ;;  %v4483_v4 = vrot.slane %v4469_v11, %v7342_v18 }
 0x98b   :  { %v4484_v48 = vcombine.low %v4476_v45, %v4483_v4 }
 0x98d   :  { %4486 = vst [vmem:[#allocation24] sm:$0xff] %v4484_v48 }
 0x98e   :  { %6195 = shalt.err (!%p6192_p12)
}
 0x98f   :  { %s6196_s28 = scalar_lea.hbm %s7416_s19, 128 }
 0x990   :  { %p6197_p13 = scmp.ne.s32.totalorder %s7416_s19, %s6196_s28  ;;  %p6200_p0 = scmp.lt.u32.totalorder %s6196_s28, %s7416_s19 }
 0x992   :  { %p6202_p1 = pnand %p6200_p0, %p6197_p13 }
 0x994   :  { %6205 = shalt.err (!%p6202_p1)
}
 0x995   :  { %4502 = dma.vmem_to_hbm [thread:$0]  %s4500_s21, 128, %s7416_s19, [#allocation5]  }
 0x996   :  { %6220 = dma.done.wait [#allocation5], 128  }
 0x997   :  { %6221 = vsyncadd [#allocation5], 4294967168 }
 0x998   :  { %6222 = dma.done.wait [#allocation26], 128  }
 0x999   :  { %6223 = vsyncadd [#allocation26], 4294967168 }
 0x99a   :  { %4536 = vsyncpa [#allocation4], 1 }
 0x99b   :  { %4537 = vsyncpa [#allocation7], 1 }
 0x99c   :  { %4538 = vsyncpa [#allocation10], 1 }
 0x99d   :  { %4539 = vsyncpa [#allocation13], 1 }
 0x99e   :  { %4540 = vsyncpa [#allocation16], 1 }
 0x99f   :  { %4541 = vsyncpa [#allocation19], 1 }
 0x9a0   :  { %4542 = vsyncpa [#allocation22], 1 }
 0x9a1   :  { %4543 = vsyncpa [#allocation5], 1 }
 0x9a2   :  { %4544 = vsyncpa [#allocation26], 1 }

</bundles_post_ra>
